<compile_context>
chip_gen: v7x
topology: tpu7x:2x2x1
jax: 0.10.0
libtpu: 0.0.40
codegen_flags: <defaults>
</compile_context>

<pallas_src>
import functools

import jax
import jax.numpy as jnp
from jax.experimental import pallas as pl
from jax.experimental.pallas import tpu as pltpu


def _bottleneck_kernel(H, W, width, pad, dilation,
                       xpad_ref, xres_ref,
                       w1_ref, b1_ref, w2_ref, b2_ref, w3_ref, b3_ref,
                       o_ref, ypad_ref):
    Hp = H + 2 * pad
    Wp = W + 2 * pad

    # ---- conv1 (1x1) + folded BN1 + ReLU, computed on the zero-padded token grid.
    xp = xpad_ref[...]                                               # (Hp*Wp, Cin)
    y1 = jnp.dot(xp, w1_ref[...], preferred_element_type=jnp.float32) + b1_ref[...]
    y1 = jnp.maximum(y1, 0.0)                                        # (Hp*Wp, width)

    # Force the halo back to exact zeros (relu(bias) != 0 there) so the 5x5 conv
    # sees true zero padding.  Mask built from a static 3-D iota (no div/mod).
    row = jax.lax.broadcasted_iota(jnp.int32, (Hp, Wp, 1), 0)
    col = jax.lax.broadcasted_iota(jnp.int32, (Hp, Wp, 1), 1)
    interior = ((row >= pad) & (row < pad + H) & (col >= pad) & (col < pad + W))
    y1p = y1.reshape(Hp, Wp, width) * interior.astype(jnp.float32)

    # Single full-tile store of the padded activation into VMEM scratch.
    ypad_ref[...] = y1p

    # ---- conv2 (5x5, dilation d, stride 1, 'same') + folded BN2 + ReLU:
    # 25 shifted matmuls accumulated in f32 (weights already (in, out) per tap).
    acc = jnp.zeros((H * W, width), dtype=jnp.float32)
    for ki in range(5):
        for kj in range(5):
            r0 = ki * dilation
            c0 = kj * dilation
            patch = ypad_ref[r0:r0 + H, c0:c0 + W, :]                # (H, W, width)
            acc = acc + jnp.dot(patch.reshape(H * W, width),
                                w2_ref[ki * 5 + kj],
                                preferred_element_type=jnp.float32)
    y2 = jnp.maximum(acc + b2_ref[...], 0.0)                         # (H*W, width)

    # ---- conv3 (1x1) + folded BN3 + residual + ReLU.
    y3 = jnp.dot(y2, w3_ref[...], preferred_element_type=jnp.float32) + b3_ref[...]
    out = jnp.maximum(y3 + xres_ref[...], 0.0)                       # (H*W, planes)
    o_ref[...] = out.astype(o_ref.dtype)


def _fold_bn_into_conv(conv_w, gamma, beta, mean, var, eps=1e-5):
    """Bias-free conv (O, I, kh, kw) followed by inference BN -> scaled weights + bias."""
    scale = gamma / jnp.sqrt(var + eps)                              # (O,)
    w = conv_w * scale[:, None, None, None]                          # (O, I, kh, kw)
    w = jnp.transpose(w, (2, 3, 1, 0))                               # (kh, kw, I, O)
    b = (beta - mean * scale)[None, :]                               # (1, O)
    return w.astype(jnp.float32), b.astype(jnp.float32)


def bottleneck_v1_pallas(x, params, *, stride=1, groups=1, dilation=1, eps=1e-5):
    """x: (B, Cin, H, W) float32 (PyTorch NCHW layout)."""
    assert stride == 1 and groups == 1, "Pallas path implements the module defaults"
    B, Cin, H, W = x.shape
    width = params["conv1_w"].shape[0]
    planes = params["conv3_w"].shape[0]
    assert Cin == planes, "residual add requires inplanes == planes"

    pad = 2 * dilation                    # 'same' padding for the 5x5 dilated conv
    Hp, Wp = H + 2 * pad, W + 2 * pad

    w1, b1 = _fold_bn_into_conv(params["conv1_w"], params["bn1_g"], params["bn1_b"],
                                params["bn1_m"], params["bn1_v"], eps)
    w2, b2 = _fold_bn_into_conv(params["conv2_w"], params["bn2_g"], params["bn2_b"],
                                params["bn2_m"], params["bn2_v"], eps)
    w3, b3 = _fold_bn_into_conv(params["conv3_w"], params["bn3_g"], params["bn3_b"],
                                params["bn3_m"], params["bn3_v"], eps)
    w1 = w1[0, 0]                                  # (Cin, width)
    w2 = w2.reshape(25, width, width)              # (25, width_in, width_out)
    w3 = w3[0, 0]                                  # (width, planes)

    # Channels-last token layouts (lane dim = channels); zero-pad once in the wrapper.
    x_cl = jnp.transpose(x, (0, 2, 3, 1)).astype(jnp.float32)        # (B, H, W, Cin)
    x_pad = jnp.pad(x_cl, ((0, 0), (pad, pad), (pad, pad), (0, 0)))
    x_pad = x_pad.reshape(B, Hp * Wp, Cin)
    x_res = x_cl.reshape(B, H * W, Cin)

    kernel = functools.partial(_bottleneck_kernel, H, W, width, pad, dilation)

    out_tok = pl.pallas_call(
        kernel,
        out_shape=jax.ShapeDtypeStruct((B, H * W, planes), x.dtype),
        grid_spec=pltpu.PrefetchScalarGridSpec(
            num_scalar_prefetch=0,
            grid=(B,),
            in_specs=[
                pl.BlockSpec((None, Hp * Wp, Cin), lambda b: (b, 0, 0)),   # padded x
                pl.BlockSpec((None, H * W, Cin), lambda b: (b, 0, 0)),     # identity
                pl.BlockSpec((Cin, width), lambda b: (0, 0)),              # w1 (BN folded)
                pl.BlockSpec((1, width), lambda b: (0, 0)),                # b1
                pl.BlockSpec((25, width, width), lambda b: (0, 0, 0)),     # w2 taps
                pl.BlockSpec((1, width), lambda b: (0, 0)),                # b2
                pl.BlockSpec((width, planes), lambda b: (0, 0)),           # w3
                pl.BlockSpec((1, planes), lambda b: (0, 0)),               # b3
            ],
            out_specs=pl.BlockSpec((None, H * W, planes), lambda b: (b, 0, 0)),
            scratch_shapes=[pltpu.VMEM((Hp, Wp, width), jnp.float32)],
        ),
        compiler_params=pltpu.CompilerParams(
            dimension_semantics=("parallel",)),
    )(x_pad, x_res, w1, b1, w2, b2, w3, b3)

    out = out_tok.reshape(B, H, W, planes)
    return jnp.transpose(out, (0, 3, 1, 2))                          # back to NCHW


def reference_bottleneck_v1(x, params, *, stride=1, groups=1, dilation=1, eps=1e-5):
    """Pure-JAX reference mirroring the PyTorch forward (inference BN, 'same' 5x5 pad)."""
    def bn(y, g, b, m, v):
        s = g / jnp.sqrt(v + eps)
        return y * s[None, :, None, None] + (b - m * s)[None, :, None, None]

    dn = ("NCHW", "OIHW", "NCHW")
    pad = 2 * dilation
    out = jax.lax.conv_general_dilated(x, params["conv1_w"], (1, 1),
                                       [(0, 0), (0, 0)], dimension_numbers=dn)
    out = jax.nn.relu(bn(out, params["bn1_g"], params["bn1_b"],
                         params["bn1_m"], params["bn1_v"]))
    out = jax.lax.conv_general_dilated(out, params["conv2_w"], (stride, stride),
                                       [(pad, pad), (pad, pad)],
                                       rhs_dilation=(dilation, dilation),
                                       dimension_numbers=dn,
                                       feature_group_count=groups)
    out = jax.nn.relu(bn(out, params["bn2_g"], params["bn2_b"],
                         params["bn2_m"], params["bn2_v"]))
    out = jax.lax.conv_general_dilated(out, params["conv3_w"], (1, 1),
                                       [(0, 0), (0, 0)], dimension_numbers=dn)
    out = bn(out, params["bn3_g"], params["bn3_b"],
             params["bn3_m"], params["bn3_v"])
    return jax.nn.relu(out + x)


if __name__ == "__main__":
    inplanes = planes = 64
    expansion = 2
    groups = 1
    stride = 1
    dilation = 1
    width = (planes // expansion) * groups        # 32
    B, H, W = 2, 16, 16

    key = jax.random.PRNGKey(0)
    keys = jax.random.split(key, 7)

    x = jax.random.normal(keys[0], (B, inplanes, H, W), dtype=jnp.float32)

    def bn_init(k, c):
        k1, k2, k3, k4 = jax.random.split(k, 4)
        return (1.0 + 0.1 * jax.random.normal(k1, (c,), jnp.float32),   # gamma
                0.1 * jax.random.normal(k2, (c,), jnp.float32),         # beta
                0.1 * jax.random.normal(k3, (c,), jnp.float32),         # running_mean
                jax.random.uniform(k4, (c,), jnp.float32, minval=0.5, maxval=1.5))  # running_var

    bn1 = bn_init(keys[4], width)
    bn2 = bn_init(keys[5], width)
    bn3 = bn_init(keys[6], planes)

    params = {
        "conv1_w": 0.05 * jax.random.normal(keys[1], (width, inplanes, 1, 1), jnp.float32),
        "conv2_w": 0.05 * jax.random.normal(keys[2], (width, width // groups, 5, 5), jnp.float32),
        "conv3_w": 0.05 * jax.random.normal(keys[3], (planes, width, 1, 1), jnp.float32),
        "bn1_g": bn1[0], "bn1_b": bn1[1], "bn1_m": bn1[2], "bn1_v": bn1[3],
        "bn2_g": bn2[0], "bn2_b": bn2[1], "bn2_m": bn2[2], "bn2_v": bn2[3],
        "bn3_g": bn3[0], "bn3_b": bn3[1], "bn3_m": bn3[2], "bn3_v": bn3[3],
    }

    out = bottleneck_v1_pallas(x, params, stride=stride, groups=groups, dilation=dilation)
    out = jax.block_until_ready(out)

    ref = reference_bottleneck_v1(x, params, stride=stride, groups=groups, dilation=dilation)
    ref = jax.block_until_ready(ref)

    assert out.shape == (B, planes, H, W)
    max_err = float(jnp.max(jnp.abs(out - ref)))
    assert jnp.allclose(out, ref, atol=1e-3, rtol=1e-3), f"max abs err {max_err}"
    print("KERNEL_OK")
</pallas_src>

<mosaic_0001>
module attributes {stable_mosaic.version = 11 : i64} {
  func.func @_bottleneck_kernel(%arg0: i32, %arg1: memref<1x400x64xf32, #tpu.memory_space<vmem>>, %arg2: memref<1x256x64xf32, #tpu.memory_space<vmem>>, %arg3: memref<64x32xf32, #tpu.memory_space<vmem>>, %arg4: memref<1x32xf32, #tpu.memory_space<vmem>>, %arg5: memref<25x32x32xf32, #tpu.memory_space<vmem>>, %arg6: memref<1x32xf32, #tpu.memory_space<vmem>>, %arg7: memref<32x64xf32, #tpu.memory_space<vmem>>, %arg8: memref<1x64xf32, #tpu.memory_space<vmem>>, %arg9: memref<1x256x64xf32, #tpu.memory_space<vmem>>, %arg10: memref<20x20x32xf32, #tpu.memory_space<vmem>>) attributes {dimension_semantics = [#tpu.dimension_semantics<parallel>], iteration_bounds = array<i64: 2>, scalar_prefetch = 0 : i64, scratch_operands = 1 : i64, tpu.core_type = #tpu.core_type<tc>, window_params = [{transform_indices = @transform_0, window_bounds = array<i64: 1, 400, 64>}, {transform_indices = @transform_1, window_bounds = array<i64: 1, 256, 64>}, {pipeline_mode = #tpu.pipeline_mode<synchronous>, transform_indices = @transform_2, window_bounds = array<i64: 64, 32>}, {pipeline_mode = #tpu.pipeline_mode<synchronous>, transform_indices = @transform_3, window_bounds = array<i64: 1, 32>}, {pipeline_mode = #tpu.pipeline_mode<synchronous>, transform_indices = @transform_4, window_bounds = array<i64: 25, 32, 32>}, {pipeline_mode = #tpu.pipeline_mode<synchronous>, transform_indices = @transform_5, window_bounds = array<i64: 1, 32>}, {pipeline_mode = #tpu.pipeline_mode<synchronous>, transform_indices = @transform_6, window_bounds = array<i64: 32, 64>}, {pipeline_mode = #tpu.pipeline_mode<synchronous>, transform_indices = @transform_7, window_bounds = array<i64: 1, 64>}, {transform_indices = @transform_8, window_bounds = array<i64: 1, 256, 64>}]} {
    %c0 = arith.constant 0 : index
    %c0_0 = arith.constant 0 : index
    %c0_1 = arith.constant 0 : index
    %0 = vector.load %arg1[%c0, %c0_0, %c0_1] : memref<1x400x64xf32, #tpu.memory_space<vmem>>, vector<1x400x64xf32>
    %1 = vector.shape_cast %0 : vector<1x400x64xf32> to vector<400x64xf32>
    %c0_2 = arith.constant 0 : index
    %c0_3 = arith.constant 0 : index
    %2 = vector.load %arg3[%c0_2, %c0_3] : memref<64x32xf32, #tpu.memory_space<vmem>>, vector<64x32xf32>
    %cst = arith.constant dense<0.000000e+00> : vector<400x32xf32>
    %3 = tpu.matmul %1, %2, %cst {dimension_numbers = #tpu.dot_dimension_numbers<[1], [0], [0], [1], [0, 0, 1, 1], [], []>} : vector<400x64xf32>, vector<64x32xf32>, vector<400x32xf32> -> vector<400x32xf32>
    %c0_4 = arith.constant 0 : index
    %c0_5 = arith.constant 0 : index
    %4 = vector.load %arg4[%c0_4, %c0_5] : memref<1x32xf32, #tpu.memory_space<vmem>>, vector<1x32xf32>
    %5 = vector.broadcast %4 : vector<1x32xf32> to vector<400x32xf32>
    %6 = arith.addf %3, %5 : vector<400x32xf32>
    %cst_6 = arith.constant 0.000000e+00 : f32
    %7 = vector.broadcast %cst_6 : f32 to vector<400x32xf32>
    %8 = arith.maximumf %6, %7 : vector<400x32xf32>
    %9 = tpu.iota {dimensions = array<i32: 0>} : vector<20x20x1xi32>
    %10 = tpu.iota {dimensions = array<i32: 1>} : vector<20x20x1xi32>
    %c2_i32 = arith.constant 2 : i32
    %11 = vector.broadcast %c2_i32 : i32 to vector<20x20x1xi32>
    %12 = arith.cmpi sge, %9, %11 : vector<20x20x1xi32>
    %c18_i32 = arith.constant 18 : i32
    %13 = vector.broadcast %c18_i32 : i32 to vector<20x20x1xi32>
    %14 = arith.cmpi slt, %9, %13 : vector<20x20x1xi32>
    %15 = arith.andi %12, %14 : vector<20x20x1xi1>
    %c2_i32_7 = arith.constant 2 : i32
    %16 = vector.broadcast %c2_i32_7 : i32 to vector<20x20x1xi32>
    %17 = arith.cmpi sge, %10, %16 : vector<20x20x1xi32>
    %18 = arith.andi %15, %17 : vector<20x20x1xi1>
    %c18_i32_8 = arith.constant 18 : i32
    %19 = vector.broadcast %c18_i32_8 : i32 to vector<20x20x1xi32>
    %20 = arith.cmpi slt, %10, %19 : vector<20x20x1xi32>
    %21 = arith.andi %18, %20 : vector<20x20x1xi1>
    %22 = vector.shape_cast %8 : vector<400x32xf32> to vector<20x20x32xf32>
    %23 = arith.extui %21 : vector<20x20x1xi1> to vector<20x20x1xi32>
    %24 = arith.sitofp %23 : vector<20x20x1xi32> to vector<20x20x1xf32>
    %25 = vector.broadcast %24 : vector<20x20x1xf32> to vector<20x20x32xf32>
    %26 = arith.mulf %22, %25 : vector<20x20x32xf32>
    %c0_9 = arith.constant 0 : index
    %c0_10 = arith.constant 0 : index
    %c0_11 = arith.constant 0 : index
    %27 = vector.load %arg10[%c0_9, %c0_10, %c0_11] : memref<20x20x32xf32, #tpu.memory_space<vmem>>, vector<20x20x32xf32>
    tpu.vector_store %arg10[%c0_9, %c0_10, %c0_11], %26 {strides = array<i32>} : memref<20x20x32xf32, #tpu.memory_space<vmem>>, vector<20x20x32xf32>,
    %cst_12 = arith.constant 0.000000e+00 : f32
    %28 = vector.broadcast %cst_12 : f32 to vector<256x32xf32>
    %c0_13 = arith.constant 0 : index
    %c0_14 = arith.constant 0 : index
    %c0_15 = arith.constant 0 : index
    %29 = vector.load %arg10[%c0_13, %c0_14, %c0_15] : memref<20x20x32xf32, #tpu.memory_space<vmem>>, vector<16x16x32xf32>
    %30 = vector.shape_cast %29 : vector<16x16x32xf32> to vector<256x32xf32>
    %c0_16 = arith.constant 0 : index
    %c0_17 = arith.constant 0 : index
    %c0_18 = arith.constant 0 : index
    %31 = vector.load %arg5[%c0_16, %c0_17, %c0_18] : memref<25x32x32xf32, #tpu.memory_space<vmem>>, vector<1x32x32xf32>
    %32 = vector.shape_cast %31 : vector<1x32x32xf32> to vector<32x32xf32>
    %cst_19 = arith.constant dense<0.000000e+00> : vector<256x32xf32>
    %33 = tpu.matmul %30, %32, %cst_19 {dimension_numbers = #tpu.dot_dimension_numbers<[1], [0], [0], [1], [0, 0, 1, 1], [], []>} : vector<256x32xf32>, vector<32x32xf32>, vector<256x32xf32> -> vector<256x32xf32>
    %34 = arith.addf %28, %33 : vector<256x32xf32>
    %c0_20 = arith.constant 0 : index
    %c1 = arith.constant 1 : index
    %c0_21 = arith.constant 0 : index
    %35 = vector.load %arg10[%c0_20, %c1, %c0_21] : memref<20x20x32xf32, #tpu.memory_space<vmem>>, vector<16x16x32xf32>
    %36 = vector.shape_cast %35 : vector<16x16x32xf32> to vector<256x32xf32>
    %c1_22 = arith.constant 1 : index
    %c0_23 = arith.constant 0 : index
    %c0_24 = arith.constant 0 : index
    %37 = vector.load %arg5[%c1_22, %c0_23, %c0_24] : memref<25x32x32xf32, #tpu.memory_space<vmem>>, vector<1x32x32xf32>
    %38 = vector.shape_cast %37 : vector<1x32x32xf32> to vector<32x32xf32>
    %cst_25 = arith.constant dense<0.000000e+00> : vector<256x32xf32>
    %39 = tpu.matmul %36, %38, %cst_25 {dimension_numbers = #tpu.dot_dimension_numbers<[1], [0], [0], [1], [0, 0, 1, 1], [], []>} : vector<256x32xf32>, vector<32x32xf32>, vector<256x32xf32> -> vector<256x32xf32>
    %40 = arith.addf %34, %39 : vector<256x32xf32>
    %c0_26 = arith.constant 0 : index
    %c2 = arith.constant 2 : index
    %c0_27 = arith.constant 0 : index
    %41 = vector.load %arg10[%c0_26, %c2, %c0_27] : memref<20x20x32xf32, #tpu.memory_space<vmem>>, vector<16x16x32xf32>
    %42 = vector.shape_cast %41 : vector<16x16x32xf32> to vector<256x32xf32>
    %c2_28 = arith.constant 2 : index
    %c0_29 = arith.constant 0 : index
    %c0_30 = arith.constant 0 : index
    %43 = vector.load %arg5[%c2_28, %c0_29, %c0_30] : memref<25x32x32xf32, #tpu.memory_space<vmem>>, vector<1x32x32xf32>
    %44 = vector.shape_cast %43 : vector<1x32x32xf32> to vector<32x32xf32>
    %cst_31 = arith.constant dense<0.000000e+00> : vector<256x32xf32>
    %45 = tpu.matmul %42, %44, %cst_31 {dimension_numbers = #tpu.dot_dimension_numbers<[1], [0], [0], [1], [0, 0, 1, 1], [], []>} : vector<256x32xf32>, vector<32x32xf32>, vector<256x32xf32> -> vector<256x32xf32>
    %46 = arith.addf %40, %45 : vector<256x32xf32>
    %c0_32 = arith.constant 0 : index
    %c3 = arith.constant 3 : index
    %c0_33 = arith.constant 0 : index
    %47 = vector.load %arg10[%c0_32, %c3, %c0_33] : memref<20x20x32xf32, #tpu.memory_space<vmem>>, vector<16x16x32xf32>
    %48 = vector.shape_cast %47 : vector<16x16x32xf32> to vector<256x32xf32>
    %c3_34 = arith.constant 3 : index
    %c0_35 = arith.constant 0 : index
    %c0_36 = arith.constant 0 : index
    %49 = vector.load %arg5[%c3_34, %c0_35, %c0_36] : memref<25x32x32xf32, #tpu.memory_space<vmem>>, vector<1x32x32xf32>
    %50 = vector.shape_cast %49 : vector<1x32x32xf32> to vector<32x32xf32>
    %cst_37 = arith.constant dense<0.000000e+00> : vector<256x32xf32>
    %51 = tpu.matmul %48, %50, %cst_37 {dimension_numbers = #tpu.dot_dimension_numbers<[1], [0], [0], [1], [0, 0, 1, 1], [], []>} : vector<256x32xf32>, vector<32x32xf32>, vector<256x32xf32> -> vector<256x32xf32>
    %52 = arith.addf %46, %51 : vector<256x32xf32>
    %c0_38 = arith.constant 0 : index
    %c4 = arith.constant 4 : index
    %c0_39 = arith.constant 0 : index
    %53 = vector.load %arg10[%c0_38, %c4, %c0_39] : memref<20x20x32xf32, #tpu.memory_space<vmem>>, vector<16x16x32xf32>
    %54 = vector.shape_cast %53 : vector<16x16x32xf32> to vector<256x32xf32>
    %c4_40 = arith.constant 4 : index
    %c0_41 = arith.constant 0 : index
    %c0_42 = arith.constant 0 : index
    %55 = vector.load %arg5[%c4_40, %c0_41, %c0_42] : memref<25x32x32xf32, #tpu.memory_space<vmem>>, vector<1x32x32xf32>
    %56 = vector.shape_cast %55 : vector<1x32x32xf32> to vector<32x32xf32>
    %cst_43 = arith.constant dense<0.000000e+00> : vector<256x32xf32>
    %57 = tpu.matmul %54, %56, %cst_43 {dimension_numbers = #tpu.dot_dimension_numbers<[1], [0], [0], [1], [0, 0, 1, 1], [], []>} : vector<256x32xf32>, vector<32x32xf32>, vector<256x32xf32> -> vector<256x32xf32>
    %58 = arith.addf %52, %57 : vector<256x32xf32>
    %c1_44 = arith.constant 1 : index
    %c0_45 = arith.constant 0 : index
    %c0_46 = arith.constant 0 : index
    %59 = vector.load %arg10[%c1_44, %c0_45, %c0_46] : memref<20x20x32xf32, #tpu.memory_space<vmem>>, vector<16x16x32xf32>
    %60 = vector.shape_cast %59 : vector<16x16x32xf32> to vector<256x32xf32>
    %c5 = arith.constant 5 : index
    %c0_47 = arith.constant 0 : index
    %c0_48 = arith.constant 0 : index
    %61 = vector.load %arg5[%c5, %c0_47, %c0_48] : memref<25x32x32xf32, #tpu.memory_space<vmem>>, vector<1x32x32xf32>
    %62 = vector.shape_cast %61 : vector<1x32x32xf32> to vector<32x32xf32>
    %cst_49 = arith.constant dense<0.000000e+00> : vector<256x32xf32>
    %63 = tpu.matmul %60, %62, %cst_49 {dimension_numbers = #tpu.dot_dimension_numbers<[1], [0], [0], [1], [0, 0, 1, 1], [], []>} : vector<256x32xf32>, vector<32x32xf32>, vector<256x32xf32> -> vector<256x32xf32>
    %64 = arith.addf %58, %63 : vector<256x32xf32>
    %c1_50 = arith.constant 1 : index
    %c1_51 = arith.constant 1 : index
    %c0_52 = arith.constant 0 : index
    %65 = vector.load %arg10[%c1_50, %c1_51, %c0_52] : memref<20x20x32xf32, #tpu.memory_space<vmem>>, vector<16x16x32xf32>
    %66 = vector.shape_cast %65 : vector<16x16x32xf32> to vector<256x32xf32>
    %c6 = arith.constant 6 : index
    %c0_53 = arith.constant 0 : index
    %c0_54 = arith.constant 0 : index
    %67 = vector.load %arg5[%c6, %c0_53, %c0_54] : memref<25x32x32xf32, #tpu.memory_space<vmem>>, vector<1x32x32xf32>
    %68 = vector.shape_cast %67 : vector<1x32x32xf32> to vector<32x32xf32>
    %cst_55 = arith.constant dense<0.000000e+00> : vector<256x32xf32>
    %69 = tpu.matmul %66, %68, %cst_55 {dimension_numbers = #tpu.dot_dimension_numbers<[1], [0], [0], [1], [0, 0, 1, 1], [], []>} : vector<256x32xf32>, vector<32x32xf32>, vector<256x32xf32> -> vector<256x32xf32>
    %70 = arith.addf %64, %69 : vector<256x32xf32>
    %c1_56 = arith.constant 1 : index
    %c2_57 = arith.constant 2 : index
    %c0_58 = arith.constant 0 : index
    %71 = vector.load %arg10[%c1_56, %c2_57, %c0_58] : memref<20x20x32xf32, #tpu.memory_space<vmem>>, vector<16x16x32xf32>
    %72 = vector.shape_cast %71 : vector<16x16x32xf32> to vector<256x32xf32>
    %c7 = arith.constant 7 : index
    %c0_59 = arith.constant 0 : index
    %c0_60 = arith.constant 0 : index
    %73 = vector.load %arg5[%c7, %c0_59, %c0_60] : memref<25x32x32xf32, #tpu.memory_space<vmem>>, vector<1x32x32xf32>
    %74 = vector.shape_cast %73 : vector<1x32x32xf32> to vector<32x32xf32>
    %cst_61 = arith.constant dense<0.000000e+00> : vector<256x32xf32>
    %75 = tpu.matmul %72, %74, %cst_61 {dimension_numbers = #tpu.dot_dimension_numbers<[1], [0], [0], [1], [0, 0, 1, 1], [], []>} : vector<256x32xf32>, vector<32x32xf32>, vector<256x32xf32> -> vector<256x32xf32>
    %76 = arith.addf %70, %75 : vector<256x32xf32>
    %c1_62 = arith.constant 1 : index
    %c3_63 = arith.constant 3 : index
    %c0_64 = arith.constant 0 : index
    %77 = vector.load %arg10[%c1_62, %c3_63, %c0_64] : memref<20x20x32xf32, #tpu.memory_space<vmem>>, vector<16x16x32xf32>
    %78 = vector.shape_cast %77 : vector<16x16x32xf32> to vector<256x32xf32>
    %c8 = arith.constant 8 : index
    %c0_65 = arith.constant 0 : index
    %c0_66 = arith.constant 0 : index
    %79 = vector.load %arg5[%c8, %c0_65, %c0_66] : memref<25x32x32xf32, #tpu.memory_space<vmem>>, vector<1x32x32xf32>
    %80 = vector.shape_cast %79 : vector<1x32x32xf32> to vector<32x32xf32>
    %cst_67 = arith.constant dense<0.000000e+00> : vector<256x32xf32>
    %81 = tpu.matmul %78, %80, %cst_67 {dimension_numbers = #tpu.dot_dimension_numbers<[1], [0], [0], [1], [0, 0, 1, 1], [], []>} : vector<256x32xf32>, vector<32x32xf32>, vector<256x32xf32> -> vector<256x32xf32>
    %82 = arith.addf %76, %81 : vector<256x32xf32>
    %c1_68 = arith.constant 1 : index
    %c4_69 = arith.constant 4 : index
    %c0_70 = arith.constant 0 : index
    %83 = vector.load %arg10[%c1_68, %c4_69, %c0_70] : memref<20x20x32xf32, #tpu.memory_space<vmem>>, vector<16x16x32xf32>
    %84 = vector.shape_cast %83 : vector<16x16x32xf32> to vector<256x32xf32>
    %c9 = arith.constant 9 : index
    %c0_71 = arith.constant 0 : index
    %c0_72 = arith.constant 0 : index
    %85 = vector.load %arg5[%c9, %c0_71, %c0_72] : memref<25x32x32xf32, #tpu.memory_space<vmem>>, vector<1x32x32xf32>
    %86 = vector.shape_cast %85 : vector<1x32x32xf32> to vector<32x32xf32>
    %cst_73 = arith.constant dense<0.000000e+00> : vector<256x32xf32>
    %87 = tpu.matmul %84, %86, %cst_73 {dimension_numbers = #tpu.dot_dimension_numbers<[1], [0], [0], [1], [0, 0, 1, 1], [], []>} : vector<256x32xf32>, vector<32x32xf32>, vector<256x32xf32> -> vector<256x32xf32>
    %88 = arith.addf %82, %87 : vector<256x32xf32>
    %c2_74 = arith.constant 2 : index
    %c0_75 = arith.constant 0 : index
    %c0_76 = arith.constant 0 : index
    %89 = vector.load %arg10[%c2_74, %c0_75, %c0_76] : memref<20x20x32xf32, #tpu.memory_space<vmem>>, vector<16x16x32xf32>
    %90 = vector.shape_cast %89 : vector<16x16x32xf32> to vector<256x32xf32>
    %c10 = arith.constant 10 : index
    %c0_77 = arith.constant 0 : index
    %c0_78 = arith.constant 0 : index
    %91 = vector.load %arg5[%c10, %c0_77, %c0_78] : memref<25x32x32xf32, #tpu.memory_space<vmem>>, vector<1x32x32xf32>
    %92 = vector.shape_cast %91 : vector<1x32x32xf32> to vector<32x32xf32>
    %cst_79 = arith.constant dense<0.000000e+00> : vector<256x32xf32>
    %93 = tpu.matmul %90, %92, %cst_79 {dimension_numbers = #tpu.dot_dimension_numbers<[1], [0], [0], [1], [0, 0, 1, 1], [], []>} : vector<256x32xf32>, vector<32x32xf32>, vector<256x32xf32> -> vector<256x32xf32>
    %94 = arith.addf %88, %93 : vector<256x32xf32>
    %c2_80 = arith.constant 2 : index
    %c1_81 = arith.constant 1 : index
    %c0_82 = arith.constant 0 : index
    %95 = vector.load %arg10[%c2_80, %c1_81, %c0_82] : memref<20x20x32xf32, #tpu.memory_space<vmem>>, vector<16x16x32xf32>
    %96 = vector.shape_cast %95 : vector<16x16x32xf32> to vector<256x32xf32>
    %c11 = arith.constant 11 : index
    %c0_83 = arith.constant 0 : index
    %c0_84 = arith.constant 0 : index
    %97 = vector.load %arg5[%c11, %c0_83, %c0_84] : memref<25x32x32xf32, #tpu.memory_space<vmem>>, vector<1x32x32xf32>
    %98 = vector.shape_cast %97 : vector<1x32x32xf32> to vector<32x32xf32>
    %cst_85 = arith.constant dense<0.000000e+00> : vector<256x32xf32>
    %99 = tpu.matmul %96, %98, %cst_85 {dimension_numbers = #tpu.dot_dimension_numbers<[1], [0], [0], [1], [0, 0, 1, 1], [], []>} : vector<256x32xf32>, vector<32x32xf32>, vector<256x32xf32> -> vector<256x32xf32>
    %100 = arith.addf %94, %99 : vector<256x32xf32>
    %c2_86 = arith.constant 2 : index
    %c2_87 = arith.constant 2 : index
    %c0_88 = arith.constant 0 : index
    %101 = vector.load %arg10[%c2_86, %c2_87, %c0_88] : memref<20x20x32xf32, #tpu.memory_space<vmem>>, vector<16x16x32xf32>
    %102 = vector.shape_cast %101 : vector<16x16x32xf32> to vector<256x32xf32>
    %c12 = arith.constant 12 : index
    %c0_89 = arith.constant 0 : index
    %c0_90 = arith.constant 0 : index
    %103 = vector.load %arg5[%c12, %c0_89, %c0_90] : memref<25x32x32xf32, #tpu.memory_space<vmem>>, vector<1x32x32xf32>
    %104 = vector.shape_cast %103 : vector<1x32x32xf32> to vector<32x32xf32>
    %cst_91 = arith.constant dense<0.000000e+00> : vector<256x32xf32>
    %105 = tpu.matmul %102, %104, %cst_91 {dimension_numbers = #tpu.dot_dimension_numbers<[1], [0], [0], [1], [0, 0, 1, 1], [], []>} : vector<256x32xf32>, vector<32x32xf32>, vector<256x32xf32> -> vector<256x32xf32>
    %106 = arith.addf %100, %105 : vector<256x32xf32>
    %c2_92 = arith.constant 2 : index
    %c3_93 = arith.constant 3 : index
    %c0_94 = arith.constant 0 : index
    %107 = vector.load %arg10[%c2_92, %c3_93, %c0_94] : memref<20x20x32xf32, #tpu.memory_space<vmem>>, vector<16x16x32xf32>
    %108 = vector.shape_cast %107 : vector<16x16x32xf32> to vector<256x32xf32>
    %c13 = arith.constant 13 : index
    %c0_95 = arith.constant 0 : index
    %c0_96 = arith.constant 0 : index
    %109 = vector.load %arg5[%c13, %c0_95, %c0_96] : memref<25x32x32xf32, #tpu.memory_space<vmem>>, vector<1x32x32xf32>
    %110 = vector.shape_cast %109 : vector<1x32x32xf32> to vector<32x32xf32>
    %cst_97 = arith.constant dense<0.000000e+00> : vector<256x32xf32>
    %111 = tpu.matmul %108, %110, %cst_97 {dimension_numbers = #tpu.dot_dimension_numbers<[1], [0], [0], [1], [0, 0, 1, 1], [], []>} : vector<256x32xf32>, vector<32x32xf32>, vector<256x32xf32> -> vector<256x32xf32>
    %112 = arith.addf %106, %111 : vector<256x32xf32>
    %c2_98 = arith.constant 2 : index
    %c4_99 = arith.constant 4 : index
    %c0_100 = arith.constant 0 : index
    %113 = vector.load %arg10[%c2_98, %c4_99, %c0_100] : memref<20x20x32xf32, #tpu.memory_space<vmem>>, vector<16x16x32xf32>
    %114 = vector.shape_cast %113 : vector<16x16x32xf32> to vector<256x32xf32>
    %c14 = arith.constant 14 : index
    %c0_101 = arith.constant 0 : index
    %c0_102 = arith.constant 0 : index
    %115 = vector.load %arg5[%c14, %c0_101, %c0_102] : memref<25x32x32xf32, #tpu.memory_space<vmem>>, vector<1x32x32xf32>
    %116 = vector.shape_cast %115 : vector<1x32x32xf32> to vector<32x32xf32>
    %cst_103 = arith.constant dense<0.000000e+00> : vector<256x32xf32>
    %117 = tpu.matmul %114, %116, %cst_103 {dimension_numbers = #tpu.dot_dimension_numbers<[1], [0], [0], [1], [0, 0, 1, 1], [], []>} : vector<256x32xf32>, vector<32x32xf32>, vector<256x32xf32> -> vector<256x32xf32>
    %118 = arith.addf %112, %117 : vector<256x32xf32>
    %c3_104 = arith.constant 3 : index
    %c0_105 = arith.constant 0 : index
    %c0_106 = arith.constant 0 : index
    %119 = vector.load %arg10[%c3_104, %c0_105, %c0_106] : memref<20x20x32xf32, #tpu.memory_space<vmem>>, vector<16x16x32xf32>
    %120 = vector.shape_cast %119 : vector<16x16x32xf32> to vector<256x32xf32>
    %c15 = arith.constant 15 : index
    %c0_107 = arith.constant 0 : index
    %c0_108 = arith.constant 0 : index
    %121 = vector.load %arg5[%c15, %c0_107, %c0_108] : memref<25x32x32xf32, #tpu.memory_space<vmem>>, vector<1x32x32xf32>
    %122 = vector.shape_cast %121 : vector<1x32x32xf32> to vector<32x32xf32>
    %cst_109 = arith.constant dense<0.000000e+00> : vector<256x32xf32>
    %123 = tpu.matmul %120, %122, %cst_109 {dimension_numbers = #tpu.dot_dimension_numbers<[1], [0], [0], [1], [0, 0, 1, 1], [], []>} : vector<256x32xf32>, vector<32x32xf32>, vector<256x32xf32> -> vector<256x32xf32>
    %124 = arith.addf %118, %123 : vector<256x32xf32>
    %c3_110 = arith.constant 3 : index
    %c1_111 = arith.constant 1 : index
    %c0_112 = arith.constant 0 : index
    %125 = vector.load %arg10[%c3_110, %c1_111, %c0_112] : memref<20x20x32xf32, #tpu.memory_space<vmem>>, vector<16x16x32xf32>
    %126 = vector.shape_cast %125 : vector<16x16x32xf32> to vector<256x32xf32>
    %c16 = arith.constant 16 : index
    %c0_113 = arith.constant 0 : index
    %c0_114 = arith.constant 0 : index
    %127 = vector.load %arg5[%c16, %c0_113, %c0_114] : memref<25x32x32xf32, #tpu.memory_space<vmem>>, vector<1x32x32xf32>
    %128 = vector.shape_cast %127 : vector<1x32x32xf32> to vector<32x32xf32>
    %cst_115 = arith.constant dense<0.000000e+00> : vector<256x32xf32>
    %129 = tpu.matmul %126, %128, %cst_115 {dimension_numbers = #tpu.dot_dimension_numbers<[1], [0], [0], [1], [0, 0, 1, 1], [], []>} : vector<256x32xf32>, vector<32x32xf32>, vector<256x32xf32> -> vector<256x32xf32>
    %130 = arith.addf %124, %129 : vector<256x32xf32>
    %c3_116 = arith.constant 3 : index
    %c2_117 = arith.constant 2 : index
    %c0_118 = arith.constant 0 : index
    %131 = vector.load %arg10[%c3_116, %c2_117, %c0_118] : memref<20x20x32xf32, #tpu.memory_space<vmem>>, vector<16x16x32xf32>
    %132 = vector.shape_cast %131 : vector<16x16x32xf32> to vector<256x32xf32>
    %c17 = arith.constant 17 : index
    %c0_119 = arith.constant 0 : index
    %c0_120 = arith.constant 0 : index
    %133 = vector.load %arg5[%c17, %c0_119, %c0_120] : memref<25x32x32xf32, #tpu.memory_space<vmem>>, vector<1x32x32xf32>
    %134 = vector.shape_cast %133 : vector<1x32x32xf32> to vector<32x32xf32>
    %cst_121 = arith.constant dense<0.000000e+00> : vector<256x32xf32>
    %135 = tpu.matmul %132, %134, %cst_121 {dimension_numbers = #tpu.dot_dimension_numbers<[1], [0], [0], [1], [0, 0, 1, 1], [], []>} : vector<256x32xf32>, vector<32x32xf32>, vector<256x32xf32> -> vector<256x32xf32>
    %136 = arith.addf %130, %135 : vector<256x32xf32>
    %c3_122 = arith.constant 3 : index
    %c3_123 = arith.constant 3 : index
    %c0_124 = arith.constant 0 : index
    %137 = vector.load %arg10[%c3_122, %c3_123, %c0_124] : memref<20x20x32xf32, #tpu.memory_space<vmem>>, vector<16x16x32xf32>
    %138 = vector.shape_cast %137 : vector<16x16x32xf32> to vector<256x32xf32>
    %c18 = arith.constant 18 : index
    %c0_125 = arith.constant 0 : index
    %c0_126 = arith.constant 0 : index
    %139 = vector.load %arg5[%c18, %c0_125, %c0_126] : memref<25x32x32xf32, #tpu.memory_space<vmem>>, vector<1x32x32xf32>
    %140 = vector.shape_cast %139 : vector<1x32x32xf32> to vector<32x32xf32>
    %cst_127 = arith.constant dense<0.000000e+00> : vector<256x32xf32>
    %141 = tpu.matmul %138, %140, %cst_127 {dimension_numbers = #tpu.dot_dimension_numbers<[1], [0], [0], [1], [0, 0, 1, 1], [], []>} : vector<256x32xf32>, vector<32x32xf32>, vector<256x32xf32> -> vector<256x32xf32>
    %142 = arith.addf %136, %141 : vector<256x32xf32>
    %c3_128 = arith.constant 3 : index
    %c4_129 = arith.constant 4 : index
    %c0_130 = arith.constant 0 : index
    %143 = vector.load %arg10[%c3_128, %c4_129, %c0_130] : memref<20x20x32xf32, #tpu.memory_space<vmem>>, vector<16x16x32xf32>
    %144 = vector.shape_cast %143 : vector<16x16x32xf32> to vector<256x32xf32>
    %c19 = arith.constant 19 : index
    %c0_131 = arith.constant 0 : index
    %c0_132 = arith.constant 0 : index
    %145 = vector.load %arg5[%c19, %c0_131, %c0_132] : memref<25x32x32xf32, #tpu.memory_space<vmem>>, vector<1x32x32xf32>
    %146 = vector.shape_cast %145 : vector<1x32x32xf32> to vector<32x32xf32>
    %cst_133 = arith.constant dense<0.000000e+00> : vector<256x32xf32>
    %147 = tpu.matmul %144, %146, %cst_133 {dimension_numbers = #tpu.dot_dimension_numbers<[1], [0], [0], [1], [0, 0, 1, 1], [], []>} : vector<256x32xf32>, vector<32x32xf32>, vector<256x32xf32> -> vector<256x32xf32>
    %148 = arith.addf %142, %147 : vector<256x32xf32>
    %c4_134 = arith.constant 4 : index
    %c0_135 = arith.constant 0 : index
    %c0_136 = arith.constant 0 : index
    %149 = vector.load %arg10[%c4_134, %c0_135, %c0_136] : memref<20x20x32xf32, #tpu.memory_space<vmem>>, vector<16x16x32xf32>
    %150 = vector.shape_cast %149 : vector<16x16x32xf32> to vector<256x32xf32>
    %c20 = arith.constant 20 : index
    %c0_137 = arith.constant 0 : index
    %c0_138 = arith.constant 0 : index
    %151 = vector.load %arg5[%c20, %c0_137, %c0_138] : memref<25x32x32xf32, #tpu.memory_space<vmem>>, vector<1x32x32xf32>
    %152 = vector.shape_cast %151 : vector<1x32x32xf32> to vector<32x32xf32>
    %cst_139 = arith.constant dense<0.000000e+00> : vector<256x32xf32>
    %153 = tpu.matmul %150, %152, %cst_139 {dimension_numbers = #tpu.dot_dimension_numbers<[1], [0], [0], [1], [0, 0, 1, 1], [], []>} : vector<256x32xf32>, vector<32x32xf32>, vector<256x32xf32> -> vector<256x32xf32>
    %154 = arith.addf %148, %153 : vector<256x32xf32>
    %c4_140 = arith.constant 4 : index
    %c1_141 = arith.constant 1 : index
    %c0_142 = arith.constant 0 : index
    %155 = vector.load %arg10[%c4_140, %c1_141, %c0_142] : memref<20x20x32xf32, #tpu.memory_space<vmem>>, vector<16x16x32xf32>
    %156 = vector.shape_cast %155 : vector<16x16x32xf32> to vector<256x32xf32>
    %c21 = arith.constant 21 : index
    %c0_143 = arith.constant 0 : index
    %c0_144 = arith.constant 0 : index
    %157 = vector.load %arg5[%c21, %c0_143, %c0_144] : memref<25x32x32xf32, #tpu.memory_space<vmem>>, vector<1x32x32xf32>
    %158 = vector.shape_cast %157 : vector<1x32x32xf32> to vector<32x32xf32>
    %cst_145 = arith.constant dense<0.000000e+00> : vector<256x32xf32>
    %159 = tpu.matmul %156, %158, %cst_145 {dimension_numbers = #tpu.dot_dimension_numbers<[1], [0], [0], [1], [0, 0, 1, 1], [], []>} : vector<256x32xf32>, vector<32x32xf32>, vector<256x32xf32> -> vector<256x32xf32>
    %160 = arith.addf %154, %159 : vector<256x32xf32>
    %c4_146 = arith.constant 4 : index
    %c2_147 = arith.constant 2 : index
    %c0_148 = arith.constant 0 : index
    %161 = vector.load %arg10[%c4_146, %c2_147, %c0_148] : memref<20x20x32xf32, #tpu.memory_space<vmem>>, vector<16x16x32xf32>
    %162 = vector.shape_cast %161 : vector<16x16x32xf32> to vector<256x32xf32>
    %c22 = arith.constant 22 : index
    %c0_149 = arith.constant 0 : index
    %c0_150 = arith.constant 0 : index
    %163 = vector.load %arg5[%c22, %c0_149, %c0_150] : memref<25x32x32xf32, #tpu.memory_space<vmem>>, vector<1x32x32xf32>
    %164 = vector.shape_cast %163 : vector<1x32x32xf32> to vector<32x32xf32>
    %cst_151 = arith.constant dense<0.000000e+00> : vector<256x32xf32>
    %165 = tpu.matmul %162, %164, %cst_151 {dimension_numbers = #tpu.dot_dimension_numbers<[1], [0], [0], [1], [0, 0, 1, 1], [], []>} : vector<256x32xf32>, vector<32x32xf32>, vector<256x32xf32> -> vector<256x32xf32>
    %166 = arith.addf %160, %165 : vector<256x32xf32>
    %c4_152 = arith.constant 4 : index
    %c3_153 = arith.constant 3 : index
    %c0_154 = arith.constant 0 : index
    %167 = vector.load %arg10[%c4_152, %c3_153, %c0_154] : memref<20x20x32xf32, #tpu.memory_space<vmem>>, vector<16x16x32xf32>
    %168 = vector.shape_cast %167 : vector<16x16x32xf32> to vector<256x32xf32>
    %c23 = arith.constant 23 : index
    %c0_155 = arith.constant 0 : index
    %c0_156 = arith.constant 0 : index
    %169 = vector.load %arg5[%c23, %c0_155, %c0_156] : memref<25x32x32xf32, #tpu.memory_space<vmem>>, vector<1x32x32xf32>
    %170 = vector.shape_cast %169 : vector<1x32x32xf32> to vector<32x32xf32>
    %cst_157 = arith.constant dense<0.000000e+00> : vector<256x32xf32>
    %171 = tpu.matmul %168, %170, %cst_157 {dimension_numbers = #tpu.dot_dimension_numbers<[1], [0], [0], [1], [0, 0, 1, 1], [], []>} : vector<256x32xf32>, vector<32x32xf32>, vector<256x32xf32> -> vector<256x32xf32>
    %172 = arith.addf %166, %171 : vector<256x32xf32>
    %c4_158 = arith.constant 4 : index
    %c4_159 = arith.constant 4 : index
    %c0_160 = arith.constant 0 : index
    %173 = vector.load %arg10[%c4_158, %c4_159, %c0_160] : memref<20x20x32xf32, #tpu.memory_space<vmem>>, vector<16x16x32xf32>
    %174 = vector.shape_cast %173 : vector<16x16x32xf32> to vector<256x32xf32>
    %c24 = arith.constant 24 : index
    %c0_161 = arith.constant 0 : index
    %c0_162 = arith.constant 0 : index
    %175 = vector.load %arg5[%c24, %c0_161, %c0_162] : memref<25x32x32xf32, #tpu.memory_space<vmem>>, vector<1x32x32xf32>
    %176 = vector.shape_cast %175 : vector<1x32x32xf32> to vector<32x32xf32>
    %cst_163 = arith.constant dense<0.000000e+00> : vector<256x32xf32>
    %177 = tpu.matmul %174, %176, %cst_163 {dimension_numbers = #tpu.dot_dimension_numbers<[1], [0], [0], [1], [0, 0, 1, 1], [], []>} : vector<256x32xf32>, vector<32x32xf32>, vector<256x32xf32> -> vector<256x32xf32>
    %178 = arith.addf %172, %177 : vector<256x32xf32>
    %c0_164 = arith.constant 0 : index
    %c0_165 = arith.constant 0 : index
    %179 = vector.load %arg6[%c0_164, %c0_165] : memref<1x32xf32, #tpu.memory_space<vmem>>, vector<1x32xf32>
    %180 = vector.broadcast %179 : vector<1x32xf32> to vector<256x32xf32>
    %181 = arith.addf %178, %180 : vector<256x32xf32>
    %cst_166 = arith.constant 0.000000e+00 : f32
    %182 = vector.broadcast %cst_166 : f32 to vector<256x32xf32>
    %183 = arith.maximumf %181, %182 : vector<256x32xf32>
    %c0_167 = arith.constant 0 : index
    %c0_168 = arith.constant 0 : index
    %184 = vector.load %arg7[%c0_167, %c0_168] : memref<32x64xf32, #tpu.memory_space<vmem>>, vector<32x64xf32>
    %cst_169 = arith.constant dense<0.000000e+00> : vector<256x64xf32>
    %185 = tpu.matmul %183, %184, %cst_169 {dimension_numbers = #tpu.dot_dimension_numbers<[1], [0], [0], [1], [0, 0, 1, 1], [], []>} : vector<256x32xf32>, vector<32x64xf32>, vector<256x64xf32> -> vector<256x64xf32>
    %c0_170 = arith.constant 0 : index
    %c0_171 = arith.constant 0 : index
    %186 = vector.load %arg8[%c0_170, %c0_171] : memref<1x64xf32, #tpu.memory_space<vmem>>, vector<1x64xf32>
    %187 = vector.broadcast %186 : vector<1x64xf32> to vector<256x64xf32>
    %188 = arith.addf %185, %187 : vector<256x64xf32>
    %c0_172 = arith.constant 0 : index
    %c0_173 = arith.constant 0 : index
    %c0_174 = arith.constant 0 : index
    %189 = vector.load %arg2[%c0_172, %c0_173, %c0_174] : memref<1x256x64xf32, #tpu.memory_space<vmem>>, vector<1x256x64xf32>
    %190 = vector.shape_cast %189 : vector<1x256x64xf32> to vector<256x64xf32>
    %191 = arith.addf %188, %190 : vector<256x64xf32>
    %cst_175 = arith.constant 0.000000e+00 : f32
    %192 = vector.broadcast %cst_175 : f32 to vector<256x64xf32>
    %193 = arith.maximumf %191, %192 : vector<256x64xf32>
    %c0_176 = arith.constant 0 : index
    %c0_177 = arith.constant 0 : index
    %c0_178 = arith.constant 0 : index
    %194 = vector.load %arg9[%c0_176, %c0_177, %c0_178] : memref<1x256x64xf32, #tpu.memory_space<vmem>>, vector<1x256x64xf32>
    %195 = vector.shape_cast %194 : vector<1x256x64xf32> to vector<256x64xf32>
    %196 = vector.shape_cast %193 : vector<256x64xf32> to vector<1x256x64xf32>
    tpu.vector_store %arg9[%c0_176, %c0_177, %c0_178], %196 {strides = array<i32>} : memref<1x256x64xf32, #tpu.memory_space<vmem>>, vector<1x256x64xf32>,
    return
  }
  func.func @transform_0(%arg0: i32) -> (i32, i32, i32) {
    %c0_i32 = arith.constant 0 : i32
    %c0_i32_0 = arith.constant 0 : i32
    %c0_i32_1 = arith.constant 0 : i32
    return %arg0, %c0_i32, %c0_i32_0 : i32, i32, i32
  }
  func.func @transform_1(%arg0: i32) -> (i32, i32, i32) {
    %c0_i32 = arith.constant 0 : i32
    %c0_i32_0 = arith.constant 0 : i32
    %c0_i32_1 = arith.constant 0 : i32
    return %arg0, %c0_i32, %c0_i32_0 : i32, i32, i32
  }
  func.func @transform_2(%arg0: i32) -> (i32, i32) {
    %c0_i32 = arith.constant 0 : i32
    %c0_i32_0 = arith.constant 0 : i32
    %c0_i32_1 = arith.constant 0 : i32
    return %c0_i32, %c0_i32_0 : i32, i32
  }
  func.func @transform_3(%arg0: i32) -> (i32, i32) {
    %c0_i32 = arith.constant 0 : i32
    %c0_i32_0 = arith.constant 0 : i32
    %c0_i32_1 = arith.constant 0 : i32
    return %c0_i32, %c0_i32_0 : i32, i32
  }
  func.func @transform_4(%arg0: i32) -> (i32, i32, i32) {
    %c0_i32 = arith.constant 0 : i32
    %c0_i32_0 = arith.constant 0 : i32
    %c0_i32_1 = arith.constant 0 : i32
    %c0_i32_2 = arith.constant 0 : i32
    return %c0_i32, %c0_i32_0, %c0_i32_1 : i32, i32, i32
  }
  func.func @transform_5(%arg0: i32) -> (i32, i32) {
    %c0_i32 = arith.constant 0 : i32
    %c0_i32_0 = arith.constant 0 : i32
    %c0_i32_1 = arith.constant 0 : i32
    return %c0_i32, %c0_i32_0 : i32, i32
  }
  func.func @transform_6(%arg0: i32) -> (i32, i32) {
    %c0_i32 = arith.constant 0 : i32
    %c0_i32_0 = arith.constant 0 : i32
    %c0_i32_1 = arith.constant 0 : i32
    return %c0_i32, %c0_i32_0 : i32, i32
  }
  func.func @transform_7(%arg0: i32) -> (i32, i32) {
    %c0_i32 = arith.constant 0 : i32
    %c0_i32_0 = arith.constant 0 : i32
    %c0_i32_1 = arith.constant 0 : i32
    return %c0_i32, %c0_i32_0 : i32, i32
  }
  func.func @transform_8(%arg0: i32) -> (i32, i32, i32) {
    %c0_i32 = arith.constant 0 : i32
    %c0_i32_0 = arith.constant 0 : i32
    %c0_i32_1 = arith.constant 0 : i32
    return %arg0, %c0_i32, %c0_i32_0 : i32, i32, i32
  }
}

</mosaic_0001>

<bundles_post_ra>
// kernel: tpu_custom_call.1
= control target key start
LH: loop header
LB: loop body
LE: loop exit
PB: predicated region body
PF: predicated region fallthrough
CT: control target
= control target key end

     0   :  { %s16391_s27 = smov 0   ;;  %s19290_s0 = inlined_call_operand.vmem [shape: f32[2,400,64], index: 0, kind: input, shape index: {}]   ;;  %s19291_s1 = inlined_call_operand.vmem [shape: f32[2,256,64], index: 1, kind: input, shape index: {}]   ;;  %s19292_s2 = inlined_call_operand.vmem [shape: f32[64,32], index: 2, kind: input, shape index: {}]   ;;  %s19293_s3 = inlined_call_operand.vmem [shape: f32[1,32], index: 3, kind: input, shape index: {}]   ;;  %s19294_s4 = inlined_call_operand.vmem [shape: f32[25,32,32], index: 4, kind: input, shape index: {}]   ;;  %s19295_s5 = inlined_call_operand.vmem [shape: f32[1,32], index: 5, kind: input, shape index: {}]   ;;  %s19296_s6 = inlined_call_operand.vmem [shape: f32[32,64], index: 6, kind: input, shape index: {}]   ;;  %s19297_s7 = inlined_call_operand.vmem [shape: f32[1,64], index: 7, kind: input, shape index: {}]   ;;  %s19298_s8 = inlined_call_operand.vmem [shape: f32[2,256,64], index: 8, kind: output, shape index: {}]  }
   0x1 LB: > { %s11786_s28 = sadd.s32 4294967295, %s16340_s27   ;;  %p11790_p0 = scmp.ge.s32.totalorder %s16340_s27, 1  ;;  %s16340_s27 = sphi %s16391_s27, %s18_s27  }
   0x2   : > { %p272_p1 = scmp.lt.s32.totalorder %s16340_s27, 3 }
   0x4   : > { %p273_p2 = pnand %p11790_p0, %p272_p1 }
   0x6   : > { %276 = sbr.rel (%p273_p2) target bundleno = 1622 (0x656), region = 52 }
   0xd   : > { %v376_v0 = vld [vmem:[%s19292_s2] sm:$0xff]  ;;  %v377_v1 = vld [vmem:[%s19292_s2 + $0x8] sm:$0xff]  ;;  %v378_v2 = vld [vmem:[%s19292_s2 + $0x10] sm:$0xff]  ;;  %p311_p3 = scmp.lt.s32.totalorder %s11786_s28, 1  ;;  %vm391_vm0 = vcmask 523264   ;;  %vm1437_vm3 = vcmask 261120  }
   0xe   : > { %v15324_v3 = vpack.c.bf16 %v377_v1, %v376_v0  ;;  %v379_v4 = vld [vmem:[%s19292_s2 + $0x18] sm:$0xff]  ;;  %v380_v6 = vld [vmem:[%s19292_s2 + $0x20] sm:$0xff]  ;;  %v381_v7 = vld [vmem:[%s19292_s2 + $0x28] sm:$0xff]  ;;  %vm1440_vm4 = vcmask 257024  }
   0xf   : > { %v15328_v5 = vpack.c.bf16 %v379_v4, %v378_v2  ;;  %s19323_s28 = smov (!%p311_p3, %s11786_s28), 1  ;;  %v15332_v8 = vpack.c.bf16 %v381_v7, %v380_v6  ;;  %v382_v9 = vld [vmem:[%s19292_s2 + $0x30] sm:$0xff]  ;;  %v383_v10 = vld [vmem:[%s19292_s2 + $0x38] sm:$0xff]  ;;  %v11849_v60 = vld [vmem:[%s19294_s4 + $0x20] sm:$0xff] }
  0x10   : > { %15325 = vmatprep.subr.bf16.mxu0 %v15324_v3  ;;  %s16320_s19 = smul.u32 400, %s19323_s28  ;;  %v15336_v12 = vpack.c.bf16 %v383_v10, %v382_v9  ;;  %v11850_v61 = vld [vmem:[%s19294_s4 + $0x28] sm:$0xff]  ;;  %v11851_v63 = vld [vmem:[%s19294_s4 + $0x30] sm:$0xff]  ;;  %v11852_v0 = vld [vmem:[%s19294_s4 + $0x38] sm:$0xff]  ;;  %s12781_s21 = sshll.u32 %s19323_s28, 8 }
  0x11   : > { %15327 = vmatpush3.bf16.msra.mxu0 %v15324_v3  ;;  %v15340_v62 = vpack.c.bf16 %v11850_v61, %v11849_v60  ;;  %v15344_v2 = vpack.c.bf16 %v11852_v0, %v11851_v63  ;;  %v12241_v4 = vld [vmem:[%s19294_s4 + $0x160] sm:$0xff]  ;;  %v12243_v7 = vld [vmem:[%s19294_s4 + $0x170] sm:$0xff]  ;;  %s19147_s24 = scalar_lea.vmem %s19291_s1, %s12781_s21  ;;  %s19161_s30 = scalar_lea.vmem %s19298_s8, %s12781_s21 }
  0x12   : > { %15329 = vmatprep.subr.bf16.mxu0 %v15328_v5  ;;  %s16429_s26 = scalar_lea.vmem %s19290_s0, %s16320_s19  ;;  %v12277_v10 = vld [vmem:[%s19294_s4 + $0x180] sm:$0xff] }
  0x13   : > { %v326_v11 = vld [vmem:[%s16429_s26] sm:$0xff]  ;;  %v327_v13 = vld [vmem:[%s16429_s26 + $0x8] sm:$0xff]  ;;  %v328_v14 = vld [vmem:[%s16429_s26 + $0x10] sm:$0xff] }
  0x14   : > { %13793 = vmatprep.mubr.msk.f32.mxu0 %vm391_vm0, %v326_v11  ;;  %v329_v15 = vld [vmem:[%s16429_s26 + $0x18] sm:$0xff]  ;;  %v330_v16 = vld [vmem:[%s16429_s26 + $0x20] sm:$0xff]  ;;  %v331_v17 = vld [vmem:[%s16429_s26 + $0x28] sm:$0xff] }
  0x15   : > { %15331 = vmatpush3.bf16.msra.mxu0 %v15328_v5  ;;  %v332_v18 = vld [vmem:[%s16429_s26 + $0x30] sm:$0xff]  ;;  %v333_v19 = vld [vmem:[%s16429_s26 + $0x38] sm:$0xff]  ;;  %v334_v20 = vld [vmem:[%s16429_s26 + $0x40] sm:$0xff] }
  0x16   : > { %15333 = vmatprep.subr.bf16.mxu0 %v15332_v8  ;;  %v335_v21 = vld [vmem:[%s16429_s26 + $0x48] sm:$0xff]  ;;  %v336_v22 = vld [vmem:[%s16429_s26 + $0x50] sm:$0xff]  ;;  %v337_v23 = vld [vmem:[%s16429_s26 + $0x58] sm:$0xff] }
  0x17   : > { %v338_v24 = vld [vmem:[%s16429_s26 + $0x60] sm:$0xff]  ;;  %v339_v25 = vld [vmem:[%s16429_s26 + $0x68] sm:$0xff]  ;;  %v340_v26 = vld [vmem:[%s16429_s26 + $0x70] sm:$0xff] }
  0x18   : > { %v341_v27 = vld [vmem:[%s16429_s26 + $0x78] sm:$0xff]  ;;  %v342_v28 = vld [vmem:[%s16429_s26 + $0x80] sm:$0xff]  ;;  %v343_v29 = vld [vmem:[%s16429_s26 + $0x88] sm:$0xff] }
  0x19   : > { %15335 = vmatpush3.bf16.msra.mxu0 %v15332_v8  ;;  %v344_v30 = vld [vmem:[%s16429_s26 + $0x90] sm:$0xff]  ;;  %v345_v31 = vld [vmem:[%s16429_s26 + $0x98] sm:$0xff]  ;;  %v346_v32 = vld [vmem:[%s16429_s26 + $0xa0] sm:$0xff] }
  0x1a   : > { %15337 = vmatprep.subr.bf16.mxu0 %v15336_v12  ;;  %v347_v33 = vld [vmem:[%s16429_s26 + $0xa8] sm:$0xff]  ;;  %v348_v34 = vld [vmem:[%s16429_s26 + $0xb0] sm:$0xff]  ;;  %v349_v35 = vld [vmem:[%s16429_s26 + $0xb8] sm:$0xff] }
  0x1b   : > { %v350_v36 = vld [vmem:[%s16429_s26 + $0xc0] sm:$0xff]  ;;  %v351_v37 = vld [vmem:[%s16429_s26 + $0xc8] sm:$0xff]  ;;  %v352_v38 = vld [vmem:[%s16429_s26 + $0xd0] sm:$0xff] }
  0x1c   : > { %v353_v39 = vld [vmem:[%s16429_s26 + $0xd8] sm:$0xff]  ;;  %v354_v40 = vld [vmem:[%s16429_s26 + $0xe0] sm:$0xff]  ;;  %v355_v41 = vld [vmem:[%s16429_s26 + $0xe8] sm:$0xff] }
  0x1d   : > { %15339 = vmatpush3.bf16.msra.mxu0 %v15336_v12  ;;  %v356_v42 = vld [vmem:[%s16429_s26 + $0xf0] sm:$0xff]  ;;  %v357_v43 = vld [vmem:[%s16429_s26 + $0xf8] sm:$0xff]  ;;  %v358_v44 = vld [vmem:[%s16429_s26 + $0x100] sm:$0xff] }
  0x1e   : > { %v359_v45 = vld [vmem:[%s16429_s26 + $0x108] sm:$0xff]  ;;  %v360_v46 = vld [vmem:[%s16429_s26 + $0x110] sm:$0xff]  ;;  %v361_v47 = vld [vmem:[%s16429_s26 + $0x118] sm:$0xff]  ;;  %15341 = vmatprep.subr.bf16.mxu0 %v15340_v62 }
  0x1f   : > { %v362_v48 = vld [vmem:[%s16429_s26 + $0x120] sm:$0xff]  ;;  %v363_v49 = vld [vmem:[%s16429_s26 + $0x128] sm:$0xff]  ;;  %v364_v50 = vld [vmem:[%s16429_s26 + $0x130] sm:$0xff] }
  0x20   : > { %13794 = vmatmul.mubr.msk.f32.vlgmr.msra.gmra.mrb[0].mxu0 %vm391_vm0, %v327_v13  ;;  %v365_v51 = vld [vmem:[%s16429_s26 + $0x138] sm:$0xff]  ;;  %v366_v52 = vld [vmem:[%s16429_s26 + $0x140] sm:$0xff]  ;;  %v367_v53 = vld [vmem:[%s16429_s26 + $0x148] sm:$0xff] }
  0x21   : > { %13796 = vmatprep.mubr.msk.f32.mxu0 %vm391_vm0, %v328_v14  ;;  %v368_v54 = vld [vmem:[%s16429_s26 + $0x150] sm:$0xff]  ;;  %v369_v55 = vld [vmem:[%s16429_s26 + $0x158] sm:$0xff]  ;;  %v370_v56 = vld [vmem:[%s16429_s26 + $0x160] sm:$0xff]  ;;  %15343 = vmatpush3.bf16.msra.mxu0 %v15340_v62 }
  0x22   : > { %v371_v57 = vld [vmem:[%s16429_s26 + $0x168] sm:$0xff]  ;;  %v372_v58 = vld [vmem:[%s16429_s26 + $0x170] sm:$0xff]  ;;  %v373_v59 = vld [vmem:[%s16429_s26 + $0x178] sm:$0xff]  ;;  %15345 = vmatprep.subr.bf16.mxu0 %v15344_v2 }
  0x23   : > { %v374_v1 = vld [vmem:[%s16429_s26 + $0x180] sm:$0xff]  ;;  %v375_v3 = vld [vmem:[%s16429_s26 + $0x188] sm:$0xff]  ;;  %v12244_v8 = vld [vmem:[%s19294_s4 + $0x178] sm:$0xff] }
  0x24   : > { %13797 = vmatmul.mubr.msk.f32.gmra.mrb[2].mxu0 %vm391_vm0, %v329_v15  ;;  %v12242_v5 = vld [vmem:[%s19294_s4 + $0x168] sm:$0xff]  ;;  %v16559_v9 = vpack.c.bf16 %v12244_v8, %v12243_v7  ;;  %v1531_v13 = vld [vmem:[%s19294_s4] sm:$0xff] }
  0x25   : > { %13799 = vmatprep.mubr.msk.f32.mxu0 %vm391_vm0, %v330_v16  ;;  %15347 = vmatpush3.bf16.msra.mxu0 %v15344_v2  ;;  %v16549_v6 = vpack.c.bf16 %v12242_v5, %v12241_v4  ;;  %v12278_v11 = vld [vmem:[%s19294_s4 + $0x188] sm:$0xff]  ;;  %v907_v16 = vlaneseq }
  0x26   : > { %19309 = vst [vmem:[#allocation4_spill] sm:$0xff] %v16559_v9  ;;  %v16569_v12 = vpack.c.bf16 %v12278_v11, %v12277_v10  ;;  %v1532_v14 = vld [vmem:[%s19294_s4 + $0x8] sm:$0xff] }
  0x27   : > { %19308 = vst [vmem:[#allocation3_spill] sm:$0xff] %v16549_v6  ;;  %15548 = vmatprep.subr.bf16.mxu1 %v16549_v6  ;;  %v16578_v15 = vpack.c.bf16 %v1532_v14, %v1531_v13 }
  0x28   : > { %13800 = vmatmul.mubr.msk.f32.gmra.mrb[4].mxu0 %vm391_vm0, %v331_v17  ;;  %15550 = vmatpush3.bf16.msra.mxu1 %v16549_v6  ;;  %v16342_v17 = vmov 839922192  }
  0x29   : > { %13802 = vmatprep.mubr.msk.f32.mxu0 %vm391_vm0, %v332_v18  ;;  %15549 = vmatprep.subr.bf16.mxu1 %v16559_v9  ;;  %v1098_v18 = vunpack.c.l.s4 %v16342_v17 }
  0x2a   : > { %15349 = vmatprep.subr.bf16.mxu0 %v16578_v15 }
  0x2c   : > { %13803 = vmatmul.mubr.msk.f32.gmra.mrb[6].mxu0 %vm391_vm0, %v333_v19  ;;  %15551 = vmatpush3.bf16.msra.mxu1 %v16559_v9  ;;  %v16343_v19 = vmov 1985246804  }
  0x2d   : > { %13805 = vmatprep.mubr.msk.f32.mxu0 %vm391_vm0, %v334_v20  ;;  %15437 = vmatprep.subr.bf16.mxu1 %v16569_v12  ;;  %v1105_v20 = vunpack.c.l.s4 %v16343_v19 }
  0x30   : > { %13806 = vmatmul.mubr.msk.f32.gmra.mrb[8].mxu0 %vm391_vm0, %v335_v21  ;;  %v908_v21 = vshrl.u32 %v907_v16, 7  ;;  %v16345_v16 = vmov 1.0  }
  0x31   : > { %13808 = vmatprep.mubr.msk.f32.mxu0 %vm391_vm0, %v336_v22  ;;  %v1099_v22 = vunpack.c.0.s8 %v1098_v18 }
  0x32   : > { %vm911_vm1 = vcmp.ge.s32.totalorder %v908_v21, 2 }
  0x34   : > { %13809 = vmatmul.mubr.msk.f32.gmra.mrb[10].mxu0 %vm391_vm0, %v337_v23  ;;  %v1106_v23 = vunpack.c.0.s8 %v1105_v20 }
  0x35   : > { %13811 = vmatprep.mubr.msk.f32.mxu0 %vm391_vm0, %v338_v24  ;;  %v16584_v24 = vld [vmem:[%s19293_s3] ss:$0 sm:$0xff] }
  0x38   : > { %13812 = vmatmul.mubr.msk.f32.gmra.mrb[12].mxu0 %vm391_vm0, %v339_v25  ;;  %v1102_v25 = vsub.s32 %v1099_v22, %v908_v21 }
  0x39   : > { %13814 = vmatprep.mubr.msk.f32.mxu0 %vm391_vm0, %v340_v26  ;;  %v1109_v26 = vsub.s32 %v1106_v23, %v908_v21 }
  0x3a   : > { %v16616_v17 = vrot.slane %v16345_v16, %v1102_v25 }
  0x3c   : > { %13815 = vmatmul.mubr.msk.f32.gmra.mrb[14].mxu0 %vm391_vm0, %v341_v27 }
  0x3d   : > { %13817 = vmatprep.mubr.msk.f32.mxu0 %vm391_vm0, %v342_v28  ;;  %v910_v28 = vadd.s32 16, %v908_v21  ;;  %v16620_v21 = vrot.slane %v16345_v16, %v1109_v26 }
  0x3f   : > { %vm922_vm2 = vcmp.lt.s32.totalorder %v910_v28, 18 }
  0x40   : > { %13818 = vmatmul.mubr.msk.f32.gmra.mrb[16].mxu0 %vm391_vm0, %v343_v29 }
  0x41   : > { %13820 = vmatprep.mubr.msk.f32.mxu0 %vm391_vm0, %v344_v30 }
  0x44   : > { %13821 = vmatmul.mubr.msk.f32.gmra.mrb[18].mxu0 %vm391_vm0, %v345_v31 }
  0x45   : > { %13823 = vmatprep.mubr.msk.f32.mxu0 %vm391_vm0, %v346_v32 }
  0x48   : > { %13824 = vmatmul.mubr.msk.f32.gmra.mrb[20].mxu0 %vm391_vm0, %v347_v33  ;;  %v16344_v33 = vmov 0.0  }
  0x49   : > { %13826 = vmatprep.mubr.msk.f32.mxu0 %vm391_vm0, %v348_v34  ;;  %v16588_v34 = vrot.slane %v16344_v33, %v1102_v25 }
  0x4c   : > { %13827 = vmatmul.mubr.msk.f32.gmra.mrb[22].mxu0 %vm391_vm0, %v349_v35  ;;  %v16590_v35 = vrot.slane %v16344_v33, %v1109_v26 }
  0x4d   : > { %13829 = vmatprep.mubr.msk.f32.mxu0 %vm391_vm0, %v350_v36 }
  0x50   : > { %13830 = vmatmul.mubr.msk.f32.gmra.mrb[24].mxu0 %vm391_vm0, %v351_v37 }
  0x51   : > { %13832 = vmatprep.mubr.msk.f32.mxu0 %vm391_vm0, %v352_v38 }
  0x54   : > { %13833 = vmatmul.mubr.msk.f32.gmra.mrb[26].mxu0 %vm391_vm0, %v353_v39 }
  0x55   : > { %13835 = vmatprep.mubr.msk.f32.mxu0 %vm391_vm0, %v354_v40 }
  0x58   : > { %13836 = vmatmul.mubr.msk.f32.gmra.mrb[28].mxu0 %vm391_vm0, %v355_v41  ;;  %v11847_v41 = vsel %vm911_vm1, 1.0, %v16344_v33 }
  0x59   : > { %13838 = vmatprep.mubr.msk.f32.mxu0 %vm391_vm0, %v356_v42  ;;  %v16601_v60 = vrot.slane %v11847_v41, %v1102_v25  ;;  %v16603_v61 = vrot.slane %v11847_v41, %v1109_v26 }
  0x5c   : > { %13839 = vmatmul.mubr.msk.f32.gmra.mrb[30].mxu0 %vm391_vm0, %v357_v43 }
  0x5d   : > { %13841 = vmatprep.mubr.msk.f32.mxu0 %vm391_vm0, %v358_v44  ;;  %v11848_v44 = vsel %vm922_vm2, 1.0, %v16344_v33 }
  0x60   : > { %13842 = vmatmul.mubr.msk.f32.gmra.mrb[32].mxu0 %vm391_vm0, %v359_v45 }
  0x61   : > { %13844 = vmatprep.mubr.msk.f32.mxu0 %vm391_vm0, %v360_v46 }
  0x64   : > { %13845 = vmatmul.mubr.msk.f32.gmra.mrb[34].mxu0 %vm391_vm0, %v361_v47 }
  0x65   : > { %13847 = vmatprep.mubr.msk.f32.mxu0 %vm391_vm0, %v362_v48 }
  0x68   : > { %13848 = vmatmul.mubr.msk.f32.gmra.mrb[36].mxu0 %vm391_vm0, %v363_v49 }
  0x69   : > { %13850 = vmatprep.mubr.msk.f32.mxu0 %vm391_vm0, %v364_v50 }
  0x6c   : > { %13851 = vmatmul.mubr.msk.f32.gmra.mrb[38].mxu0 %vm391_vm0, %v365_v51 }
  0x6d   : > { %13853 = vmatprep.mubr.msk.f32.mxu0 %vm391_vm0, %v366_v52 }
  0x70   : > { %13854 = vmatmul.mubr.msk.f32.gmra.mrb[40].mxu0 %vm391_vm0, %v367_v53 }
  0x71   : > { %13856 = vmatprep.mubr.msk.f32.mxu0 %vm391_vm0, %v368_v54 }
  0x74   : > { %13857 = vmatmul.mubr.msk.f32.gmra.mrb[42].mxu0 %vm391_vm0, %v369_v55 }
  0x75   : > { %13859 = vmatprep.mubr.msk.f32.mxu0 %vm391_vm0, %v370_v56 }
  0x78   : > { %13860 = vmatmul.mubr.msk.f32.gmra.mrb[44].mxu0 %vm391_vm0, %v371_v57 }
  0x79   : > { %13862 = vmatprep.mubr.msk.f32.mxu0 %vm391_vm0, %v372_v58 }
  0x7c   : > { %13863 = vmatmul.mubr.msk.f32.gmra.mrb[46].mxu0 %vm391_vm0, %v373_v59 }
  0x7d   : > { %13865 = vmatprep.mubr.msk.f32.mxu0 %vm391_vm0, %v374_v1 }
  0x80   : > { %13866 = vmatmul.mubr.msk.f32.gmra.mrb[48].mxu0 %vm391_vm0, %v375_v3  ;;  %v16610_v3 = vrot.slane %v11848_v44, %v1102_v25  ;;  %v1534_v25 = vld [vmem:[%s19294_s4 + $0x18] sm:$0xff] }
  0xf3   : > { %v13795_v27 = vpop.f32.mrb[0].mxu0 }
  0xf4   : > { %v614_v29 = vadd.f32 %v13795_v27, %v16584_v24  ;;  %v608_v30 = vpop.f32.mrb[1].mxu0 }
  0xf5   : > { %v609_v31 = vadd.f32 %v16584_v24, %v608_v30 }
  0xf6   : > { %v858_v32 = vmax.f32 %v614_v29, 0.0  ;;  %v1533_v29 = vld [vmem:[%s19294_s4 + $0x10] sm:$0xff] }
  0xf7   : > { %v857_v36 = vmax.f32 %v609_v31, 0.0  ;;  %v13798_v37 = vpop.f32.mrb[2].mxu0  ;;  %v15352_v41 = vpack.c.bf16 %v1534_v25, %v1533_v29 }
  0xf8   : > { %v980_v38 = vcombine.high %v858_v32, %v858_v32  ;;  %v624_v39 = vadd.f32 %v13798_v37, %v16584_v24  ;;  %v618_v40 = vpop.f32.mrb[3].mxu0  ;;  %v1179_v45 = vmul.f32 %v16588_v34, %v858_v32 }
  0xf9   : > { %v979_v42 = vcombine.high %v857_v36, %v857_v36  ;;  %v619_v43 = vadd.f32 %v16584_v24, %v618_v40  ;;  %v1177_v48 = vmul.f32 %v16588_v34, %v857_v36 }
  0xfa   : > { %v1180_v46 = vmul.f32 %v16590_v35, %v980_v38  ;;  %v860_v47 = vmax.f32 %v624_v39, 0.0 }
  0xfb   : > { %v1178_v49 = vmul.f32 %v16590_v35, %v979_v42  ;;  %v859_v50 = vmax.f32 %v619_v43, 0.0  ;;  %v13801_v51 = vpop.f32.mrb[4].mxu0 }
  0xfc   : > { %v1358_v52 = vcombine.low %v1179_v45, %v1180_v46  ;;  %v982_v53 = vcombine.high %v860_v47, %v860_v47  ;;  %v634_v54 = vadd.f32 %v13801_v51, %v16584_v24  ;;  %v628_v55 = vpop.f32.mrb[5].mxu0  ;;  %v1183_v63 = vmul.f32 %v16590_v35, %v860_v47 }
  0xfd   : > { %v1357_v56 = vcombine.low %v1177_v48, %v1178_v49  ;;  %v981_v57 = vcombine.high %v859_v50, %v859_v50  ;;  %v1181_v58 = vmul.f32 %v16588_v34, %v859_v50  ;;  %v629_v59 = vadd.f32 %v16584_v24, %v628_v55 }
  0xfe   : > { %1439 = vst.msk [vmem:[#allocation2 + $0x8] sm:$0xff] %vm1437_vm3, %v1358_v52  ;;  %v862_v62 = vmax.f32 %v634_v54, 0.0  ;;  %v1184_v4 = vmul.f32 %v16588_v34, %v982_v53 }
  0xff   : > { %1438 = vst.msk [vmem:[#allocation2] sm:$0xff] %vm1437_vm3, %v1357_v56  ;;  %v1182_v0 = vmul.f32 %v16588_v34, %v981_v57  ;;  %v861_v1 = vmax.f32 %v629_v59, 0.0  ;;  %v13804_v2 = vpop.f32.mrb[6].mxu0 }
 0x100   : > { %1441 = vst.msk [vmem:[#allocation2 + $0x10] sm:$0xf] %vm1440_vm4, %v1181_v58  ;;  %v984_v5 = vcombine.high %v862_v62, %v862_v62  ;;  %v644_v7 = vadd.f32 %v13804_v2, %v16584_v24  ;;  %v638_v8 = vpop.f32.mrb[7].mxu0  ;;  %v1187_v18 = vmul.f32 %v16601_v60, %v862_v62 }
 0x101   : > { %v1359_v10 = vcombine.low %v1182_v0, %v1183_v63  ;;  %v983_v11 = vcombine.high %v861_v1, %v861_v1  ;;  %v1185_v13 = vmul.f32 %v16590_v35, %v861_v1  ;;  %v639_v14 = vadd.f32 %v16584_v24, %v638_v8 }
 0x102   : > { %v1188_v19 = vmul.f32 %v16603_v61, %v984_v5  ;;  %v864_v20 = vmax.f32 %v644_v7, 0.0 }
 0x103   : > { %1442 = vst.msk [vmem:[#allocation2 + $0x18] sm:$0xff] %vm1437_vm3, %v1359_v10  ;;  %v1186_v22 = vmul.f32 %v16588_v34, %v983_v11  ;;  %v1360_v23 = vcombine.low %v1184_v4, %v1185_v13  ;;  %v863_v27 = vmax.f32 %v639_v14, 0.0  ;;  %v13807_v28 = vpop.f32.mrb[8].mxu0  ;;  %v11917_v13 = vld [vmem:[%s19294_s4 + $0x40] sm:$0xff]  ;;  %v11918_v14 = vld [vmem:[%s19294_s4 + $0x48] sm:$0xff] }
 0x104   : > { %v1361_v30 = vcombine.low %v1187_v18, %v1188_v19  ;;  %v986_v31 = vcombine.high %v864_v20, %v864_v20  ;;  %v1191_v26 = vmul.f32 %v16610_v3, %v864_v20  ;;  %v654_v32 = vadd.f32 %v13807_v28, %v16584_v24  ;;  %v648_v33 = vpop.f32.mrb[9].mxu0 }
 0x105   : > { %1443 = vst.msk [vmem:[#allocation2 + $0x20] sm:$0xff] %vm1437_vm3, %v1360_v23  ;;  %v985_v36 = vcombine.high %v863_v27, %v863_v27  ;;  %v649_v37 = vadd.f32 %v16584_v24, %v648_v33  ;;  %v1189_v42 = vmul.f32 %v16616_v17, %v863_v27 }
 0x106   : > { %1444 = vst.msk [vmem:[#allocation2 + $0x28] sm:$0xf] %vm1440_vm4, %v1186_v22  ;;  %1447 = vst.msk [vmem:[#allocation2 + $0x40] sm:$0xf] %vm1440_vm4, %v1191_v26  ;;  %v866_v38 = vmax.f32 %v654_v32, 0.0  ;;  %v1535_v39 = vld [vmem:[#allocation2 + $0x1] sm:$0xff]  ;;  %v1192_v46 = vmul.f32 %v16601_v60, %v986_v31  ;;  %v16667_v22 = vpack.c.bf16 %v11918_v14, %v11917_v13 }
 0x107   : > { %1445 = vst.msk [vmem:[#allocation2 + $0x30] sm:$0xff] %vm1437_vm3, %v1361_v30  ;;  %v1536_v40 = vld [vmem:[#allocation2 + $0x9] sm:$0xff]  ;;  %v1190_v43 = vmul.f32 %v16620_v21, %v985_v36  ;;  %v865_v44 = vmax.f32 %v649_v37, 0.0  ;;  %v13810_v45 = vpop.f32.mrb[10].mxu0  ;;  %13876 = vmatprep.mubr.msk.f32.mxu0 %vm1437_vm3, %v1535_v39 }
 0x108   : > { %v988_v47 = vcombine.high %v866_v38, %v866_v38  ;;  %v664_v48 = vadd.f32 %v13810_v45, %v16584_v24  ;;  %v658_v49 = vpop.f32.mrb[11].mxu0  ;;  %13877 = vmatmul.mubr.msk.f32.vlgmr.msra.gmra.mrb[50].mxu0 %vm1437_vm3, %v1536_v40  ;;  %v1195_v56 = vmul.f32 %v16620_v21, %v866_v38 }
 0x109   : > { %v1362_v50 = vcombine.low %v1189_v42, %v1190_v43  ;;  %v987_v51 = vcombine.high %v865_v44, %v865_v44  ;;  %v1193_v52 = vmul.f32 %v16603_v61, %v865_v44  ;;  %v659_v53 = vadd.f32 %v16584_v24, %v658_v49  ;;  %15351 = vmatpush3.bf16.msra.mxu0 %v16578_v15 }
 0x10a   : > { %v1196_v54 = vmul.f32 %v16610_v3, %v988_v47  ;;  %v868_v55 = vmax.f32 %v664_v48, 0.0  ;;  %15353 = vmatprep.subr.bf16.mxu0 %v15352_v41 }
 0x10b   : > { %1446 = vst.msk [vmem:[#allocation2 + $0x38] sm:$0xff] %vm1437_vm3, %v1362_v50  ;;  %v1194_v57 = vmul.f32 %v16616_v17, %v987_v51  ;;  %v1363_v58 = vcombine.low %v1192_v46, %v1193_v52  ;;  %v867_v59 = vmax.f32 %v659_v53, 0.0  ;;  %v13813_v62 = vpop.f32.mrb[12].mxu0 }
 0x10c   : > { %1450 = vst.msk [vmem:[#allocation2 + $0x58] sm:$0xf] %vm1440_vm4, %v1196_v54  ;;  %v990_v63 = vcombine.high %v868_v55, %v868_v55  ;;  %v674_v0 = vadd.f32 %v13813_v62, %v16584_v24  ;;  %v668_v1 = vpop.f32.mrb[13].mxu0  ;;  %v1537_v15 = vld [vmem:[#allocation2 + $0x19] sm:$0xff]  ;;  %v1199_v8 = vmul.f32 %v16616_v17, %v868_v55 }
 0x10d   : > { %v1538_v2 = vld [vmem:[#allocation2 + $0x21] sm:$0xff]  ;;  %v1364_v4 = vcombine.low %v1194_v57, %v1195_v56  ;;  %1448 = vst.msk [vmem:[#allocation2 + $0x48] sm:$0xff] %vm1437_vm3, %v1363_v58  ;;  %v989_v5 = vcombine.high %v867_v59, %v867_v59  ;;  %v669_v7 = vadd.f32 %v16584_v24, %v668_v1  ;;  %13879 = vmatprep.mubr.msk.f32.mxu0 %vm1437_vm3, %v1537_v15  ;;  %v12279_v58 = vld [vmem:[%s19294_s4 + $0x190] sm:$0xff] }
 0x10e   : > { %v1200_v10 = vmul.f32 %v16620_v21, %v990_v63  ;;  %v870_v11 = vmax.f32 %v674_v0, 0.0  ;;  %13880 = vmatmul.mubr.msk.f32.gmra.mrb[52].mxu0 %vm1437_vm3, %v1538_v2  ;;  %v1197_v16 = vmul.f32 %v16601_v60, %v867_v59  ;;  %v12280_v59 = vld [vmem:[%s19294_s4 + $0x198] sm:$0xff] }
 0x10f   : > { %1449 = vst.msk [vmem:[#allocation2 + $0x50] sm:$0xff] %vm1437_vm3, %v1364_v4  ;;  %v1198_v18 = vmul.f32 %v16603_v61, %v989_v5  ;;  %v869_v19 = vmax.f32 %v669_v7, 0.0  ;;  %v13816_v20 = vpop.f32.mrb[14].mxu0  ;;  %15355 = vmatpush3.bf16.msra.mxu0 %v15352_v41 }
 0x110   : > { %v1366_v23 = vcombine.low %v1199_v8, %v1200_v10  ;;  %v992_v27 = vcombine.high %v870_v11, %v870_v11  ;;  %v684_v28 = vadd.f32 %v13816_v20, %v16584_v24  ;;  %v678_v29 = vpop.f32.mrb[15].mxu0  ;;  %15357 = vmatprep.subr.bf16.mxu0 %v16667_v22  ;;  %v1203_v37 = vmul.f32 %v16603_v61, %v870_v11 }
 0x111   : > { %v1365_v25 = vcombine.low %v1197_v16, %v1198_v18  ;;  %v991_v30 = vcombine.high %v869_v19, %v869_v19  ;;  %v1201_v31 = vmul.f32 %v16610_v3, %v869_v19  ;;  %v679_v26 = vadd.f32 %v16584_v24, %v678_v29 }
 0x112   : > { %1452 = vst.msk [vmem:[#allocation2 + $0x68] sm:$0xff] %vm1437_vm3, %v1366_v23  ;;  %v872_v32 = vmax.f32 %v684_v28, 0.0  ;;  %v1539_v33 = vld [vmem:[#allocation2 + $0x31] sm:$0xff]  ;;  %v1540_v36 = vld [vmem:[#allocation2 + $0x39] sm:$0xff]  ;;  %v1204_v41 = vmul.f32 %v16616_v17, %v992_v27  ;;  %v15440_v10 = vpack.c.bf16 %v12280_v59, %v12279_v58 }
 0x113   : > { %1451 = vst.msk [vmem:[#allocation2 + $0x60] sm:$0xff] %vm1437_vm3, %v1365_v25  ;;  %v1202_v38 = vmul.f32 %v16601_v60, %v991_v30  ;;  %v871_v39 = vmax.f32 %v679_v26, 0.0  ;;  %v13819_v40 = vpop.f32.mrb[16].mxu0  ;;  %13882 = vmatprep.mubr.msk.f32.mxu0 %vm1437_vm3, %v1539_v33  ;;  %v12313_v26 = vld [vmem:[%s19294_s4 + $0x1a0] sm:$0xff] }
 0x114   : > { %1453 = vst.msk [vmem:[#allocation2 + $0x70] sm:$0xf] %vm1440_vm4, %v1201_v31  ;;  %v994_v42 = vcombine.high %v872_v32, %v872_v32  ;;  %v694_v43 = vadd.f32 %v13819_v40, %v16584_v24  ;;  %v688_v44 = vpop.f32.mrb[17].mxu0  ;;  %13883 = vmatmul.mubr.msk.f32.gmra.mrb[54].mxu0 %vm1437_vm3, %v1540_v36  ;;  %v1207_v49 = vmul.f32 %v16601_v60, %v872_v32  ;;  %v12314_v32 = vld [vmem:[%s19294_s4 + $0x1a8] sm:$0xff] }
 0x115   : > { %v1367_v45 = vcombine.low %v1202_v38, %v1203_v37  ;;  %v993_v46 = vcombine.high %v871_v39, %v871_v39  ;;  %v1205_v47 = vmul.f32 %v16620_v21, %v871_v39  ;;  %v689_v48 = vadd.f32 %v16584_v24, %v688_v44 }
 0x116   : > { %v1208_v50 = vmul.f32 %v16603_v61, %v994_v42  ;;  %v874_v51 = vmax.f32 %v694_v43, 0.0  ;;  %v1541_v52 = vld [vmem:[#allocation2 + $0x49] sm:$0xff]  ;;  %v1542_v53 = vld [vmem:[#allocation2 + $0x51] sm:$0xff] }
 0x117   : > { %1454 = vst.msk [vmem:[#allocation2 + $0x78] sm:$0xff] %vm1437_vm3, %v1367_v45  ;;  %v1206_v54 = vmul.f32 %v16610_v3, %v993_v46  ;;  %v1368_v55 = vcombine.low %v1204_v41, %v1205_v47  ;;  %v873_v56 = vmax.f32 %v689_v48, 0.0  ;;  %v13822_v57 = vpop.f32.mrb[18].mxu0  ;;  %13885 = vmatprep.mubr.msk.f32.mxu0 %vm1437_vm3, %v1541_v52  ;;  %v16729_v47 = vpack.c.bf16 %v12314_v32, %v12313_v26 }
 0x118   : > { %v1369_v62 = vcombine.low %v1207_v49, %v1208_v50  ;;  %v996_v63 = vcombine.high %v874_v51, %v874_v51  ;;  %v1211_v0 = vmul.f32 %v16610_v3, %v874_v51  ;;  %v704_v1 = vadd.f32 %v13822_v57, %v16584_v24  ;;  %v698_v15 = vpop.f32.mrb[19].mxu0  ;;  %13886 = vmatmul.mubr.msk.f32.gmra.mrb[56].mxu0 %vm1437_vm3, %v1542_v53 }
 0x119   : > { %1455 = vst.msk [vmem:[#allocation2 + $0x80] sm:$0xff] %vm1437_vm3, %v1368_v55  ;;  %v995_v2 = vcombine.high %v873_v56, %v873_v56  ;;  %v699_v4 = vadd.f32 %v16584_v24, %v698_v15  ;;  %v1209_v11 = vmul.f32 %v16616_v17, %v873_v56 }
 0x11a   : > { %1456 = vst.msk [vmem:[#allocation2 + $0x88] sm:$0xf] %vm1440_vm4, %v1206_v54  ;;  %1459 = vst.msk [vmem:[#allocation2 + $0xa0] sm:$0xf] %vm1440_vm4, %v1211_v0  ;;  %v876_v5 = vmax.f32 %v704_v1, 0.0  ;;  %v1543_v7 = vld [vmem:[#allocation2 + $0x61] sm:$0xff]  ;;  %v1212_v18 = vmul.f32 %v16601_v60, %v996_v63 }
 0x11b   : > { %1457 = vst.msk [vmem:[#allocation2 + $0x90] sm:$0xff] %vm1437_vm3, %v1369_v62  ;;  %v1544_v8 = vld [vmem:[#allocation2 + $0x69] sm:$0xff]  ;;  %v1210_v13 = vmul.f32 %v16620_v21, %v995_v2  ;;  %v875_v14 = vmax.f32 %v699_v4, 0.0  ;;  %v13825_v16 = vpop.f32.mrb[20].mxu0  ;;  %13888 = vmatprep.mubr.msk.f32.mxu0 %vm1437_vm3, %v1543_v7  ;;  %14498 = vmatprep.mubr.msk.f32.mxu1 %vm1437_vm3, %v1543_v7 }
 0x11c   : > { %v998_v19 = vcombine.high %v876_v5, %v876_v5  ;;  %v714_v20 = vadd.f32 %v13825_v16, %v16584_v24  ;;  %v708_v23 = vpop.f32.mrb[21].mxu0  ;;  %13889 = vmatmul.mubr.msk.f32.gmra.mrb[58].mxu0 %vm1437_vm3, %v1544_v8  ;;  %14499 = vmatmul.mubr.msk.f32.vlgmr.msra.gmra.mrb[0].mxu1 %vm1437_vm3, %v1544_v8  ;;  %v1215_v33 = vmul.f32 %v16620_v21, %v876_v5 }
 0x11d   : > { %v1370_v27 = vcombine.low %v1209_v11, %v1210_v13  ;;  %v997_v28 = vcombine.high %v875_v14, %v875_v14  ;;  %v1213_v29 = vmul.f32 %v16603_v61, %v875_v14  ;;  %v709_v25 = vadd.f32 %v16584_v24, %v708_v23  ;;  %15439 = vmatpush3.bf16.msra.mxu1 %v16569_v12 }
 0x11e   : > { %v1216_v30 = vmul.f32 %v16610_v3, %v998_v19  ;;  %v878_v31 = vmax.f32 %v714_v20, 0.0  ;;  %15441 = vmatprep.subr.bf16.mxu1 %v15440_v10 }
 0x11f   : > { %1458 = vst.msk [vmem:[#allocation2 + $0x98] sm:$0xff] %vm1437_vm3, %v1370_v27  ;;  %v1214_v36 = vmul.f32 %v16616_v17, %v997_v28  ;;  %v1371_v37 = vcombine.low %v1212_v18, %v1213_v29  ;;  %v877_v12 = vmax.f32 %v709_v25, 0.0  ;;  %v13828_v38 = vpop.f32.mrb[22].mxu0 }
 0x120   : > { %1462 = vst.msk [vmem:[#allocation2 + $0xb8] sm:$0xf] %vm1440_vm4, %v1216_v30  ;;  %v1000_v39 = vcombine.high %v878_v31, %v878_v31  ;;  %v724_v40 = vadd.f32 %v13828_v38, %v16584_v24  ;;  %v718_v41 = vpop.f32.mrb[23].mxu0  ;;  %v1545_v42 = vld [vmem:[#allocation2 + $0x79] sm:$0xff]  ;;  %v1219_v48 = vmul.f32 %v16616_v17, %v878_v31 }
 0x121   : > { %v1546_v43 = vld [vmem:[#allocation2 + $0x81] sm:$0xff]  ;;  %v1372_v44 = vcombine.low %v1214_v36, %v1215_v33  ;;  %1460 = vst.msk [vmem:[#allocation2 + $0xa8] sm:$0xff] %vm1437_vm3, %v1371_v37  ;;  %v999_v45 = vcombine.high %v877_v12, %v877_v12  ;;  %v719_v46 = vadd.f32 %v16584_v24, %v718_v41  ;;  %13891 = vmatprep.mubr.msk.f32.mxu0 %vm1437_vm3, %v1545_v42 }
 0x122   : > { %v1220_v49 = vmul.f32 %v16620_v21, %v1000_v39  ;;  %v880_v50 = vmax.f32 %v724_v40, 0.0  ;;  %14501 = vmatprep.mubr.msk.f32.mxu1 %vm1437_vm3, %v1545_v42  ;;  %13892 = vmatmul.mubr.msk.f32.gmra.mrb[60].mxu0 %vm1437_vm3, %v1546_v43  ;;  %v1217_v51 = vmul.f32 %v16601_v60, %v877_v12 }
 0x123   : > { %1461 = vst.msk [vmem:[#allocation2 + $0xb0] sm:$0xff] %vm1437_vm3, %v1372_v44  ;;  %v1218_v52 = vmul.f32 %v16603_v61, %v999_v45  ;;  %v879_v53 = vmax.f32 %v719_v46, 0.0  ;;  %14502 = vmatmul.mubr.msk.f32.gmra.mrb[2].mxu1 %vm1437_vm3, %v1546_v43  ;;  %v13831_v54 = vpop.f32.mrb[24].mxu0 }
 0x124   : > { %v1374_v55 = vcombine.low %v1219_v48, %v1220_v49  ;;  %v1002_v56 = vcombine.high %v880_v50, %v880_v50  ;;  %v734_v57 = vadd.f32 %v13831_v54, %v16584_v24  ;;  %v728_v58 = vpop.f32.mrb[25].mxu0  ;;  %15443 = vmatpush3.bf16.msra.mxu1 %v15440_v10  ;;  %v1223_v4 = vmul.f32 %v16603_v61, %v880_v50 }
 0x125   : > { %v1373_v59 = vcombine.low %v1217_v51, %v1218_v52  ;;  %v1001_v62 = vcombine.high %v879_v53, %v879_v53  ;;  %v1221_v63 = vmul.f32 %v16610_v3, %v879_v53  ;;  %v729_v0 = vadd.f32 %v16584_v24, %v728_v58  ;;  %15445 = vmatprep.subr.bf16.mxu1 %v16729_v47 }
 0x126   : > { %1464 = vst.msk [vmem:[#allocation2 + $0xc8] sm:$0xff] %vm1437_vm3, %v1374_v55  ;;  %v882_v1 = vmax.f32 %v734_v57, 0.0  ;;  %v1547_v15 = vld [vmem:[#allocation2 + $0x91] sm:$0xff]  ;;  %v1548_v2 = vld [vmem:[#allocation2 + $0x99] sm:$0xff]  ;;  %v1224_v10 = vmul.f32 %v16616_v17, %v1002_v56 }
 0x127   : > { %1463 = vst.msk [vmem:[#allocation2 + $0xc0] sm:$0xff] %vm1437_vm3, %v1373_v59  ;;  %v1222_v5 = vmul.f32 %v16601_v60, %v1001_v62  ;;  %v881_v7 = vmax.f32 %v729_v0, 0.0  ;;  %v13834_v8 = vpop.f32.mrb[26].mxu0  ;;  %13894 = vmatprep.mubr.msk.f32.mxu0 %vm1437_vm3, %v1547_v15  ;;  %14504 = vmatprep.mubr.msk.f32.mxu1 %vm1437_vm3, %v1547_v15 }
 0x128   : > { %1465 = vst.msk [vmem:[#allocation2 + $0xd0] sm:$0xf] %vm1440_vm4, %v1221_v63  ;;  %v1004_v11 = vcombine.high %v882_v1, %v882_v1  ;;  %v744_v13 = vadd.f32 %v13834_v8, %v16584_v24  ;;  %v738_v14 = vpop.f32.mrb[27].mxu0  ;;  %13895 = vmatmul.mubr.msk.f32.gmra.mrb[62].mxu0 %vm1437_vm3, %v1548_v2  ;;  %14505 = vmatmul.mubr.msk.f32.gmra.mrb[4].mxu1 %vm1437_vm3, %v1548_v2 }
 0x129   : > { %v1375_v16 = vcombine.low %v1222_v5, %v1223_v4  ;;  %v1003_v18 = vcombine.high %v881_v7, %v881_v7  ;;  %v1225_v19 = vmul.f32 %v16620_v21, %v881_v7  ;;  %v739_v20 = vadd.f32 %v16584_v24, %v738_v14 }
 0x12a   : > { %v1227_v23 = vmul.f32 %v16601_v60, %v882_v1  ;;  %v1228_v27 = vmul.f32 %v16603_v61, %v1004_v11  ;;  %v884_v28 = vmax.f32 %v744_v13, 0.0  ;;  %v1549_v29 = vld [vmem:[#allocation2 + $0xa9] sm:$0xff]  ;;  %v1550_v25 = vld [vmem:[#allocation2 + $0xb1] sm:$0xff] }
 0x12b   : > { %1466 = vst.msk [vmem:[#allocation2 + $0xd8] sm:$0xff] %vm1437_vm3, %v1375_v16  ;;  %v1226_v30 = vmul.f32 %v16610_v3, %v1003_v18  ;;  %v1376_v31 = vcombine.low %v1224_v10, %v1225_v19  ;;  %v883_v26 = vmax.f32 %v739_v20, 0.0  ;;  %v13837_v32 = vpop.f32.mrb[28].mxu0  ;;  %13897 = vmatprep.mubr.msk.f32.mxu0 %vm1437_vm3, %v1549_v29  ;;  %14507 = vmatprep.mubr.msk.f32.mxu1 %vm1437_vm3, %v1549_v29 }
 0x12c   : > { %v1377_v33 = vcombine.low %v1227_v23, %v1228_v27  ;;  %v1006_v36 = vcombine.high %v884_v28, %v884_v28  ;;  %v1231_v37 = vmul.f32 %v16610_v3, %v884_v28  ;;  %v754_v12 = vadd.f32 %v13837_v32, %v16584_v24  ;;  %v748_v38 = vpop.f32.mrb[29].mxu0  ;;  %13898 = vmatmul.mubr.msk.f32.gmra.mrb[64].mxu0 %vm1437_vm3, %v1550_v25 }
 0x12d   : > { %1467 = vst.msk [vmem:[#allocation2 + $0xe0] sm:$0xff] %vm1437_vm3, %v1376_v31  ;;  %v1005_v39 = vcombine.high %v883_v26, %v883_v26  ;;  %v749_v40 = vadd.f32 %v16584_v24, %v748_v38  ;;  %14508 = vmatmul.mubr.msk.f32.gmra.mrb[6].mxu1 %vm1437_vm3, %v1550_v25  ;;  %v1229_v44 = vmul.f32 %v16616_v17, %v883_v26 }
 0x12e   : > { %1468 = vst.msk [vmem:[#allocation2 + $0xe8] sm:$0xf] %vm1440_vm4, %v1226_v30  ;;  %1471 = vst.msk [vmem:[#allocation2 + $0x100] sm:$0xf] %vm1440_vm4, %v1231_v37  ;;  %v886_v41 = vmax.f32 %v754_v12, 0.0  ;;  %v1551_v42 = vld [vmem:[#allocation2 + $0xc1] sm:$0xff]  ;;  %v1232_v49 = vmul.f32 %v16601_v60, %v1006_v36 }
 0x12f   : > { %1469 = vst.msk [vmem:[#allocation2 + $0xf0] sm:$0xff] %vm1437_vm3, %v1377_v33  ;;  %v1552_v43 = vld [vmem:[#allocation2 + $0xc9] sm:$0xff]  ;;  %v1230_v45 = vmul.f32 %v16620_v21, %v1005_v39  ;;  %v885_v46 = vmax.f32 %v749_v40, 0.0  ;;  %v13840_v48 = vpop.f32.mrb[30].mxu0  ;;  %13900 = vmatprep.mubr.msk.f32.mxu0 %vm1437_vm3, %v1551_v42  ;;  %14510 = vmatprep.mubr.msk.f32.mxu1 %vm1437_vm3, %v1551_v42 }
 0x130   : > { %v1008_v50 = vcombine.high %v886_v41, %v886_v41  ;;  %v764_v51 = vadd.f32 %v13840_v48, %v16584_v24  ;;  %v758_v52 = vpop.f32.mrb[31].mxu0  ;;  %13901 = vmatmul.mubr.msk.f32.gmra.mrb[66].mxu0 %vm1437_vm3, %v1552_v43  ;;  %v1235_v59 = vmul.f32 %v16620_v21, %v886_v41 }
 0x131   : > { %v1378_v53 = vcombine.low %v1229_v44, %v1230_v45  ;;  %v1007_v54 = vcombine.high %v885_v46, %v885_v46  ;;  %v1233_v55 = vmul.f32 %v16603_v61, %v885_v46  ;;  %v759_v56 = vadd.f32 %v16584_v24, %v758_v52  ;;  %14511 = vmatmul.mubr.msk.f32.gmra.mrb[8].mxu1 %vm1437_vm3, %v1552_v43 }
 0x132   : > { %v1236_v57 = vmul.f32 %v16610_v3, %v1008_v50  ;;  %v888_v58 = vmax.f32 %v764_v51, 0.0 }
 0x133   : > { %1470 = vst.msk [vmem:[#allocation2 + $0xf8] sm:$0xff] %vm1437_vm3, %v1378_v53  ;;  %v1234_v62 = vmul.f32 %v16616_v17, %v1007_v54  ;;  %v1379_v63 = vcombine.low %v1232_v49, %v1233_v55  ;;  %v887_v0 = vmax.f32 %v759_v56, 0.0  ;;  %v13843_v1 = vpop.f32.mrb[32].mxu0 }
 0x134   : > { %1474 = vst.msk [vmem:[#allocation2 + $0x118] sm:$0xf] %vm1440_vm4, %v1236_v57  ;;  %v1010_v15 = vcombine.high %v888_v58, %v888_v58  ;;  %v774_v2 = vadd.f32 %v13843_v1, %v16584_v24  ;;  %v768_v4 = vpop.f32.mrb[33].mxu0  ;;  %v1553_v5 = vld [vmem:[#allocation2 + $0xd9] sm:$0xff]  ;;  %v1239_v13 = vmul.f32 %v16616_v17, %v888_v58 }
 0x135   : > { %v1554_v7 = vld [vmem:[#allocation2 + $0xe1] sm:$0xff]  ;;  %v1380_v8 = vcombine.low %v1234_v62, %v1235_v59  ;;  %1472 = vst.msk [vmem:[#allocation2 + $0x108] sm:$0xff] %vm1437_vm3, %v1379_v63  ;;  %v1009_v10 = vcombine.high %v887_v0, %v887_v0  ;;  %v769_v11 = vadd.f32 %v16584_v24, %v768_v4  ;;  %13903 = vmatprep.mubr.msk.f32.mxu0 %vm1437_vm3, %v1553_v5 }
 0x136   : > { %v1240_v14 = vmul.f32 %v16620_v21, %v1010_v15  ;;  %v890_v16 = vmax.f32 %v774_v2, 0.0  ;;  %14513 = vmatprep.mubr.msk.f32.mxu1 %vm1437_vm3, %v1553_v5  ;;  %13904 = vmatmul.mubr.msk.f32.gmra.mrb[68].mxu0 %vm1437_vm3, %v1554_v7  ;;  %v1237_v18 = vmul.f32 %v16601_v60, %v887_v0 }
 0x137   : > { %1473 = vst.msk [vmem:[#allocation2 + $0x110] sm:$0xff] %vm1437_vm3, %v1380_v8  ;;  %v1238_v19 = vmul.f32 %v16603_v61, %v1009_v10  ;;  %v889_v20 = vmax.f32 %v769_v11, 0.0  ;;  %14514 = vmatmul.mubr.msk.f32.gmra.mrb[10].mxu1 %vm1437_vm3, %v1554_v7  ;;  %v13846_v23 = vpop.f32.mrb[34].mxu0 }
 0x138   : > { %v1382_v27 = vcombine.low %v1239_v13, %v1240_v14  ;;  %v1012_v28 = vcombine.high %v890_v16, %v890_v16  ;;  %v784_v29 = vadd.f32 %v13846_v23, %v16584_v24  ;;  %v778_v25 = vpop.f32.mrb[35].mxu0  ;;  %v1243_v12 = vmul.f32 %v16603_v61, %v890_v16 }
 0x139   : > { %v1381_v30 = vcombine.low %v1237_v18, %v1238_v19  ;;  %v1011_v31 = vcombine.high %v889_v20, %v889_v20  ;;  %v1241_v26 = vmul.f32 %v16610_v3, %v889_v20  ;;  %v779_v32 = vadd.f32 %v16584_v24, %v778_v25 }
 0x13a   : > { %1476 = vst.msk [vmem:[#allocation2 + $0x128] sm:$0xff] %vm1437_vm3, %v1382_v27  ;;  %v892_v33 = vmax.f32 %v784_v29, 0.0  ;;  %v1555_v36 = vld [vmem:[#allocation2 + $0xf1] sm:$0xff]  ;;  %v1556_v37 = vld [vmem:[#allocation2 + $0xf9] sm:$0xff]  ;;  %v1244_v41 = vmul.f32 %v16616_v17, %v1012_v28 }
 0x13b   : > { %1475 = vst.msk [vmem:[#allocation2 + $0x120] sm:$0xff] %vm1437_vm3, %v1381_v30  ;;  %v1242_v38 = vmul.f32 %v16601_v60, %v1011_v31  ;;  %v891_v39 = vmax.f32 %v779_v32, 0.0  ;;  %v13849_v40 = vpop.f32.mrb[36].mxu0  ;;  %13906 = vmatprep.mubr.msk.f32.mxu0 %vm1437_vm3, %v1555_v36  ;;  %14516 = vmatprep.mubr.msk.f32.mxu1 %vm1437_vm3, %v1555_v36 }
 0x13c   : > { %1477 = vst.msk [vmem:[#allocation2 + $0x130] sm:$0xf] %vm1440_vm4, %v1241_v26  ;;  %v1014_v42 = vcombine.high %v892_v33, %v892_v33  ;;  %v794_v43 = vadd.f32 %v13849_v40, %v16584_v24  ;;  %v788_v44 = vpop.f32.mrb[37].mxu0  ;;  %13907 = vmatmul.mubr.msk.f32.gmra.mrb[70].mxu0 %vm1437_vm3, %v1556_v37  ;;  %14517 = vmatmul.mubr.msk.f32.gmra.mrb[12].mxu1 %vm1437_vm3, %v1556_v37 }
 0x13d   : > { %v1383_v45 = vcombine.low %v1242_v38, %v1243_v12  ;;  %v1013_v46 = vcombine.high %v891_v39, %v891_v39  ;;  %v1245_v48 = vmul.f32 %v16620_v21, %v891_v39  ;;  %v789_v49 = vadd.f32 %v16584_v24, %v788_v44 }
 0x13e   : > { %v1247_v50 = vmul.f32 %v16601_v60, %v892_v33  ;;  %v1248_v51 = vmul.f32 %v16603_v61, %v1014_v42  ;;  %v894_v52 = vmax.f32 %v794_v43, 0.0  ;;  %v1557_v53 = vld [vmem:[#allocation2 + $0x109] sm:$0xff]  ;;  %v1558_v54 = vld [vmem:[#allocation2 + $0x111] sm:$0xff] }
 0x13f   : > { %1478 = vst.msk [vmem:[#allocation2 + $0x138] sm:$0xff] %vm1437_vm3, %v1383_v45  ;;  %v1246_v55 = vmul.f32 %v16610_v3, %v1013_v46  ;;  %v1384_v56 = vcombine.low %v1244_v41, %v1245_v48  ;;  %v893_v57 = vmax.f32 %v789_v49, 0.0  ;;  %v13852_v58 = vpop.f32.mrb[38].mxu0  ;;  %13909 = vmatprep.mubr.msk.f32.mxu0 %vm1437_vm3, %v1557_v53  ;;  %14519 = vmatprep.mubr.msk.f32.mxu1 %vm1437_vm3, %v1557_v53 }
 0x140   : > { %v1385_v59 = vcombine.low %v1247_v50, %v1248_v51  ;;  %v1016_v62 = vcombine.high %v894_v52, %v894_v52  ;;  %v1251_v63 = vmul.f32 %v16610_v3, %v894_v52  ;;  %v804_v0 = vadd.f32 %v13852_v58, %v16584_v24  ;;  %v798_v1 = vpop.f32.mrb[39].mxu0  ;;  %13910 = vmatmul.mubr.msk.f32.gmra.mrb[72].mxu0 %vm1437_vm3, %v1558_v54 }
 0x141   : > { %1479 = vst.msk [vmem:[#allocation2 + $0x140] sm:$0xff] %vm1437_vm3, %v1384_v56  ;;  %v1015_v15 = vcombine.high %v893_v57, %v893_v57  ;;  %v799_v2 = vadd.f32 %v16584_v24, %v798_v1  ;;  %14520 = vmatmul.mubr.msk.f32.gmra.mrb[14].mxu1 %vm1437_vm3, %v1558_v54  ;;  %v1249_v8 = vmul.f32 %v16616_v17, %v893_v57 }
 0x142   : > { %1480 = vst.msk [vmem:[#allocation2 + $0x148] sm:$0xf] %vm1440_vm4, %v1246_v55  ;;  %1483 = vst.msk [vmem:[#allocation2 + $0x160] sm:$0xf] %vm1440_vm4, %v1251_v63  ;;  %v896_v4 = vmax.f32 %v804_v0, 0.0  ;;  %v1559_v5 = vld [vmem:[#allocation2 + $0x121] sm:$0xff]  ;;  %v1252_v14 = vmul.f32 %v16601_v60, %v1016_v62 }
 0x143   : > { %1481 = vst.msk [vmem:[#allocation2 + $0x150] sm:$0xff] %vm1437_vm3, %v1385_v59  ;;  %v1560_v7 = vld [vmem:[#allocation2 + $0x129] sm:$0xff]  ;;  %v1250_v10 = vmul.f32 %v16620_v21, %v1015_v15  ;;  %v895_v11 = vmax.f32 %v799_v2, 0.0  ;;  %v13855_v13 = vpop.f32.mrb[40].mxu0  ;;  %13912 = vmatprep.mubr.msk.f32.mxu0 %vm1437_vm3, %v1559_v5  ;;  %14522 = vmatprep.mubr.msk.f32.mxu1 %vm1437_vm3, %v1559_v5 }
 0x144   : > { %v1018_v16 = vcombine.high %v896_v4, %v896_v4  ;;  %v814_v18 = vadd.f32 %v13855_v13, %v16584_v24  ;;  %v808_v19 = vpop.f32.mrb[41].mxu0  ;;  %13913 = vmatmul.mubr.msk.f32.gmra.mrb[74].mxu0 %vm1437_vm3, %v1560_v7  ;;  %v1255_v30 = vmul.f32 %v16620_v21, %v896_v4 }
 0x145   : > { %v1386_v20 = vcombine.low %v1249_v8, %v1250_v10  ;;  %v1017_v23 = vcombine.high %v895_v11, %v895_v11  ;;  %v1253_v27 = vmul.f32 %v16603_v61, %v895_v11  ;;  %v809_v28 = vadd.f32 %v16584_v24, %v808_v19  ;;  %14523 = vmatmul.mubr.msk.f32.gmra.mrb[16].mxu1 %vm1437_vm3, %v1560_v7 }
 0x146   : > { %v1256_v29 = vmul.f32 %v16610_v3, %v1018_v16  ;;  %v898_v25 = vmax.f32 %v814_v18, 0.0 }
 0x147   : > { %1482 = vst.msk [vmem:[#allocation2 + $0x158] sm:$0xff] %vm1437_vm3, %v1386_v20  ;;  %v1254_v31 = vmul.f32 %v16616_v17, %v1017_v23  ;;  %v1387_v26 = vcombine.low %v1252_v14, %v1253_v27  ;;  %v897_v32 = vmax.f32 %v809_v28, 0.0  ;;  %v13858_v33 = vpop.f32.mrb[42].mxu0 }
 0x148   : > { %1486 = vst.msk [vmem:[#allocation2 + $0x178] sm:$0xf] %vm1440_vm4, %v1256_v29  ;;  %v1020_v36 = vcombine.high %v898_v25, %v898_v25  ;;  %v824_v37 = vadd.f32 %v13858_v33, %v16584_v24  ;;  %v818_v12 = vpop.f32.mrb[43].mxu0  ;;  %v1561_v38 = vld [vmem:[#allocation2 + $0x139] sm:$0xff]  ;;  %v1259_v43 = vmul.f32 %v16616_v17, %v898_v25  ;;  %v1500_v33 = vld [vmem:[#allocation2 + $0x8] sm:$0xff] }
 0x149   : > { %v1562_v39 = vld [vmem:[#allocation2 + $0x141] sm:$0xff]  ;;  %v1388_v40 = vcombine.low %v1254_v31, %v1255_v30  ;;  %1484 = vst.msk [vmem:[#allocation2 + $0x168] sm:$0xff] %vm1437_vm3, %v1387_v26  ;;  %v1019_v41 = vcombine.high %v897_v32, %v897_v32  ;;  %v819_v42 = vadd.f32 %v16584_v24, %v818_v12  ;;  %13915 = vmatprep.mubr.msk.f32.mxu0 %vm1437_vm3, %v1561_v38 }
 0x14a   : > { %v1260_v44 = vmul.f32 %v16620_v21, %v1020_v36  ;;  %v900_v45 = vmax.f32 %v824_v37, 0.0  ;;  %14525 = vmatprep.mubr.msk.f32.mxu1 %vm1437_vm3, %v1561_v38  ;;  %13916 = vmatmul.mubr.msk.f32.gmra.mrb[76].mxu0 %vm1437_vm3, %v1562_v39  ;;  %v1257_v46 = vmul.f32 %v16601_v60, %v897_v32  ;;  %v1501_v36 = vld [vmem:[#allocation2 + $0x18] sm:$0xff]  ;;  %v11953_v37 = vld [vmem:[%s19294_s4 + $0x60] sm:$0xff]  ;;  %v11954_v12 = vld [vmem:[%s19294_s4 + $0x68] sm:$0xff] }
 0x14b   : > { %1485 = vst.msk [vmem:[#allocation2 + $0x170] sm:$0xff] %vm1437_vm3, %v1388_v40  ;;  %v1258_v48 = vmul.f32 %v16603_v61, %v1019_v41  ;;  %v899_v49 = vmax.f32 %v819_v42, 0.0  ;;  %14526 = vmatmul.mubr.msk.f32.gmra.mrb[18].mxu1 %vm1437_vm3, %v1562_v39  ;;  %v13861_v50 = vpop.f32.mrb[44].mxu0  ;;  %v1502_v39 = vld [vmem:[#allocation2 + $0x20] sm:$0xff]  ;;  %v16909_v40 = vpack.c.bf16 %v11954_v12, %v11953_v37  ;;  %v1503_v41 = vld [vmem:[#allocation2 + $0x30] sm:$0xff] }
 0x14c   : > { %v1390_v51 = vcombine.low %v1259_v43, %v1260_v44  ;;  %v1022_v52 = vcombine.high %v900_v45, %v900_v45  ;;  %v834_v53 = vadd.f32 %v13861_v50, %v16584_v24  ;;  %v828_v54 = vpop.f32.mrb[45].mxu0  ;;  %v1263_v0 = vmul.f32 %v16603_v61, %v900_v45  ;;  %v12315_v44 = vld [vmem:[%s19294_s4 + $0x1b0] sm:$0xff]  ;;  %v16931_v50 = vld [vmem:[#allocation2 + $0x3a] sm:$0xff] }
 0x14d   : > { %v1389_v55 = vcombine.low %v1257_v46, %v1258_v48  ;;  %v1021_v56 = vcombine.high %v899_v49, %v899_v49  ;;  %v1261_v57 = vmul.f32 %v16610_v3, %v899_v49  ;;  %v829_v58 = vadd.f32 %v16584_v24, %v828_v54  ;;  %v16921_v45 = vld [vmem:[#allocation2 + $0x32] sm:$0xff]  ;;  %v16927_v48 = vld [vmem:[#allocation2 + $0x48] sm:$0xff]  ;;  %v17109_v37 = vld [vmem:[#allocation2 + $0x140] sm:$0xff] }
 0x14e   : > { %1488 = vst.msk [vmem:[#allocation2 + $0x188] sm:$0xff] %vm1437_vm3, %v1390_v51  ;;  %v902_v59 = vmax.f32 %v834_v53, 0.0  ;;  %v1563_v62 = vld [vmem:[#allocation2 + $0x151] sm:$0xff]  ;;  %v1564_v63 = vld [vmem:[#allocation2 + $0x159] sm:$0xff]  ;;  %v1264_v4 = vmul.f32 %v16616_v17, %v1022_v52  ;;  %v12350_v52 = vld [vmem:[%s19294_s4 + $0x1c8] sm:$0xff] }
 0x14f   : > { %1487 = vst.msk [vmem:[#allocation2 + $0x180] sm:$0xff] %vm1437_vm3, %v1389_v55  ;;  %v1262_v1 = vmul.f32 %v16601_v60, %v1021_v56  ;;  %v901_v15 = vmax.f32 %v829_v58, 0.0  ;;  %v13864_v2 = vpop.f32.mrb[46].mxu0  ;;  %13918 = vmatprep.mubr.msk.f32.mxu0 %vm1437_vm3, %v1563_v62  ;;  %14528 = vmatprep.mubr.msk.f32.mxu1 %vm1437_vm3, %v1563_v62  ;;  %v1504_v46 = vld [vmem:[#allocation2 + $0x38] sm:$0xff]  ;;  %v12349_v51 = vld [vmem:[%s19294_s4 + $0x1c0] sm:$0xff]  ;;  %v16941_v53 = vld [vmem:[#allocation2 + $0x4a] sm:$0xff] }
 0x150   : > { %1489 = vst.msk [vmem:[#allocation2 + $0x190] sm:$0xf] %vm1440_vm4, %v1261_v57  ;;  %v1024_v5 = vcombine.high %v902_v59, %v902_v59  ;;  %v844_v7 = vadd.f32 %v13864_v2, %v16584_v24  ;;  %v838_v8 = vpop.f32.mrb[47].mxu0  ;;  %13919 = vmatmul.mubr.msk.f32.gmra.mrb[78].mxu0 %vm1437_vm3, %v1564_v63  ;;  %14529 = vmatmul.mubr.msk.f32.gmra.mrb[20].mxu1 %vm1437_vm3, %v1564_v63  ;;  %v16946_v54 = vld [vmem:[#allocation2 + $0x50] sm:$0xff]  ;;  %v16950_v55 = vld [vmem:[#allocation2 + $0x60] sm:$0xff]  ;;  %v16964_v58 = vld [vmem:[#allocation2 + $0x68] sm:$0xff] }
 0x151   : > { %v1391_v61 = vcombine.low %v1262_v1, %v1263_v0  ;;  %v1023_v60 = vcombine.high %v901_v15, %v901_v15  ;;  %v1265_v10 = vmul.f32 %v16620_v21, %v901_v15  ;;  %v839_v11 = vadd.f32 %v16584_v24, %v838_v8  ;;  %v11919_v24 = vld [vmem:[%s19294_s4 + $0x50] sm:$0xff]  ;;  %v11920_v21 = vld [vmem:[%s19294_s4 + $0x58] sm:$0xff]  ;;  %v16981_v0 = vld [vmem:[#allocation2 + $0x80] sm:$0xff]  ;;  %19310 = vst [vmem:[#allocation5_spill] sm:$0xff] %v17109_v37 }
 0x152   : > { %v1267_v13 = vmul.f32 %v16588_v34, %v902_v59  ;;  %v1268_v14 = vmul.f32 %v16590_v35, %v1024_v5  ;;  %v16874_v16 = vmax.f32 %v844_v7, 0.0  ;;  %v1565_v17 = vld [vmem:[#allocation2 + $0x169] sm:$0xff]  ;;  %v1566_v18 = vld [vmem:[#allocation2 + $0x171] sm:$0xff]  ;;  %v15360_v26 = vpack.c.bf16 %v11920_v21, %v11919_v24  ;;  %v16977_v63 = vld [vmem:[#allocation2 + $0x7a] sm:$0xff] }
 0x153   : > { %1490 = vst.msk [vmem:[#allocation2 + $0x198] sm:$0xff] %vm1437_vm3, %v1391_v61  ;;  %v1266_v19 = vmul.f32 %v16610_v3, %v1023_v60  ;;  %v1392_v20 = vcombine.low %v1264_v4, %v1265_v10  ;;  %v903_v23 = vmax.f32 %v839_v11, 0.0  ;;  %13921 = vmatprep.mubr.msk.f32.mxu0 %vm1437_vm3, %v1565_v17  ;;  %14531 = vmatprep.mubr.msk.f32.mxu1 %vm1437_vm3, %v1565_v17  ;;  %v1499_v3 = vld [vmem:[#allocation2] sm:$0xff]  ;;  %v16956_v57 = vld [vmem:[#allocation2 + $0x52] sm:$0xff]  ;;  %v16973_v62 = vld [vmem:[#allocation2 + $0x6a] sm:$0xff] }
 0x154   : > { %v1393_v27 = vcombine.low %v1267_v13, %v1268_v14  ;;  %v1271_v28 = vmul.f32 %v16588_v34, %v16874_v16  ;;  %13922 = vmatmul.mubr.msk.f32.gmra.mrb[80].mxu0 %vm1437_vm3, %v1566_v18  ;;  %14532 = vmatmul.mubr.msk.f32.gmra.mrb[22].mxu1 %vm1437_vm3, %v1566_v18  ;;  %v16952_v56 = vpack.c.bf16 %v12350_v52, %v12349_v51  ;;  %v16968_v59 = vld [vmem:[#allocation2 + $0x78] sm:$0xff]  ;;  %v16985_v1 = vld [vmem:[#allocation2 + $0x90] sm:$0xff]  ;;  %v16989_v15 = vld [vmem:[#allocation2 + $0x82] sm:$0xff] }
 0x155   : > { %1491 = vst.msk [vmem:[#allocation2 + $0x1a0] sm:$0xff] %vm1437_vm3, %v1392_v20  ;;  %v1025_v29 = vcombine.high %v903_v23, %v903_v23  ;;  %v1269_v25 = vmul.f32 %v16588_v34, %v903_v23  ;;  %13932 = vmatprep.mubr.msk.f32.mxu0 %vm1437_vm3, %v1499_v3  ;;  %v16993_v2 = vld [vmem:[#allocation2 + $0x92] sm:$0xff]  ;;  %v17001_v5 = vld [vmem:[#allocation2 + $0xa8] sm:$0xff]  ;;  %v17005_v7 = vld [vmem:[#allocation2 + $0x9a] sm:$0xff] }
 0x156   : > { %1492 = vst.msk [vmem:[#allocation2 + $0x1a8] sm:$0xf] %vm1440_vm4, %v1266_v19  ;;  %1495 = vst.msk [vmem:[#allocation2 + $0x1c0] sm:$0xf] %vm1440_vm4, %v1271_v28  ;;  %v5754_v30 = vld [vmem:[#allocation2 + $0x181] sm:$0xff]  ;;  %v16997_v4 = vld [vmem:[#allocation2 + $0x98] sm:$0xff] }
 0x157   : > { %1493 = vst.msk [vmem:[#allocation2 + $0x1b0] sm:$0xff] %vm1437_vm3, %v1393_v27  ;;  %v5755_v31 = vld [vmem:[#allocation2 + $0x189] sm:$0xff]  ;;  %v1270_v32 = vmul.f32 %v16590_v35, %v1025_v29  ;;  %14534 = vmatprep.mubr.msk.f32.mxu1 %vm1437_vm3, %v5754_v30  ;;  %v17017_v60 = vld [vmem:[#allocation2 + $0xc0] sm:$0xff]  ;;  %v17021_v10 = vld [vmem:[#allocation2 + $0xb2] sm:$0xff] }
 0x158   : > { %13933 = vmatmul.mubr.msk.f32.vlgmr.msra.gmra.mrb[50].mxu0 %vm1437_vm3, %v1500_v33  ;;  %14535 = vmatmul.mubr.msk.f32.gmra.mrb[24].mxu1 %vm1437_vm3, %v5755_v31  ;;  %v17009_v8 = vld [vmem:[#allocation2 + $0xaa] sm:$0xff]  ;;  %v17025_v11 = vld [vmem:[#allocation2 + $0xc2] sm:$0xff]  ;;  %v17033_v14 = vld [vmem:[#allocation2 + $0xd8] sm:$0xff] }
 0x159   : > { %v1394_v38 = vcombine.low %v1269_v25, %v1270_v32  ;;  %13935 = vmatprep.mubr.msk.f32.mxu0 %vm1437_vm3, %v1501_v36  ;;  %15359 = vmatpush3.bf16.msra.mxu0 %v16667_v22  ;;  %v12316_v22 = vld [vmem:[%s19294_s4 + $0x1b8] sm:$0xff]  ;;  %v17013_v61 = vld [vmem:[#allocation2 + $0xb0] sm:$0xff]  ;;  %v17029_v13 = vld [vmem:[#allocation2 + $0xc8] sm:$0xff] }
 0x15a   : > { %15361 = vmatprep.subr.bf16.mxu0 %v15360_v26  ;;  %v15448_v49 = vpack.c.bf16 %v12316_v22, %v12315_v44  ;;  %v17037_v17 = vld [vmem:[#allocation2 + $0xca] sm:$0xff]  ;;  %v17041_v18 = vld [vmem:[#allocation2 + $0xda] sm:$0xff]  ;;  %v17053_v23 = vld [vmem:[#allocation2 + $0xe2] sm:$0xff] }
 0x15b   : > { %1494 = vst.msk [vmem:[#allocation2 + $0x1b8] sm:$0xff] %vm1437_vm3, %v1394_v38  ;;  %v17045_v19 = vld [vmem:[#allocation2 + $0xe0] sm:$0xff]  ;;  %v17049_v20 = vld [vmem:[#allocation2 + $0xf0] sm:$0xff]  ;;  %v17061_v21 = vld [vmem:[#allocation2 + $0xf8] sm:$0xff] }
 0x15c   : > { %13936 = vmatmul.mubr.msk.f32.gmra.mrb[52].mxu0 %vm1437_vm3, %v1502_v39  ;;  %v5756_v42 = vld [vmem:[#allocation2 + $0x199] sm:$0xff]  ;;  %v17065_v27 = vld [vmem:[#allocation2 + $0x108] sm:$0xff]  ;;  %v17077_v29 = vld [vmem:[#allocation2 + $0x110] sm:$0xff] }
 0x15d   : > { %v5757_v43 = vld [vmem:[#allocation2 + $0x1a1] sm:$0xff]  ;;  %13938 = vmatprep.mubr.msk.f32.mxu0 %vm1437_vm3, %v1503_v41  ;;  %14537 = vmatprep.mubr.msk.f32.mxu1 %vm1437_vm3, %v5756_v42  ;;  %v17057_v24 = vld [vmem:[#allocation2 + $0xf2] sm:$0xff]  ;;  %v17073_v3 = vld [vmem:[#allocation2 + $0x10a] sm:$0xff] }
 0x15e   : > { %14538 = vmatmul.mubr.msk.f32.gmra.mrb[26].mxu1 %vm1437_vm3, %v5757_v43  ;;  %15363 = vmatpush3.bf16.msra.mxu0 %v15360_v26  ;;  %v17069_v28 = vld [vmem:[#allocation2 + $0xfa] sm:$0xff]  ;;  %v17085_v30 = vld [vmem:[#allocation2 + $0x112] sm:$0xff]  ;;  %v17089_v31 = vld [vmem:[#allocation2 + $0x122] sm:$0xff] }
 0x15f   : > { %14548 = vmatprep.mubr.msk.f32.mxu1 %vm1437_vm3, %v16921_v45  ;;  %15365 = vmatprep.subr.bf16.mxu0 %v16909_v40  ;;  %v17081_v25 = vld [vmem:[#allocation2 + $0x120] sm:$0xff]  ;;  %v17093_v26 = vld [vmem:[#allocation2 + $0x128] sm:$0xff]  ;;  %v17097_v32 = vld [vmem:[#allocation2 + $0x138] sm:$0xff] }
 0x160   : > { %13939 = vmatmul.mubr.msk.f32.gmra.mrb[54].mxu0 %vm1437_vm3, %v1504_v46  ;;  %v17101_v33 = vld [vmem:[#allocation2 + $0x12a] sm:$0xff]  ;;  %v17105_v36 = vld [vmem:[#allocation2 + $0x13a] sm:$0xff]  ;;  %v17117_v38 = vld [vmem:[#allocation2 + $0x142] sm:$0xff] }
 0x161   : > { %13941 = vmatprep.mubr.msk.f32.mxu0 %vm1437_vm3, %v16927_v48  ;;  %v17113_v12 = vld [vmem:[#allocation2 + $0x150] sm:$0xff]  ;;  %v17125_v41 = vld [vmem:[#allocation2 + $0x158] sm:$0xff]  ;;  %v17129_v42 = vld [vmem:[#allocation2 + $0x168] sm:$0xff] }
 0x162   : > { %14549 = vmatmul.mubr.msk.f32.vlgmr.msra.gmra.mrb[28].mxu1 %vm1437_vm3, %v16931_v50  ;;  %19311 = vst [vmem:[#allocation6_spill] sm:$0xff] %v17113_v12  ;;  %v17121_v39 = vld [vmem:[#allocation2 + $0x152] sm:$0xff]  ;;  %19312 = vst [vmem:[#allocation7_spill] sm:$0xff] %v17125_v41  ;;  %v17133_v43 = vld [vmem:[#allocation2 + $0x15a] sm:$0xff] }
 0x163   : > { %15447 = vmatpush3.bf16.msra.mxu1 %v16729_v47  ;;  %14551 = vmatprep.mubr.msk.f32.mxu1 %vm1437_vm3, %v16941_v53  ;;  %v16960_v47 = vld [vmem:[#allocation2 + $0x62] sm:$0xff]  ;;  %19313 = vst [vmem:[#allocation8_spill] sm:$0xff] %v17129_v42  ;;  %v17137_v44 = vld [vmem:[#allocation2 + $0x16a] sm:$0xff]  ;;  %v17152_v52 = vld [vmem:[#allocation2 + $0x172] sm:$0xff] }
 0x164   : > { %13942 = vmatmul.mubr.msk.f32.gmra.mrb[56].mxu0 %vm1437_vm3, %v16946_v54  ;;  %15449 = vmatprep.subr.bf16.mxu1 %v15448_v49  ;;  %v17141_v22 = vld [vmem:[#allocation2 + $0x170] sm:$0xff]  ;;  %v2214_v51 = vld [vmem:[#allocation2 + $0x2] sm:$0xff] }
 0x165   : > { %13944 = vmatprep.mubr.msk.f32.mxu0 %vm1437_vm3, %v16950_v55  ;;  %19314 = vst [vmem:[#allocation9_spill] sm:$0xff] %v17141_v22  ;;  %v11955_v46 = vld [vmem:[%s19294_s4 + $0x70] sm:$0xff]  ;;  %v6144_v9 = vld [vmem:[#allocation2 + $0x182] sm:$0xff] }
 0x166   : > { %14552 = vmatmul.mubr.msk.f32.gmra.mrb[30].mxu1 %vm1437_vm3, %v16956_v57 }
 0x167   : > { %14554 = vmatprep.mubr.msk.f32.mxu1 %vm1437_vm3, %v16960_v47  ;;  %15451 = vmatpush3.bf16.msra.mxu1 %v15448_v49  ;;  %v11956_v49 = vld [vmem:[%s19294_s4 + $0x78] sm:$0xff] }
 0x168   : > { %13945 = vmatmul.mubr.msk.f32.gmra.mrb[58].mxu0 %vm1437_vm3, %v16964_v58  ;;  %15453 = vmatprep.subr.bf16.mxu1 %v16952_v56  ;;  %v15368_v6 = vpack.c.bf16 %v11956_v49, %v11955_v46  ;;  %v2217_v49 = vld [vmem:[#allocation2 + $0x22] sm:$0xff] }
 0x169   : > { %13947 = vmatprep.mubr.msk.f32.mxu0 %vm1437_vm3, %v16968_v59 }
 0x16a   : > { %14555 = vmatmul.mubr.msk.f32.gmra.mrb[0].mxu1 %vm1437_vm3, %v16973_v62 }
 0x16b   : > { %14557 = vmatprep.mubr.msk.f32.mxu1 %vm1437_vm3, %v16977_v63 }
 0x16c   : > { %13948 = vmatmul.mubr.msk.f32.gmra.mrb[60].mxu0 %vm1437_vm3, %v16981_v0 }
 0x16d   : > { %13950 = vmatprep.mubr.msk.f32.mxu0 %vm1437_vm3, %v16985_v1 }
 0x16e   : > { %14558 = vmatmul.mubr.msk.f32.gmra.mrb[2].mxu1 %vm1437_vm3, %v16989_v15 }
 0x16f   : > { %14560 = vmatprep.mubr.msk.f32.mxu1 %vm1437_vm3, %v16993_v2 }
 0x170   : > { %13951 = vmatmul.mubr.msk.f32.gmra.mrb[62].mxu0 %vm1437_vm3, %v16997_v4 }
 0x171   : > { %13953 = vmatprep.mubr.msk.f32.mxu0 %vm1437_vm3, %v17001_v5 }
 0x172   : > { %14561 = vmatmul.mubr.msk.f32.gmra.mrb[4].mxu1 %vm1437_vm3, %v17005_v7 }
 0x173   : > { %14563 = vmatprep.mubr.msk.f32.mxu1 %vm1437_vm3, %v17009_v8 }
 0x174   : > { %13954 = vmatmul.mubr.msk.f32.gmra.mrb[64].mxu0 %vm1437_vm3, %v17013_v61 }
 0x175   : > { %13956 = vmatprep.mubr.msk.f32.mxu0 %vm1437_vm3, %v17017_v60 }
 0x176   : > { %14564 = vmatmul.mubr.msk.f32.gmra.mrb[6].mxu1 %vm1437_vm3, %v17021_v10 }
 0x177   : > { %14566 = vmatprep.mubr.msk.f32.mxu1 %vm1437_vm3, %v17025_v11 }
 0x178   : > { %13957 = vmatmul.mubr.msk.f32.gmra.mrb[66].mxu0 %vm1437_vm3, %v17029_v13 }
 0x179   : > { %13959 = vmatprep.mubr.msk.f32.mxu0 %vm1437_vm3, %v17033_v14 }
 0x17a   : > { %14567 = vmatmul.mubr.msk.f32.gmra.mrb[8].mxu1 %vm1437_vm3, %v17037_v17 }
 0x17b   : > { %14569 = vmatprep.mubr.msk.f32.mxu1 %vm1437_vm3, %v17041_v18 }
 0x17c   : > { %13960 = vmatmul.mubr.msk.f32.gmra.mrb[68].mxu0 %vm1437_vm3, %v17045_v19 }
 0x17d   : > { %13962 = vmatprep.mubr.msk.f32.mxu0 %vm1437_vm3, %v17049_v20 }
 0x17e   : > { %14570 = vmatmul.mubr.msk.f32.gmra.mrb[10].mxu1 %vm1437_vm3, %v17053_v23 }
 0x17f   : > { %14572 = vmatprep.mubr.msk.f32.mxu1 %vm1437_vm3, %v17057_v24 }
 0x180   : > { %13963 = vmatmul.mubr.msk.f32.gmra.mrb[70].mxu0 %vm1437_vm3, %v17061_v21 }
 0x181   : > { %13965 = vmatprep.mubr.msk.f32.mxu0 %vm1437_vm3, %v17065_v27 }
 0x182   : > { %14573 = vmatmul.mubr.msk.f32.gmra.mrb[12].mxu1 %vm1437_vm3, %v17069_v28 }
 0x183   : > { %14575 = vmatprep.mubr.msk.f32.mxu1 %vm1437_vm3, %v17073_v3 }
 0x184   : > { %13966 = vmatmul.mubr.msk.f32.gmra.mrb[72].mxu0 %vm1437_vm3, %v17077_v29 }
 0x185   : > { %13968 = vmatprep.mubr.msk.f32.mxu0 %vm1437_vm3, %v17081_v25 }
 0x186   : > { %14576 = vmatmul.mubr.msk.f32.gmra.mrb[14].mxu1 %vm1437_vm3, %v17085_v30 }
 0x187   : > { %14578 = vmatprep.mubr.msk.f32.mxu1 %vm1437_vm3, %v17089_v31 }
 0x188   : > { %13969 = vmatmul.mubr.msk.f32.gmra.mrb[74].mxu0 %vm1437_vm3, %v17093_v26 }
 0x189   : > { %13971 = vmatprep.mubr.msk.f32.mxu0 %vm1437_vm3, %v17097_v32 }
 0x18a   : > { %14579 = vmatmul.mubr.msk.f32.gmra.mrb[16].mxu1 %vm1437_vm3, %v17101_v33 }
 0x18b   : > { %14581 = vmatprep.mubr.msk.f32.mxu1 %vm1437_vm3, %v17105_v36 }
 0x18c   : > { %13972 = vmatmul.mubr.msk.f32.gmra.mrb[76].mxu0 %vm1437_vm3, %v17109_v37  ;;  %v17353_v37 = vld [vmem:[#allocation2 + $0x15b] sm:$0xff] }
 0x18d   : > { %13974 = vmatprep.mubr.msk.f32.mxu0 %vm1437_vm3, %v17113_v12  ;;  %v6145_v12 = vld [vmem:[#allocation2 + $0x18a] sm:$0xff] }
 0x18e   : > { %14582 = vmatmul.mubr.msk.f32.gmra.mrb[18].mxu1 %vm1437_vm3, %v17117_v38 }
 0x18f   : > { %14584 = vmatprep.mubr.msk.f32.mxu1 %vm1437_vm3, %v17121_v39 }
 0x190   : > { %13975 = vmatmul.mubr.msk.f32.gmra.mrb[78].mxu0 %vm1437_vm3, %v17125_v41  ;;  %v11989_v41 = vld [vmem:[%s19294_s4 + $0x80] sm:$0xff] }
 0x191   : > { %13977 = vmatprep.mubr.msk.f32.mxu0 %vm1437_vm3, %v17129_v42  ;;  %v2215_v42 = vld [vmem:[#allocation2 + $0xa] sm:$0xff] }
 0x192   : > { %14585 = vmatmul.mubr.msk.f32.gmra.mrb[20].mxu1 %vm1437_vm3, %v17133_v43 }
 0x193   : > { %14587 = vmatprep.mubr.msk.f32.mxu1 %vm1437_vm3, %v17137_v44 }
 0x194   : > { %13978 = vmatmul.mubr.msk.f32.gmra.mrb[80].mxu0 %vm1437_vm3, %v17141_v22  ;;  %v11990_v22 = vld [vmem:[%s19294_s4 + $0x88] sm:$0xff] }
 0x195   : > { %13988 = vmatprep.mubr.msk.f32.mxu0 %vm1437_vm3, %v2214_v51  ;;  %v2216_v51 = vld [vmem:[#allocation2 + $0x1a] sm:$0xff]  ;;  %v17167_v46 = vpack.c.bf16 %v11990_v22, %v11989_v41  ;;  %v12386_v22 = vld [vmem:[%s19294_s4 + $0x1e8] sm:$0xff] }
 0x196   : > { %14588 = vmatmul.mubr.msk.f32.gmra.mrb[22].mxu1 %vm1437_vm3, %v17152_v52  ;;  %v17189_v41 = vld [vmem:[#allocation2 + $0x3b] sm:$0xff] }
 0x197   : > { %14590 = vmatprep.mubr.msk.f32.mxu1 %vm1437_vm3, %v6144_v9  ;;  %v6146_v9 = vld [vmem:[#allocation2 + $0x19a] sm:$0xff] }
 0x198   : > { %13989 = vmatmul.mubr.msk.f32.vlgmr.msra.gmra.mrb[50].mxu0 %vm1437_vm3, %v2215_v42  ;;  %v6147_v42 = vld [vmem:[#allocation2 + $0x1a2] sm:$0xff] }
 0x199   : > { %13991 = vmatprep.mubr.msk.f32.mxu0 %vm1437_vm3, %v2216_v51  ;;  %15367 = vmatpush3.bf16.msra.mxu0 %v16909_v40  ;;  %v12351_v51 = vld [vmem:[%s19294_s4 + $0x1d0] sm:$0xff]  ;;  %v12352_v40 = vld [vmem:[%s19294_s4 + $0x1d8] sm:$0xff] }
 0x19a   : > { %14591 = vmatmul.mubr.msk.f32.gmra.mrb[24].mxu1 %vm1437_vm3, %v6145_v12  ;;  %15369 = vmatprep.subr.bf16.mxu0 %v15368_v6  ;;  %v17180_v12 = vld [vmem:[#allocation2 + $0x33] sm:$0xff] }
 0x19b   : > { %14593 = vmatprep.mubr.msk.f32.mxu1 %vm1437_vm3, %v6146_v9  ;;  %v17199_v9 = vld [vmem:[#allocation2 + $0x4b] sm:$0xff] }
 0x19c   : > { %13992 = vmatmul.mubr.msk.f32.gmra.mrb[52].mxu0 %vm1437_vm3, %v2217_v49  ;;  %v17214_v49 = vld [vmem:[#allocation2 + $0x63] sm:$0xff] }
 0x19d   : > { %13994 = vmatprep.mubr.msk.f32.mxu0 %vm1437_vm3, %v16921_v45  ;;  %15371 = vmatpush3.bf16.msra.mxu0 %v15368_v6  ;;  %v15456_v45 = vpack.c.bf16 %v12352_v40, %v12351_v51  ;;  %v12385_v6 = vld [vmem:[%s19294_s4 + $0x1e0] sm:$0xff] }
 0x19e   : > { %14594 = vmatmul.mubr.msk.f32.gmra.mrb[26].mxu1 %vm1437_vm3, %v6147_v42  ;;  %15373 = vmatprep.subr.bf16.mxu0 %v17167_v46  ;;  %v16333_v42 = vld [vmem:[%s19293_s3] ss:$0 sm:$0xff] }
 0x19f   : > { %14604 = vmatprep.mubr.msk.f32.mxu1 %vm1437_vm3, %v17180_v12 }
 0x1a0   : > { %13995 = vmatmul.mubr.msk.f32.gmra.mrb[54].mxu0 %vm1437_vm3, %v16931_v50  ;;  %v17206_v50 = vpack.c.bf16 %v12386_v22, %v12385_v6  ;;  %v17337_v22 = vld [vmem:[#allocation2 + $0x143] sm:$0xff] }
 0x1a1   : > { %13997 = vmatprep.mubr.msk.f32.mxu0 %vm1437_vm3, %v16941_v53  ;;  %v17210_v53 = vld [vmem:[#allocation2 + $0x53] sm:$0xff] }
 0x1a2   : > { %14605 = vmatmul.mubr.msk.f32.vlgmr.msra.gmra.mrb[28].mxu1 %vm1437_vm3, %v17189_v41 }
 0x1a3   : > { %15455 = vmatpush3.bf16.msra.mxu1 %v16952_v56  ;;  %14607 = vmatprep.mubr.msk.f32.mxu1 %vm1437_vm3, %v17199_v9  ;;  %v17223_v56 = vld [vmem:[#allocation2 + $0x6b] sm:$0xff] }
 0x1a4   : > { %13998 = vmatmul.mubr.msk.f32.gmra.mrb[56].mxu0 %vm1437_vm3, %v16956_v57  ;;  %15457 = vmatprep.subr.bf16.mxu1 %v15456_v45  ;;  %v17227_v57 = vld [vmem:[#allocation2 + $0x7b] sm:$0xff] }
 0x1a5   : > { %14000 = vmatprep.mubr.msk.f32.mxu0 %vm1437_vm3, %v16960_v47  ;;  %v17235_v47 = vld [vmem:[#allocation2 + $0x83] sm:$0xff] }
 0x1a6   : > { %14608 = vmatmul.mubr.msk.f32.gmra.mrb[30].mxu1 %vm1437_vm3, %v17210_v53 }
 0x1a7   : > { %14610 = vmatprep.mubr.msk.f32.mxu1 %vm1437_vm3, %v17214_v49  ;;  %15459 = vmatpush3.bf16.msra.mxu1 %v15456_v45  ;;  %v17328_v45 = vld [vmem:[#allocation2 + $0x13b] sm:$0xff] }
 0x1a8   : > { %14001 = vmatmul.mubr.msk.f32.gmra.mrb[58].mxu0 %vm1437_vm3, %v16973_v62  ;;  %15461 = vmatprep.subr.bf16.mxu1 %v17206_v50  ;;  %v17239_v62 = vld [vmem:[#allocation2 + $0x93] sm:$0xff] }
 0x1a9   : > { %14003 = vmatprep.mubr.msk.f32.mxu0 %vm1437_vm3, %v16977_v63  ;;  %v17247_v63 = vld [vmem:[#allocation2 + $0x9b] sm:$0xff] }
 0x1aa   : > { %14611 = vmatmul.mubr.msk.f32.gmra.mrb[0].mxu1 %vm1437_vm3, %v17223_v56 }
 0x1ab   : > { %14613 = vmatprep.mubr.msk.f32.mxu1 %vm1437_vm3, %v17227_v57 }
 0x1ac   : > { %14004 = vmatmul.mubr.msk.f32.gmra.mrb[60].mxu0 %vm1437_vm3, %v16989_v15  ;;  %v17251_v15 = vld [vmem:[#allocation2 + $0xab] sm:$0xff] }
 0x1ad   : > { %14006 = vmatprep.mubr.msk.f32.mxu0 %vm1437_vm3, %v16993_v2  ;;  %v17259_v2 = vld [vmem:[#allocation2 + $0xb3] sm:$0xff] }
 0x1ae   : > { %14614 = vmatmul.mubr.msk.f32.gmra.mrb[2].mxu1 %vm1437_vm3, %v17235_v47 }
 0x1af   : > { %14616 = vmatprep.mubr.msk.f32.mxu1 %vm1437_vm3, %v17239_v62 }
 0x1b0   : > { %14007 = vmatmul.mubr.msk.f32.gmra.mrb[62].mxu0 %vm1437_vm3, %v17005_v7  ;;  %v17263_v7 = vld [vmem:[#allocation2 + $0xc3] sm:$0xff] }
 0x1b1   : > { %14009 = vmatprep.mubr.msk.f32.mxu0 %vm1437_vm3, %v17009_v8  ;;  %v17271_v8 = vld [vmem:[#allocation2 + $0xcb] sm:$0xff] }
 0x1b2   : > { %14617 = vmatmul.mubr.msk.f32.gmra.mrb[4].mxu1 %vm1437_vm3, %v17247_v63 }
 0x1b3   : > { %14619 = vmatprep.mubr.msk.f32.mxu1 %vm1437_vm3, %v17251_v15 }
 0x1b4   : > { %14010 = vmatmul.mubr.msk.f32.gmra.mrb[64].mxu0 %vm1437_vm3, %v17021_v10  ;;  %v17275_v10 = vld [vmem:[#allocation2 + $0xdb] sm:$0xff] }
 0x1b5   : > { %14012 = vmatprep.mubr.msk.f32.mxu0 %vm1437_vm3, %v17025_v11  ;;  %v17283_v11 = vld [vmem:[#allocation2 + $0xe3] sm:$0xff] }
 0x1b6   : > { %14620 = vmatmul.mubr.msk.f32.gmra.mrb[6].mxu1 %vm1437_vm3, %v17259_v2 }
 0x1b7   : > { %14622 = vmatprep.mubr.msk.f32.mxu1 %vm1437_vm3, %v17263_v7 }
 0x1b8   : > { %14013 = vmatmul.mubr.msk.f32.gmra.mrb[66].mxu0 %vm1437_vm3, %v17037_v17  ;;  %v17287_v17 = vld [vmem:[#allocation2 + $0xf3] sm:$0xff] }
 0x1b9   : > { %14015 = vmatprep.mubr.msk.f32.mxu0 %vm1437_vm3, %v17041_v18  ;;  %v17295_v18 = vld [vmem:[#allocation2 + $0xfb] sm:$0xff] }
 0x1ba   : > { %14623 = vmatmul.mubr.msk.f32.gmra.mrb[8].mxu1 %vm1437_vm3, %v17271_v8 }
 0x1bb   : > { %14625 = vmatprep.mubr.msk.f32.mxu1 %vm1437_vm3, %v17275_v10 }
 0x1bc   : > { %14016 = vmatmul.mubr.msk.f32.gmra.mrb[68].mxu0 %vm1437_vm3, %v17053_v23  ;;  %v17299_v23 = vld [vmem:[#allocation2 + $0x10b] sm:$0xff] }
 0x1bd   : > { %14018 = vmatprep.mubr.msk.f32.mxu0 %vm1437_vm3, %v17057_v24  ;;  %v17307_v24 = vld [vmem:[#allocation2 + $0x113] sm:$0xff] }
 0x1be   : > { %14626 = vmatmul.mubr.msk.f32.gmra.mrb[10].mxu1 %vm1437_vm3, %v17283_v11 }
 0x1bf   : > { %14628 = vmatprep.mubr.msk.f32.mxu1 %vm1437_vm3, %v17287_v17 }
 0x1c0   : > { %14019 = vmatmul.mubr.msk.f32.gmra.mrb[70].mxu0 %vm1437_vm3, %v17069_v28  ;;  %v17311_v28 = vld [vmem:[#allocation2 + $0x123] sm:$0xff] }
 0x1c1   : > { %14021 = vmatprep.mubr.msk.f32.mxu0 %vm1437_vm3, %v17073_v3  ;;  %v1026_v3 = vcombine.high %v16874_v16, %v16874_v16 }
 0x1c2   : > { %14629 = vmatmul.mubr.msk.f32.gmra.mrb[12].mxu1 %vm1437_vm3, %v17295_v18 }
 0x1c3   : > { %14631 = vmatprep.mubr.msk.f32.mxu1 %vm1437_vm3, %v17299_v23 }
 0x1c4   : > { %14022 = vmatmul.mubr.msk.f32.gmra.mrb[72].mxu0 %vm1437_vm3, %v17085_v30  ;;  %v13867_v30 = vpop.f32.mrb[48].mxu0 }
 0x1c5   : > { %14024 = vmatprep.mubr.msk.f32.mxu0 %vm1437_vm3, %v17089_v31  ;;  %v17321_v31 = vld [vmem:[#allocation2 + $0x12b] sm:$0xff]  ;;  %v854_v51 = vadd.f32 %v16333_v42, %v13867_v30  ;;  %v848_v40 = vpop.f32.mrb[49].mxu0 }
 0x1c6   : > { %14632 = vmatmul.mubr.msk.f32.gmra.mrb[14].mxu1 %vm1437_vm3, %v17307_v24  ;;  %v849_v16 = vadd.f32 %v16333_v42, %v848_v40  ;;  %v17341_v42 = vld [vmem:[#allocation2 + $0x153] sm:$0xff] }
 0x1c7   : > { %14634 = vmatprep.mubr.msk.f32.mxu1 %vm1437_vm3, %v17311_v28 }
 0x1c8   : > { %14025 = vmatmul.mubr.msk.f32.gmra.mrb[74].mxu0 %vm1437_vm3, %v17101_v33  ;;  %v906_v33 = vmax.f32 %v854_v51, 0.0  ;;  %v905_v6 = vmax.f32 %v849_v16, 0.0 }
 0x1c9   : > { %14027 = vmatprep.mubr.msk.f32.mxu0 %vm1437_vm3, %v17105_v36  ;;  %v1272_v36 = vmul.f32 %v16588_v34, %v1026_v3 }
 0x1ca   : > { %14635 = vmatmul.mubr.msk.f32.gmra.mrb[16].mxu1 %vm1437_vm3, %v17321_v31  ;;  %v1028_v30 = vcombine.high %v906_v33, %v906_v33  ;;  %v1275_v40 = vmul.f32 %v16590_v35, %v906_v33  ;;  %v1027_v51 = vcombine.high %v905_v6, %v905_v6  ;;  %v1273_v3 = vmul.f32 %v16590_v35, %v905_v6  ;;  %v17358_v35 = vld [vmem:[#allocation2 + $0x16b] sm:$0xff]  ;;  %v6534_v6 = vld [vmem:[#allocation2 + $0x183] sm:$0xff] }
 0x1cb   : > { %14637 = vmatprep.mubr.msk.f32.mxu1 %vm1437_vm3, %v17328_v45 }
 0x1cc   : > { %14028 = vmatmul.mubr.msk.f32.gmra.mrb[76].mxu0 %vm1437_vm3, %v17117_v38  ;;  %v1276_v38 = vmul.f32 %v16588_v34, %v1028_v30  ;;  %v1395_v16 = vcombine.low %v1272_v36, %v1273_v3  ;;  %v17373_v36 = vld [vmem:[#allocation2 + $0x173] sm:$0xff]  ;;  %v2606_v3 = vld [vmem:[#allocation2 + $0x1b] sm:$0xff] }
 0x1cd   : > { %14030 = vmatprep.mubr.msk.f32.mxu0 %vm1437_vm3, %v17121_v39  ;;  %v1274_v39 = vmul.f32 %v16588_v34, %v1027_v51  ;;  %v11991_v34 = vld [vmem:[%s19294_s4 + $0x90] sm:$0xff]  ;;  %v12025_v51 = vld [vmem:[%s19294_s4 + $0xa0] sm:$0xff] }
 0x1ce   : > { %14638 = vmatmul.mubr.msk.f32.gmra.mrb[18].mxu1 %vm1437_vm3, %v17337_v22  ;;  %1498 = vst.msk [vmem:[#allocation2 + $0x1d8] sm:$0xf] %vm1440_vm4, %v1276_v38  ;;  %v6535_v38 = vld [vmem:[#allocation2 + $0x18b] sm:$0xff] }
 0x1cf   : > { %14640 = vmatprep.mubr.msk.f32.mxu1 %vm1437_vm3, %v17341_v42  ;;  %v1396_v33 = vcombine.low %v1274_v39, %v1275_v40  ;;  %1496 = vst.msk [vmem:[#allocation2 + $0x1c8] sm:$0xff] %vm1437_vm3, %v1395_v16  ;;  %v2605_v40 = vld [vmem:[#allocation2 + $0xb] sm:$0xff]  ;;  %v6536_v39 = vld [vmem:[#allocation2 + $0x19b] sm:$0xff] }
 0x1d0   : > { %14031 = vmatmul.mubr.msk.f32.gmra.mrb[78].mxu0 %vm1437_vm3, %v17133_v43  ;;  %v11992_v43 = vld [vmem:[%s19294_s4 + $0x98] sm:$0xff] }
 0x1d1   : > { %14033 = vmatprep.mubr.msk.f32.mxu0 %vm1437_vm3, %v17137_v44  ;;  %v2604_v44 = vld [vmem:[#allocation2 + $0x3] sm:$0xff]  ;;  %1497 = vst.msk [vmem:[#allocation2 + $0x1d0] sm:$0xff] %vm1437_vm3, %v1396_v33  ;;  %v15376_v30 = vpack.c.bf16 %v11992_v43, %v11991_v34  ;;  %v12387_v43 = vld [vmem:[%s19294_s4 + $0x1f0] sm:$0xff] }
 0x1d2   : > { %14641 = vmatmul.mubr.msk.f32.gmra.mrb[20].mxu1 %vm1437_vm3, %v17353_v37  ;;  %v2607_v33 = vld [vmem:[#allocation2 + $0x23] sm:$0xff] }
 0x1d3   : > { %14643 = vmatprep.mubr.msk.f32.mxu1 %vm1437_vm3, %v17358_v35  ;;  %v6537_v34 = vld [vmem:[#allocation2 + $0x1a3] sm:$0xff] }
 0x1d4   : > { %14034 = vmatmul.mubr.msk.f32.gmra.mrb[80].mxu0 %vm1437_vm3, %v17152_v52  ;;  %v12026_v52 = vld [vmem:[%s19294_s4 + $0xa8] sm:$0xff] }
 0x1d5   : > { %14044 = vmatprep.mubr.msk.f32.mxu0 %vm1437_vm3, %v2604_v44  ;;  %v17388_v16 = vpack.c.bf16 %v12026_v52, %v12025_v51  ;;  %v17401_v44 = vld [vmem:[#allocation2 + $0x34] sm:$0xff]  ;;  %v17420_v51 = vld [vmem:[#allocation2 + $0x4c] sm:$0xff]  ;;  %v17435_v52 = vld [vmem:[#allocation2 + $0x64] sm:$0xff] }
 0x1d6   : > { %14644 = vmatmul.mubr.msk.f32.gmra.mrb[22].mxu1 %vm1437_vm3, %v17373_v36 }
 0x1d7   : > { %14646 = vmatprep.mubr.msk.f32.mxu1 %vm1437_vm3, %v6534_v6  ;;  %v17410_v6 = vld [vmem:[#allocation2 + $0x3c] sm:$0xff] }
 0x1d8   : > { %14045 = vmatmul.mubr.msk.f32.vlgmr.msra.gmra.mrb[50].mxu0 %vm1437_vm3, %v2605_v40  ;;  %v12422_v40 = vld [vmem:[%s19294_s4 + $0x208] sm:$0xff] }
 0x1d9   : > { %14047 = vmatprep.mubr.msk.f32.mxu0 %vm1437_vm3, %v2606_v3  ;;  %15375 = vmatpush3.bf16.msra.mxu0 %v17167_v46  ;;  %v12388_v46 = vld [vmem:[%s19294_s4 + $0x1f8] sm:$0xff] }
 0x1da   : > { %14647 = vmatmul.mubr.msk.f32.gmra.mrb[24].mxu1 %vm1437_vm3, %v6535_v38  ;;  %15377 = vmatprep.subr.bf16.mxu0 %v15376_v30  ;;  %v17581_v3 = vld [vmem:[#allocation2 + $0x174] sm:$0xff]  ;;  %v6924_v38 = vld [vmem:[#allocation2 + $0x184] sm:$0xff] }
 0x1db   : > { %14649 = vmatprep.mubr.msk.f32.mxu1 %vm1437_vm3, %v6536_v39 }
 0x1dc   : > { %14048 = vmatmul.mubr.msk.f32.gmra.mrb[52].mxu0 %vm1437_vm3, %v2607_v33  ;;  %v2995_v33 = vld [vmem:[#allocation2 + $0xc] sm:$0xff] }
 0x1dd   : > { %14050 = vmatprep.mubr.msk.f32.mxu0 %vm1437_vm3, %v17180_v12  ;;  %15379 = vmatpush3.bf16.msra.mxu0 %v15376_v30  ;;  %v15464_v12 = vpack.c.bf16 %v12388_v46, %v12387_v43  ;;  %v12421_v30 = vld [vmem:[%s19294_s4 + $0x200] sm:$0xff]  ;;  %v6925_v46 = vld [vmem:[#allocation2 + $0x18c] sm:$0xff] }
 0x1de   : > { %14650 = vmatmul.mubr.msk.f32.gmra.mrb[26].mxu1 %vm1437_vm3, %v6537_v34  ;;  %15381 = vmatprep.subr.bf16.mxu0 %v17388_v16  ;;  %v12061_v34 = vld [vmem:[%s19294_s4 + $0xc0] sm:$0xff] }
 0x1df   : > { %14660 = vmatprep.mubr.msk.f32.mxu1 %vm1437_vm3, %v17401_v44  ;;  %v2996_v43 = vld [vmem:[#allocation2 + $0x1c] sm:$0xff] }
 0x1e0   : > { %14051 = vmatmul.mubr.msk.f32.gmra.mrb[54].mxu0 %vm1437_vm3, %v17189_v41  ;;  %v17427_v41 = vpack.c.bf16 %v12422_v40, %v12421_v30  ;;  %v2997_v40 = vld [vmem:[#allocation2 + $0x24] sm:$0xff] }
 0x1e1   : > { %14053 = vmatprep.mubr.msk.f32.mxu0 %vm1437_vm3, %v17199_v9  ;;  %v17431_v9 = vld [vmem:[#allocation2 + $0x54] sm:$0xff] }
 0x1e2   : > { %14661 = vmatmul.mubr.msk.f32.vlgmr.msra.gmra.mrb[28].mxu1 %vm1437_vm3, %v17410_v6 }
 0x1e3   : > { %15463 = vmatpush3.bf16.msra.mxu1 %v17206_v50  ;;  %14663 = vmatprep.mubr.msk.f32.mxu1 %vm1437_vm3, %v17420_v51  ;;  %v17444_v50 = vld [vmem:[#allocation2 + $0x6c] sm:$0xff] }
 0x1e4   : > { %14054 = vmatmul.mubr.msk.f32.gmra.mrb[56].mxu0 %vm1437_vm3, %v17210_v53  ;;  %15465 = vmatprep.subr.bf16.mxu1 %v15464_v12  ;;  %v17448_v53 = vld [vmem:[#allocation2 + $0x7c] sm:$0xff] }
 0x1e5   : > { %14056 = vmatprep.mubr.msk.f32.mxu0 %vm1437_vm3, %v17214_v49  ;;  %v17456_v49 = vld [vmem:[#allocation2 + $0x84] sm:$0xff] }
 0x1e6   : > { %14664 = vmatmul.mubr.msk.f32.gmra.mrb[30].mxu1 %vm1437_vm3, %v17431_v9 }
 0x1e7   : > { %14666 = vmatprep.mubr.msk.f32.mxu1 %vm1437_vm3, %v17435_v52  ;;  %15467 = vmatpush3.bf16.msra.mxu1 %v15464_v12  ;;  %v6926_v12 = vld [vmem:[#allocation2 + $0x19c] sm:$0xff] }
 0x1e8   : > { %14057 = vmatmul.mubr.msk.f32.gmra.mrb[58].mxu0 %vm1437_vm3, %v17223_v56  ;;  %15469 = vmatprep.subr.bf16.mxu1 %v17427_v41  ;;  %v17460_v56 = vld [vmem:[#allocation2 + $0x94] sm:$0xff] }
 0x1e9   : > { %14059 = vmatprep.mubr.msk.f32.mxu0 %vm1437_vm3, %v17227_v57  ;;  %v17468_v57 = vld [vmem:[#allocation2 + $0x9c] sm:$0xff] }
 0x1ea   : > { %14667 = vmatmul.mubr.msk.f32.gmra.mrb[0].mxu1 %vm1437_vm3, %v17444_v50 }
 0x1eb   : > { %14669 = vmatprep.mubr.msk.f32.mxu1 %vm1437_vm3, %v17448_v53 }
 0x1ec   : > { %14060 = vmatmul.mubr.msk.f32.gmra.mrb[60].mxu0 %vm1437_vm3, %v17235_v47  ;;  %v17472_v47 = vld [vmem:[#allocation2 + $0xac] sm:$0xff] }
 0x1ed   : > { %14062 = vmatprep.mubr.msk.f32.mxu0 %vm1437_vm3, %v17239_v62  ;;  %v17480_v62 = vld [vmem:[#allocation2 + $0xb4] sm:$0xff] }
 0x1ee   : > { %14670 = vmatmul.mubr.msk.f32.gmra.mrb[2].mxu1 %vm1437_vm3, %v17456_v49 }
 0x1ef   : > { %14672 = vmatprep.mubr.msk.f32.mxu1 %vm1437_vm3, %v17460_v56 }
 0x1f0   : > { %14063 = vmatmul.mubr.msk.f32.gmra.mrb[62].mxu0 %vm1437_vm3, %v17247_v63  ;;  %v17484_v63 = vld [vmem:[#allocation2 + $0xc4] sm:$0xff] }
 0x1f1   : > { %14065 = vmatprep.mubr.msk.f32.mxu0 %vm1437_vm3, %v17251_v15  ;;  %v17492_v15 = vld [vmem:[#allocation2 + $0xcc] sm:$0xff] }
 0x1f2   : > { %14673 = vmatmul.mubr.msk.f32.gmra.mrb[4].mxu1 %vm1437_vm3, %v17468_v57 }
 0x1f3   : > { %14675 = vmatprep.mubr.msk.f32.mxu1 %vm1437_vm3, %v17472_v47 }
 0x1f4   : > { %14066 = vmatmul.mubr.msk.f32.gmra.mrb[64].mxu0 %vm1437_vm3, %v17259_v2  ;;  %v17496_v2 = vld [vmem:[#allocation2 + $0xdc] sm:$0xff] }
 0x1f5   : > { %14068 = vmatprep.mubr.msk.f32.mxu0 %vm1437_vm3, %v17263_v7  ;;  %v17504_v7 = vld [vmem:[#allocation2 + $0xe4] sm:$0xff] }
 0x1f6   : > { %14676 = vmatmul.mubr.msk.f32.gmra.mrb[6].mxu1 %vm1437_vm3, %v17480_v62 }
 0x1f7   : > { %14678 = vmatprep.mubr.msk.f32.mxu1 %vm1437_vm3, %v17484_v63 }
 0x1f8   : > { %14069 = vmatmul.mubr.msk.f32.gmra.mrb[66].mxu0 %vm1437_vm3, %v17271_v8  ;;  %v17508_v8 = vld [vmem:[#allocation2 + $0xf4] sm:$0xff] }
 0x1f9   : > { %14071 = vmatprep.mubr.msk.f32.mxu0 %vm1437_vm3, %v17275_v10  ;;  %v17516_v10 = vld [vmem:[#allocation2 + $0xfc] sm:$0xff] }
 0x1fa   : > { %14679 = vmatmul.mubr.msk.f32.gmra.mrb[8].mxu1 %vm1437_vm3, %v17492_v15 }
 0x1fb   : > { %14681 = vmatprep.mubr.msk.f32.mxu1 %vm1437_vm3, %v17496_v2 }
 0x1fc   : > { %14072 = vmatmul.mubr.msk.f32.gmra.mrb[68].mxu0 %vm1437_vm3, %v17283_v11  ;;  %v17520_v11 = vld [vmem:[#allocation2 + $0x10c] sm:$0xff] }
 0x1fd   : > { %14074 = vmatprep.mubr.msk.f32.mxu0 %vm1437_vm3, %v17287_v17  ;;  %v17528_v17 = vld [vmem:[#allocation2 + $0x114] sm:$0xff] }
 0x1fe   : > { %14682 = vmatmul.mubr.msk.f32.gmra.mrb[10].mxu1 %vm1437_vm3, %v17504_v7 }
 0x1ff   : > { %14684 = vmatprep.mubr.msk.f32.mxu1 %vm1437_vm3, %v17508_v8 }
 0x200   : > { %14075 = vmatmul.mubr.msk.f32.gmra.mrb[70].mxu0 %vm1437_vm3, %v17295_v18  ;;  %v17532_v18 = vld [vmem:[#allocation2 + $0x124] sm:$0xff] }
 0x201   : > { %14077 = vmatprep.mubr.msk.f32.mxu0 %vm1437_vm3, %v17299_v23  ;;  %v17540_v23 = vld [vmem:[#allocation2 + $0x12c] sm:$0xff] }
 0x202   : > { %14685 = vmatmul.mubr.msk.f32.gmra.mrb[12].mxu1 %vm1437_vm3, %v17516_v10 }
 0x203   : > { %14687 = vmatprep.mubr.msk.f32.mxu1 %vm1437_vm3, %v17520_v11 }
 0x204   : > { %14078 = vmatmul.mubr.msk.f32.gmra.mrb[72].mxu0 %vm1437_vm3, %v17307_v24  ;;  %v17544_v24 = vld [vmem:[#allocation2 + $0x13c] sm:$0xff] }
 0x205   : > { %14080 = vmatprep.mubr.msk.f32.mxu0 %vm1437_vm3, %v17311_v28  ;;  %v17552_v28 = vld [vmem:[#allocation2 + $0x144] sm:$0xff] }
 0x206   : > { %14688 = vmatmul.mubr.msk.f32.gmra.mrb[14].mxu1 %vm1437_vm3, %v17528_v17 }
 0x207   : > { %14690 = vmatprep.mubr.msk.f32.mxu1 %vm1437_vm3, %v17532_v18 }
 0x208   : > { %14081 = vmatmul.mubr.msk.f32.gmra.mrb[74].mxu0 %vm1437_vm3, %v17321_v31  ;;  %v17556_v31 = vld [vmem:[#allocation2 + $0x154] sm:$0xff] }
 0x209   : > { %14083 = vmatprep.mubr.msk.f32.mxu0 %vm1437_vm3, %v17328_v45  ;;  %v17564_v45 = vld [vmem:[#allocation2 + $0x15c] sm:$0xff] }
 0x20a   : > { %14691 = vmatmul.mubr.msk.f32.gmra.mrb[16].mxu1 %vm1437_vm3, %v17540_v23 }
 0x20b   : > { %14693 = vmatprep.mubr.msk.f32.mxu1 %vm1437_vm3, %v17544_v24 }
 0x20c   : > { %14084 = vmatmul.mubr.msk.f32.gmra.mrb[76].mxu0 %vm1437_vm3, %v17337_v22  ;;  %v17568_v22 = vld [vmem:[#allocation2 + $0x16c] sm:$0xff] }
 0x20d   : > { %14086 = vmatprep.mubr.msk.f32.mxu0 %vm1437_vm3, %v17341_v42  ;;  %v12027_v42 = vld [vmem:[%s19294_s4 + $0xb0] sm:$0xff] }
 0x20e   : > { %14694 = vmatmul.mubr.msk.f32.gmra.mrb[18].mxu1 %vm1437_vm3, %v17552_v28 }
 0x20f   : > { %14696 = vmatprep.mubr.msk.f32.mxu1 %vm1437_vm3, %v17556_v31 }
 0x210   : > { %14087 = vmatmul.mubr.msk.f32.gmra.mrb[78].mxu0 %vm1437_vm3, %v17353_v37  ;;  %v12028_v37 = vld [vmem:[%s19294_s4 + $0xb8] sm:$0xff] }
 0x211   : > { %14089 = vmatprep.mubr.msk.f32.mxu0 %vm1437_vm3, %v17358_v35  ;;  %v2994_v35 = vld [vmem:[#allocation2 + $0x4] sm:$0xff]  ;;  %v15384_v39 = vpack.c.bf16 %v12028_v37, %v12027_v42  ;;  %v12423_v37 = vld [vmem:[%s19294_s4 + $0x210] sm:$0xff] }
 0x212   : > { %14697 = vmatmul.mubr.msk.f32.gmra.mrb[20].mxu1 %vm1437_vm3, %v17564_v45  ;;  %v6927_v42 = vld [vmem:[#allocation2 + $0x1a4] sm:$0xff] }
 0x213   : > { %14699 = vmatprep.mubr.msk.f32.mxu1 %vm1437_vm3, %v17568_v22 }
 0x214   : > { %14090 = vmatmul.mubr.msk.f32.gmra.mrb[80].mxu0 %vm1437_vm3, %v17373_v36  ;;  %v12062_v36 = vld [vmem:[%s19294_s4 + $0xc8] sm:$0xff] }
 0x215   : > { %14100 = vmatprep.mubr.msk.f32.mxu0 %vm1437_vm3, %v2994_v35  ;;  %v17596_v30 = vpack.c.bf16 %v12062_v36, %v12061_v34  ;;  %v12457_v35 = vld [vmem:[%s19294_s4 + $0x220] sm:$0xff]  ;;  %v3401_v34 = vld [vmem:[#allocation2 + $0xd8] sm:$0xff]  ;;  %v17831_v36 = vld [vmem:[#allocation2 + $0xc9] sm:$0xff] }
 0x216   : > { %14700 = vmatmul.mubr.msk.f32.gmra.mrb[22].mxu1 %vm1437_vm3, %v17581_v3 }
 0x217   : > { %14702 = vmatprep.mubr.msk.f32.mxu1 %vm1437_vm3, %v6924_v38  ;;  %v12458_v38 = vld [vmem:[%s19294_s4 + $0x228] sm:$0xff] }
 0x218   : > { %14101 = vmatmul.mubr.msk.f32.vlgmr.msra.gmra.mrb[50].mxu0 %vm1437_vm3, %v2995_v33  ;;  %v3400_v33 = vld [vmem:[#allocation2 + $0xc8] sm:$0xff] }
 0x219   : > { %14103 = vmatprep.mubr.msk.f32.mxu0 %vm1437_vm3, %v2996_v43  ;;  %15383 = vmatpush3.bf16.msra.mxu0 %v17388_v16  ;;  %v12424_v16 = vld [vmem:[%s19294_s4 + $0x218] sm:$0xff] }
 0x21a   : > { %14703 = vmatmul.mubr.msk.f32.gmra.mrb[24].mxu1 %vm1437_vm3, %v6925_v46  ;;  %15385 = vmatprep.subr.bf16.mxu0 %v15384_v39  ;;  %v17835_v43 = vld [vmem:[#allocation2 + $0xd9] sm:$0xff] }
 0x21b   : > { %14705 = vmatprep.mubr.msk.f32.mxu1 %vm1437_vm3, %v6926_v12  ;;  %v3402_v46 = vld [vmem:[#allocation2 + $0xe0] sm:$0xff]  ;;  %v3403_v12 = vld [vmem:[#allocation2 + $0xf0] sm:$0xff] }
 0x21c   : > { %14104 = vmatmul.mubr.msk.f32.gmra.mrb[52].mxu0 %vm1437_vm3, %v2997_v40  ;;  %v17845_v40 = vld [vmem:[#allocation2 + $0xf1] sm:$0xff] }
 0x21d   : > { %14106 = vmatprep.mubr.msk.f32.mxu0 %vm1437_vm3, %v17401_v44  ;;  %15387 = vmatpush3.bf16.msra.mxu0 %v15384_v39  ;;  %v15472_v44 = vpack.c.bf16 %v12424_v16, %v12423_v37  ;;  %v17825_v39 = vld [vmem:[#allocation2 + $0xc1] sm:$0xff]  ;;  %v17851_v16 = vld [vmem:[#allocation2 + $0xf9] sm:$0xff] }
 0x21e   : > { %14706 = vmatmul.mubr.msk.f32.gmra.mrb[26].mxu1 %vm1437_vm3, %v6927_v42  ;;  %15389 = vmatprep.subr.bf16.mxu0 %v17596_v30  ;;  %v3404_v42 = vld [vmem:[#allocation2 + $0xf8] sm:$0xff]  ;;  %v3405_v37 = vld [vmem:[#allocation2 + $0x108] sm:$0xff] }
 0x21f   : > { %14716 = vmatprep.mubr.msk.f32.mxu1 %vm1437_vm3, %v16927_v48  ;;  %v17629_v48 = vpack.c.bf16 %v12458_v38, %v12457_v35  ;;  %v3406_v35 = vld [vmem:[#allocation2 + $0x110] sm:$0xff]  ;;  %v3407_v38 = vld [vmem:[#allocation2 + $0x120] sm:$0xff] }
 0x220   : > { %14107 = vmatmul.mubr.msk.f32.gmra.mrb[54].mxu0 %vm1437_vm3, %v17410_v6  ;;  %v3389_v6 = vld [vmem:[#allocation2 + $0x48] sm:$0xff] }
 0x221   : > { %14109 = vmatprep.mubr.msk.f32.mxu0 %vm1437_vm3, %v17420_v51  ;;  %v7318_v51 = vld [vmem:[#allocation2 + $0x1b8] sm:$0xff] }
 0x222   : > { %14717 = vmatmul.mubr.msk.f32.vlgmr.msra.gmra.mrb[28].mxu1 %vm1437_vm3, %v16946_v54  ;;  %v19315_v54 = vld [vmem:[#allocation5_spill] sm:$0xff] }
 0x223   : > { %15471 = vmatpush3.bf16.msra.mxu1 %v17427_v41  ;;  %14719 = vmatprep.mubr.msk.f32.mxu1 %vm1437_vm3, %v16950_v55  ;;  %v19316_v55 = vld [vmem:[#allocation6_spill] sm:$0xff]  ;;  %v12459_v41 = vld [vmem:[%s19294_s4 + $0x230] sm:$0xff] }
 0x224   : > { %14110 = vmatmul.mubr.msk.f32.gmra.mrb[56].mxu0 %vm1437_vm3, %v17431_v9  ;;  %15473 = vmatprep.subr.bf16.mxu1 %v15472_v44  ;;  %v12460_v9 = vld [vmem:[%s19294_s4 + $0x238] sm:$0xff] }
 0x225   : > { %14112 = vmatprep.mubr.msk.f32.mxu0 %vm1437_vm3, %v17435_v52  ;;  %v17764_v52 = vld [vmem:[#allocation2 + $0x49] sm:$0xff] }
 0x226   : > { %14720 = vmatmul.mubr.msk.f32.gmra.mrb[30].mxu1 %vm1437_vm3, %v16964_v58  ;;  %v19317_v58 = vld [vmem:[#allocation7_spill] sm:$0xff] }
 0x227   : > { %14722 = vmatprep.mubr.msk.f32.mxu1 %vm1437_vm3, %v16968_v59  ;;  %15475 = vmatpush3.bf16.msra.mxu1 %v15472_v44  ;;  %v19318_v59 = vld [vmem:[#allocation8_spill] sm:$0xff] }
 0x228   : > { %14113 = vmatmul.mubr.msk.f32.gmra.mrb[58].mxu0 %vm1437_vm3, %v17444_v50  ;;  %15477 = vmatprep.subr.bf16.mxu1 %v17629_v48  ;;  %v3390_v50 = vld [vmem:[#allocation2 + $0x50] sm:$0xff] }
 0x229   : > { %14115 = vmatprep.mubr.msk.f32.mxu0 %vm1437_vm3, %v17448_v53  ;;  %v3391_v53 = vld [vmem:[#allocation2 + $0x60] sm:$0xff]  ;;  %v17855_v44 = vld [vmem:[#allocation2 + $0x109] sm:$0xff] }
 0x22a   : > { %14723 = vmatmul.mubr.msk.f32.gmra.mrb[0].mxu1 %vm1437_vm3, %v16981_v0  ;;  %v19319_v0 = vld [vmem:[#allocation9_spill] sm:$0xff] }
 0x22b   : > { %14725 = vmatprep.mubr.msk.f32.mxu1 %vm1437_vm3, %v16985_v1  ;;  %v17724_v1 = vld [vmem:[#allocation2 + $0x180] sm:$0xff] }
 0x22c   : > { %14116 = vmatmul.mubr.msk.f32.gmra.mrb[60].mxu0 %vm1437_vm3, %v17456_v49  ;;  %v15480_v49 = vpack.c.bf16 %v12460_v9, %v12459_v41  ;;  %v7705_v41 = vld [vmem:[#allocation2 + $0x199] sm:$0xff] }
 0x22d   : > { %14118 = vmatprep.mubr.msk.f32.mxu0 %vm1437_vm3, %v17460_v56  ;;  %v17771_v56 = vld [vmem:[#allocation2 + $0x51] sm:$0xff] }
 0x22e   : > { %14726 = vmatmul.mubr.msk.f32.gmra.mrb[2].mxu1 %vm1437_vm3, %v16997_v4  ;;  %v12063_v4 = vld [vmem:[%s19294_s4 + $0xd0] sm:$0xff] }
 0x22f   : > { %14728 = vmatprep.mubr.msk.f32.mxu1 %vm1437_vm3, %v17001_v5  ;;  %v12064_v5 = vld [vmem:[%s19294_s4 + $0xd8] sm:$0xff] }
 0x230   : > { %14119 = vmatmul.mubr.msk.f32.gmra.mrb[62].mxu0 %vm1437_vm3, %v17468_v57  ;;  %v12493_v57 = vld [vmem:[%s19294_s4 + $0x240] sm:$0xff] }
 0x231   : > { %14121 = vmatprep.mubr.msk.f32.mxu0 %vm1437_vm3, %v17472_v47  ;;  %v12494_v47 = vld [vmem:[%s19294_s4 + $0x248] sm:$0xff] }
 0x232   : > { %14729 = vmatmul.mubr.msk.f32.gmra.mrb[4].mxu1 %vm1437_vm3, %v17013_v61  ;;  %v3385_v61 = vld [vmem:[#allocation2 + $0x18] sm:$0xff] }
 0x233   : > { %14731 = vmatprep.mubr.msk.f32.mxu1 %vm1437_vm3, %v17017_v60  ;;  %v17737_v60 = vld [vmem:[#allocation2 + $0x188] sm:$0xff] }
 0x234   : > { %14122 = vmatmul.mubr.msk.f32.gmra.mrb[64].mxu0 %vm1437_vm3, %v17480_v62  ;;  %v17781_v62 = vld [vmem:[#allocation2 + $0x61] sm:$0xff] }
 0x235   : > { %14124 = vmatprep.mubr.msk.f32.mxu0 %vm1437_vm3, %v17484_v63  ;;  %v3392_v63 = vld [vmem:[#allocation2 + $0x68] sm:$0xff] }
 0x236   : > { %14732 = vmatmul.mubr.msk.f32.gmra.mrb[6].mxu1 %vm1437_vm3, %v17029_v13  ;;  %v7315_v13 = vld [vmem:[#allocation2 + $0x198] sm:$0xff] }
 0x237   : > { %14734 = vmatprep.mubr.msk.f32.mxu1 %vm1437_vm3, %v17033_v14  ;;  %v15392_v14 = vpack.c.bf16 %v12064_v5, %v12063_v4  ;;  %v3410_v4 = vld [vmem:[#allocation2 + $0x140] sm:$0xff]  ;;  %v3411_v5 = vld [vmem:[#allocation2 + $0x150] sm:$0xff] }
 0x238   : > { %14125 = vmatmul.mubr.msk.f32.gmra.mrb[66].mxu0 %vm1437_vm3, %v17492_v15  ;;  %v3393_v15 = vld [vmem:[#allocation2 + $0x78] sm:$0xff] }
 0x239   : > { %14127 = vmatprep.mubr.msk.f32.mxu0 %vm1437_vm3, %v17496_v2  ;;  %v17787_v2 = vpack.c.bf16 %v12494_v47, %v12493_v57  ;;  %v7706_v57 = vld [vmem:[#allocation2 + $0x1a1] sm:$0xff]  ;;  %v7707_v47 = vld [vmem:[#allocation2 + $0x1b1] sm:$0xff] }
 0x23a   : > { %14735 = vmatmul.mubr.msk.f32.gmra.mrb[8].mxu1 %vm1437_vm3, %v17045_v19  ;;  %v3386_v19 = vld [vmem:[#allocation2 + $0x20] sm:$0xff] }
 0x23b   : > { %14737 = vmatprep.mubr.msk.f32.mxu1 %vm1437_vm3, %v17049_v20  ;;  %v12097_v20 = vld [vmem:[%s19294_s4 + $0xe0] sm:$0xff] }
 0x23c   : > { %14128 = vmatmul.mubr.msk.f32.gmra.mrb[68].mxu0 %vm1437_vm3, %v17504_v7  ;;  %v17790_v7 = vld [vmem:[#allocation2 + $0x69] sm:$0xff] }
 0x23d   : > { %14130 = vmatprep.mubr.msk.f32.mxu0 %vm1437_vm3, %v17508_v8  ;;  %v17794_v8 = vld [vmem:[#allocation2 + $0x79] sm:$0xff] }
 0x23e   : > { %14738 = vmatmul.mubr.msk.f32.gmra.mrb[10].mxu1 %vm1437_vm3, %v17061_v21  ;;  %v12098_v21 = vld [vmem:[%s19294_s4 + $0xe8] sm:$0xff] }
 0x23f   : > { %14740 = vmatprep.mubr.msk.f32.mxu1 %vm1437_vm3, %v17065_v27  ;;  %v3387_v27 = vld [vmem:[#allocation2 + $0x30] sm:$0xff] }
 0x240   : > { %14131 = vmatmul.mubr.msk.f32.gmra.mrb[70].mxu0 %vm1437_vm3, %v17516_v10  ;;  %v3394_v10 = vld [vmem:[#allocation2 + $0x80] sm:$0xff] }
 0x241   : > { %14133 = vmatprep.mubr.msk.f32.mxu0 %vm1437_vm3, %v17520_v11  ;;  %v3395_v11 = vld [vmem:[#allocation2 + $0x90] sm:$0xff] }
 0x242   : > { %14741 = vmatmul.mubr.msk.f32.gmra.mrb[12].mxu1 %vm1437_vm3, %v17077_v29  ;;  %v7316_v29 = vld [vmem:[#allocation2 + $0x1a0] sm:$0xff] }
 0x243   : > { %14743 = vmatprep.mubr.msk.f32.mxu1 %vm1437_vm3, %v17081_v25  ;;  %v7317_v25 = vld [vmem:[#allocation2 + $0x1b0] sm:$0xff] }
 0x244   : > { %14134 = vmatmul.mubr.msk.f32.gmra.mrb[72].mxu0 %vm1437_vm3, %v17528_v17  ;;  %v17801_v17 = vld [vmem:[#allocation2 + $0x81] sm:$0xff] }
 0x245   : > { %14136 = vmatprep.mubr.msk.f32.mxu0 %vm1437_vm3, %v17532_v18  ;;  %v17805_v18 = vld [vmem:[#allocation2 + $0x91] sm:$0xff] }
 0x246   : > { %14744 = vmatmul.mubr.msk.f32.gmra.mrb[14].mxu1 %vm1437_vm3, %v17093_v26  ;;  %v17752_v26 = vpack.c.bf16 %v12098_v21, %v12097_v20  ;;  %v17891_v20 = vld [vmem:[#allocation2 + $0x159] sm:$0xff]  ;;  %v17895_v21 = vld [vmem:[#allocation2 + $0x169] sm:$0xff] }
 0x247   : > { %14746 = vmatprep.mubr.msk.f32.mxu1 %vm1437_vm3, %v17097_v32  ;;  %v3388_v32 = vld [vmem:[#allocation2 + $0x38] sm:$0xff] }
 0x248   : > { %14137 = vmatmul.mubr.msk.f32.gmra.mrb[74].mxu0 %vm1437_vm3, %v17540_v23  ;;  %v3396_v23 = vld [vmem:[#allocation2 + $0x98] sm:$0xff] }
 0x249   : > { %14139 = vmatprep.mubr.msk.f32.mxu0 %vm1437_vm3, %v17544_v24  ;;  %v3397_v24 = vld [vmem:[#allocation2 + $0xa8] sm:$0xff] }
 0x24a   : > { %14747 = vmatmul.mubr.msk.f32.gmra.mrb[16].mxu1 %vm1437_vm3, %v19315_v54  ;;  %v17865_v54 = vld [vmem:[#allocation2 + $0x121] sm:$0xff] }
 0x24b   : > { %14749 = vmatprep.mubr.msk.f32.mxu1 %vm1437_vm3, %v19316_v55  ;;  %v3408_v55 = vld [vmem:[#allocation2 + $0x128] sm:$0xff] }
 0x24c   : > { %14140 = vmatmul.mubr.msk.f32.gmra.mrb[76].mxu0 %vm1437_vm3, %v17552_v28  ;;  %v17811_v28 = vld [vmem:[#allocation2 + $0x99] sm:$0xff] }
 0x24d   : > { %14142 = vmatprep.mubr.msk.f32.mxu0 %vm1437_vm3, %v17556_v31  ;;  %v17815_v31 = vld [vmem:[#allocation2 + $0xa9] sm:$0xff] }
 0x24e   : > { %14750 = vmatmul.mubr.msk.f32.gmra.mrb[18].mxu1 %vm1437_vm3, %v19317_v58  ;;  %v3409_v58 = vld [vmem:[#allocation2 + $0x138] sm:$0xff] }
 0x24f   : > { %14752 = vmatprep.mubr.msk.f32.mxu1 %vm1437_vm3, %v19318_v59  ;;  %v17871_v59 = vld [vmem:[#allocation2 + $0x129] sm:$0xff] }
 0x250   : > { %14143 = vmatmul.mubr.msk.f32.gmra.mrb[78].mxu0 %vm1437_vm3, %v17564_v45  ;;  %v3398_v45 = vld [vmem:[#allocation2 + $0xb0] sm:$0xff] }
 0x251   : > { %14145 = vmatprep.mubr.msk.f32.mxu0 %vm1437_vm3, %v17568_v22  ;;  %v3399_v22 = vld [vmem:[#allocation2 + $0xc0] sm:$0xff] }
 0x252   : > { %14753 = vmatmul.mubr.msk.f32.gmra.mrb[20].mxu1 %vm1437_vm3, %v19319_v0  ;;  %v17875_v0 = vld [vmem:[#allocation2 + $0x139] sm:$0xff] }
 0x253   : > { %14755 = vmatprep.mubr.msk.f32.mxu1 %vm1437_vm3, %v17724_v1 }
 0x254   : > { %14146 = vmatmul.mubr.msk.f32.gmra.mrb[80].mxu0 %vm1437_vm3, %v17581_v3  ;;  %v17821_v3 = vld [vmem:[#allocation2 + $0xb1] sm:$0xff] }
 0x255   : > { %14156 = vmatprep.mubr.msk.f32.mxu0 %vm1437_vm3, %v3385_v61  ;;  %v17881_v61 = vld [vmem:[#allocation2 + $0x141] sm:$0xff] }
 0x256   : > { %14756 = vmatmul.mubr.msk.f32.gmra.mrb[22].mxu1 %vm1437_vm3, %v17737_v60 }
 0x257   : > { %14758 = vmatprep.mubr.msk.f32.mxu1 %vm1437_vm3, %v7315_v13  ;;  %v17885_v13 = vld [vmem:[#allocation2 + $0x151] sm:$0xff] }
 0x258   : > { %14157 = vmatmul.mubr.msk.f32.vlgmr.msra.gmra.mrb[50].mxu0 %vm1437_vm3, %v3386_v19  ;;  %v3413_v19 = vld [vmem:[#allocation2 + $0x168] sm:$0xff] }
 0x259   : > { %14159 = vmatprep.mubr.msk.f32.mxu0 %vm1437_vm3, %v3387_v27  ;;  %15391 = vmatpush3.bf16.msra.mxu0 %v17596_v30  ;;  %v17841_v30 = vld [vmem:[#allocation2 + $0xe1] sm:$0xff]  ;;  %v3414_v27 = vld [vmem:[#allocation2 + $0x170] sm:$0xff] }
 0x25a   : > { %14759 = vmatmul.mubr.msk.f32.gmra.mrb[24].mxu1 %vm1437_vm3, %v7316_v29  ;;  %15393 = vmatprep.subr.bf16.mxu0 %v15392_v14  ;;  %v17902_v29 = vld [vmem:[#allocation2 + $0x171] sm:$0xff] }
 0x25b   : > { %14761 = vmatprep.mubr.msk.f32.mxu1 %vm1437_vm3, %v7317_v25  ;;  %v17906_v25 = vld [vmem:[#allocation2 + $0x181] sm:$0xff] }
 0x25c   : > { %14160 = vmatmul.mubr.msk.f32.gmra.mrb[52].mxu0 %vm1437_vm3, %v3388_v32  ;;  %v12099_v32 = vld [vmem:[%s19294_s4 + $0xf0] sm:$0xff] }
 0x25d   : > { %14162 = vmatprep.mubr.msk.f32.mxu0 %vm1437_vm3, %v3389_v6  ;;  %15395 = vmatpush3.bf16.msra.mxu0 %v15392_v14  ;;  %v3412_v14 = vld [vmem:[#allocation2 + $0x158] sm:$0xff] }
 0x25e   : > { %14762 = vmatmul.mubr.msk.f32.gmra.mrb[26].mxu1 %vm1437_vm3, %v7318_v51  ;;  %15397 = vmatprep.subr.bf16.mxu0 %v17752_v26  ;;  %v12100_v6 = vld [vmem:[%s19294_s4 + $0xf8] sm:$0xff]  ;;  %v17919_v51 = vld [vmem:[#allocation2 + $0x189] sm:$0xff] }
 0x25f   : > { %14772 = vmatprep.mubr.msk.f32.mxu1 %vm1437_vm3, %v17764_v52  ;;  %v15400_v9 = vpack.c.bf16 %v12100_v6, %v12099_v32  ;;  %v12532_v32 = vld [vmem:[%s19294_s4 + $0x278] sm:$0xff]  ;;  %v18155_v6 = vld [vmem:[#allocation2 + $0x4b] sm:$0xff] }
 0x260   : > { %14163 = vmatmul.mubr.msk.f32.gmra.mrb[54].mxu0 %vm1437_vm3, %v3390_v50  ;;  %v3776_v50 = vld [vmem:[#allocation2 + $0x21] sm:$0xff] }
 0x261   : > { %14165 = vmatprep.mubr.msk.f32.mxu0 %vm1437_vm3, %v3391_v53  ;;  %v12133_v53 = vld [vmem:[%s19294_s4 + $0x100] sm:$0xff] }
 0x262   : > { %14773 = vmatmul.mubr.msk.f32.vlgmr.msra.gmra.mrb[28].mxu1 %vm1437_vm3, %v17771_v56 }
 0x263   : > { %15479 = vmatpush3.bf16.msra.mxu1 %v17629_v48  ;;  %14775 = vmatprep.mubr.msk.f32.mxu1 %vm1437_vm3, %v17781_v62  ;;  %v17861_v48 = vld [vmem:[#allocation2 + $0x111] sm:$0xff] }
 0x264   : > { %14166 = vmatmul.mubr.msk.f32.gmra.mrb[56].mxu0 %vm1437_vm3, %v3392_v63  ;;  %15481 = vmatprep.subr.bf16.mxu1 %v15480_v49 }
 0x265   : > { %14168 = vmatprep.mubr.msk.f32.mxu0 %vm1437_vm3, %v3393_v15  ;;  %v3778_v15 = vld [vmem:[#allocation2 + $0x39] sm:$0xff] }
 0x266   : > { %14776 = vmatmul.mubr.msk.f32.gmra.mrb[30].mxu1 %vm1437_vm3, %v17790_v7 }
 0x267   : > { %14778 = vmatprep.mubr.msk.f32.mxu1 %vm1437_vm3, %v17794_v8  ;;  %15483 = vmatpush3.bf16.msra.mxu1 %v15480_v49  ;;  %v3777_v49 = vld [vmem:[#allocation2 + $0x31] sm:$0xff] }
 0x268   : > { %14169 = vmatmul.mubr.msk.f32.gmra.mrb[58].mxu0 %vm1437_vm3, %v3394_v10  ;;  %15485 = vmatprep.subr.bf16.mxu1 %v17787_v2  ;;  %v7708_v10 = vld [vmem:[#allocation2 + $0x1b9] sm:$0xff] }
 0x269   : > { %14171 = vmatprep.mubr.msk.f32.mxu0 %vm1437_vm3, %v3395_v11  ;;  %v12495_v11 = vld [vmem:[%s19294_s4 + $0x250] sm:$0xff] }
 0x26a   : > { %14779 = vmatmul.mubr.msk.f32.gmra.mrb[0].mxu1 %vm1437_vm3, %v17801_v17 }
 0x26b   : > { %14781 = vmatprep.mubr.msk.f32.mxu1 %vm1437_vm3, %v17805_v18 }
 0x26c   : > { %14172 = vmatmul.mubr.msk.f32.gmra.mrb[60].mxu0 %vm1437_vm3, %v3396_v23  ;;  %v17947_v23 = vld [vmem:[#allocation2 + $0x4a] sm:$0xff] }
 0x26d   : > { %14174 = vmatprep.mubr.msk.f32.mxu0 %vm1437_vm3, %v3397_v24  ;;  %v17956_v24 = vld [vmem:[#allocation2 + $0x52] sm:$0xff] }
 0x26e   : > { %14782 = vmatmul.mubr.msk.f32.gmra.mrb[2].mxu1 %vm1437_vm3, %v17811_v28 }
 0x26f   : > { %14784 = vmatprep.mubr.msk.f32.mxu1 %vm1437_vm3, %v17815_v31 }
 0x270   : > { %14175 = vmatmul.mubr.msk.f32.gmra.mrb[62].mxu0 %vm1437_vm3, %v3398_v45  ;;  %v12529_v45 = vld [vmem:[%s19294_s4 + $0x260] sm:$0xff] }
 0x271   : > { %14177 = vmatprep.mubr.msk.f32.mxu0 %vm1437_vm3, %v3399_v22  ;;  %v12530_v22 = vld [vmem:[%s19294_s4 + $0x268] sm:$0xff] }
 0x272   : > { %14785 = vmatmul.mubr.msk.f32.gmra.mrb[4].mxu1 %vm1437_vm3, %v17821_v3 }
 0x273   : > { %14787 = vmatprep.mubr.msk.f32.mxu1 %vm1437_vm3, %v17825_v39 }
 0x274   : > { %14178 = vmatmul.mubr.msk.f32.gmra.mrb[64].mxu0 %vm1437_vm3, %v3400_v33  ;;  %v17966_v33 = vld [vmem:[#allocation2 + $0x62] sm:$0xff] }
 0x275   : > { %14180 = vmatprep.mubr.msk.f32.mxu0 %vm1437_vm3, %v3401_v34  ;;  %v17981_v34 = vld [vmem:[#allocation2 + $0x7a] sm:$0xff] }
 0x276   : > { %14788 = vmatmul.mubr.msk.f32.gmra.mrb[6].mxu1 %vm1437_vm3, %v17831_v36 }
 0x277   : > { %14790 = vmatprep.mubr.msk.f32.mxu1 %vm1437_vm3, %v17835_v43 }
 0x278   : > { %14181 = vmatmul.mubr.msk.f32.gmra.mrb[66].mxu0 %vm1437_vm3, %v3402_v46  ;;  %v18054_v46 = vld [vmem:[#allocation2 + $0x10a] sm:$0xff] }
 0x279   : > { %14183 = vmatprep.mubr.msk.f32.mxu0 %vm1437_vm3, %v3403_v12  ;;  %v18062_v12 = vld [vmem:[#allocation2 + $0x112] sm:$0xff] }
 0x27a   : > { %14791 = vmatmul.mubr.msk.f32.gmra.mrb[8].mxu1 %vm1437_vm3, %v17841_v30 }
 0x27b   : > { %14793 = vmatprep.mubr.msk.f32.mxu1 %vm1437_vm3, %v17845_v40 }
 0x27c   : > { %14184 = vmatmul.mubr.msk.f32.gmra.mrb[68].mxu0 %vm1437_vm3, %v3404_v42  ;;  %v18078_v42 = vld [vmem:[#allocation2 + $0x13a] sm:$0xff] }
 0x27d   : > { %14186 = vmatprep.mubr.msk.f32.mxu0 %vm1437_vm3, %v3405_v37  ;;  %v18086_v37 = vld [vmem:[#allocation2 + $0x142] sm:$0xff] }
 0x27e   : > { %14794 = vmatmul.mubr.msk.f32.gmra.mrb[10].mxu1 %vm1437_vm3, %v17851_v16 }
 0x27f   : > { %14796 = vmatprep.mubr.msk.f32.mxu1 %vm1437_vm3, %v17855_v44 }
 0x280   : > { %14187 = vmatmul.mubr.msk.f32.gmra.mrb[70].mxu0 %vm1437_vm3, %v3406_v35  ;;  %v18102_v35 = vld [vmem:[#allocation2 + $0x16a] sm:$0xff] }
 0x281   : > { %14189 = vmatprep.mubr.msk.f32.mxu0 %vm1437_vm3, %v3407_v38  ;;  %v18110_v38 = vld [vmem:[#allocation2 + $0x172] sm:$0xff] }
 0x282   : > { %14797 = vmatmul.mubr.msk.f32.gmra.mrb[12].mxu1 %vm1437_vm3, %v17861_v48 }
 0x283   : > { %14799 = vmatprep.mubr.msk.f32.mxu1 %vm1437_vm3, %v17865_v54 }
 0x284   : > { %14190 = vmatmul.mubr.msk.f32.gmra.mrb[72].mxu0 %vm1437_vm3, %v3408_v55  ;;  %v12136_v55 = vld [vmem:[%s19294_s4 + $0x118] sm:$0xff] }
 0x285   : > { %14192 = vmatprep.mubr.msk.f32.mxu0 %vm1437_vm3, %v3409_v58  ;;  %v4165_v58 = vld [vmem:[#allocation2 + $0x1a] sm:$0xff] }
 0x286   : > { %14800 = vmatmul.mubr.msk.f32.gmra.mrb[14].mxu1 %vm1437_vm3, %v17871_v59 }
 0x287   : > { %14802 = vmatprep.mubr.msk.f32.mxu1 %vm1437_vm3, %v17875_v0 }
 0x288   : > { %14193 = vmatmul.mubr.msk.f32.gmra.mrb[74].mxu0 %vm1437_vm3, %v3410_v4 }
 0x289   : > { %14195 = vmatprep.mubr.msk.f32.mxu0 %vm1437_vm3, %v3411_v5  ;;  %v4166_v5 = vld [vmem:[#allocation2 + $0x22] sm:$0xff] }
 0x28a   : > { %14803 = vmatmul.mubr.msk.f32.gmra.mrb[16].mxu1 %vm1437_vm3, %v17881_v61 }
 0x28b   : > { %14805 = vmatprep.mubr.msk.f32.mxu1 %vm1437_vm3, %v17885_v13 }
 0x28c   : > { %14196 = vmatmul.mubr.msk.f32.gmra.mrb[76].mxu0 %vm1437_vm3, %v3412_v14  ;;  %v4167_v14 = vld [vmem:[#allocation2 + $0x32] sm:$0xff] }
 0x28d   : > { %14198 = vmatprep.mubr.msk.f32.mxu0 %vm1437_vm3, %v3413_v19  ;;  %v8096_v19 = vld [vmem:[#allocation2 + $0x1a2] sm:$0xff] }
 0x28e   : > { %14806 = vmatmul.mubr.msk.f32.gmra.mrb[18].mxu1 %vm1437_vm3, %v17891_v20 }
 0x28f   : > { %14808 = vmatprep.mubr.msk.f32.mxu1 %vm1437_vm3, %v17895_v21 }
 0x290   : > { %14199 = vmatmul.mubr.msk.f32.gmra.mrb[78].mxu0 %vm1437_vm3, %v3414_v27  ;;  %v4168_v27 = vld [vmem:[#allocation2 + $0x3a] sm:$0xff] }
 0x291   : > { %14201 = vmatprep.mubr.msk.f32.mxu0 %vm1437_vm3, %v17724_v1  ;;  %v3775_v1 = vld [vmem:[#allocation2 + $0x19] sm:$0xff] }
 0x292   : > { %14809 = vmatmul.mubr.msk.f32.gmra.mrb[20].mxu1 %vm1437_vm3, %v17902_v29 }
 0x293   : > { %14811 = vmatprep.mubr.msk.f32.mxu1 %vm1437_vm3, %v17906_v25 }
 0x294   : > { %14202 = vmatmul.mubr.msk.f32.gmra.mrb[80].mxu0 %vm1437_vm3, %v17737_v60  ;;  %v12134_v60 = vld [vmem:[%s19294_s4 + $0x108] sm:$0xff] }
 0x295   : > { %14212 = vmatprep.mubr.msk.f32.mxu0 %vm1437_vm3, %v3775_v1  ;;  %v17934_v63 = vpack.c.bf16 %v12134_v60, %v12133_v53  ;;  %v18185_v60 = vld [vmem:[#allocation2 + $0x6b] sm:$0xff] }
 0x296   : > { %14812 = vmatmul.mubr.msk.f32.gmra.mrb[22].mxu1 %vm1437_vm3, %v17919_v51 }
 0x297   : > { %14814 = vmatprep.mubr.msk.f32.mxu1 %vm1437_vm3, %v7705_v41  ;;  %v12565_v41 = vld [vmem:[%s19294_s4 + $0x280] sm:$0xff] }
 0x298   : > { %14213 = vmatmul.mubr.msk.f32.vlgmr.msra.gmra.mrb[50].mxu0 %vm1437_vm3, %v3776_v50  ;;  %v18174_v50 = vld [vmem:[#allocation2 + $0x63] sm:$0xff] }
 0x299   : > { %14215 = vmatprep.mubr.msk.f32.mxu0 %vm1437_vm3, %v3777_v49  ;;  %15399 = vmatpush3.bf16.msra.mxu0 %v17752_v26  ;;  %v12496_v26 = vld [vmem:[%s19294_s4 + $0x258] sm:$0xff] }
 0x29a   : > { %14815 = vmatmul.mubr.msk.f32.gmra.mrb[24].mxu1 %vm1437_vm3, %v7706_v57  ;;  %15401 = vmatprep.subr.bf16.mxu0 %v15400_v9  ;;  %v18189_v49 = vld [vmem:[#allocation2 + $0x7b] sm:$0xff]  ;;  %v18198_v57 = vld [vmem:[#allocation2 + $0x83] sm:$0xff] }
 0x29b   : > { %14817 = vmatprep.mubr.msk.f32.mxu1 %vm1437_vm3, %v7707_v47  ;;  %v18202_v47 = vld [vmem:[#allocation2 + $0x93] sm:$0xff] }
 0x29c   : > { %14216 = vmatmul.mubr.msk.f32.gmra.mrb[52].mxu0 %vm1437_vm3, %v3778_v15  ;;  %v18214_v15 = vld [vmem:[#allocation2 + $0xab] sm:$0xff] }
 0x29d   : > { %14218 = vmatprep.mubr.msk.f32.mxu0 %vm1437_vm3, %v17764_v52  ;;  %15403 = vmatpush3.bf16.msra.mxu0 %v15400_v9  ;;  %v15488_v52 = vpack.c.bf16 %v12496_v26, %v12495_v11  ;;  %v12566_v9 = vld [vmem:[%s19294_s4 + $0x288] sm:$0xff] }
 0x29e   : > { %14818 = vmatmul.mubr.msk.f32.gmra.mrb[26].mxu1 %vm1437_vm3, %v7708_v10  ;;  %15405 = vmatprep.subr.bf16.mxu0 %v17934_v63  ;;  %v18181_v53 = vpack.c.bf16 %v12566_v9, %v12565_v41  ;;  %v18222_v10 = vld [vmem:[#allocation2 + $0xb3] sm:$0xff]  ;;  %v18226_v11 = vld [vmem:[#allocation2 + $0xc3] sm:$0xff]  ;;  %v18234_v26 = vld [vmem:[#allocation2 + $0xcb] sm:$0xff] }
 0x29f   : > { %14828 = vmatprep.mubr.msk.f32.mxu1 %vm1437_vm3, %v17947_v23  ;;  %v18466_v41 = vld [vmem:[#allocation2 + $0xfc] sm:$0xff]  ;;  %v18470_v9 = vld [vmem:[#allocation2 + $0x10c] sm:$0xff] }
 0x2a0   : > { %14219 = vmatmul.mubr.msk.f32.gmra.mrb[54].mxu0 %vm1437_vm3, %v17771_v56  ;;  %v17973_v56 = vpack.c.bf16 %v12530_v22, %v12529_v45  ;;  %v18258_v45 = vld [vmem:[#allocation2 + $0xfb] sm:$0xff]  ;;  %v18262_v22 = vld [vmem:[#allocation2 + $0x10b] sm:$0xff] }
 0x2a1   : > { %14221 = vmatprep.mubr.msk.f32.mxu0 %vm1437_vm3, %v17781_v62  ;;  %v17977_v62 = vld [vmem:[#allocation2 + $0x6a] sm:$0xff] }
 0x2a2   : > { %14829 = vmatmul.mubr.msk.f32.vlgmr.msra.gmra.mrb[28].mxu1 %vm1437_vm3, %v17956_v24 }
 0x2a3   : > { %15487 = vmatpush3.bf16.msra.mxu1 %v17787_v2  ;;  %14831 = vmatprep.mubr.msk.f32.mxu1 %vm1437_vm3, %v17966_v33  ;;  %v17990_v2 = vld [vmem:[#allocation2 + $0x82] sm:$0xff] }
 0x2a4   : > { %14222 = vmatmul.mubr.msk.f32.gmra.mrb[56].mxu0 %vm1437_vm3, %v17790_v7  ;;  %15489 = vmatprep.subr.bf16.mxu1 %v15488_v52  ;;  %v17994_v7 = vld [vmem:[#allocation2 + $0x92] sm:$0xff] }
 0x2a5   : > { %14224 = vmatprep.mubr.msk.f32.mxu0 %vm1437_vm3, %v17794_v8  ;;  %v18002_v8 = vld [vmem:[#allocation2 + $0x9a] sm:$0xff] }
 0x2a6   : > { %14832 = vmatmul.mubr.msk.f32.gmra.mrb[30].mxu1 %vm1437_vm3, %v17977_v62 }
 0x2a7   : > { %14834 = vmatprep.mubr.msk.f32.mxu1 %vm1437_vm3, %v17981_v34  ;;  %15491 = vmatpush3.bf16.msra.mxu1 %v15488_v52  ;;  %v18246_v52 = vld [vmem:[#allocation2 + $0xe3] sm:$0xff] }
 0x2a8   : > { %14225 = vmatmul.mubr.msk.f32.gmra.mrb[58].mxu0 %vm1437_vm3, %v17801_v17  ;;  %15493 = vmatprep.subr.bf16.mxu1 %v17973_v56  ;;  %v18006_v17 = vld [vmem:[#allocation2 + $0xaa] sm:$0xff] }
 0x2a9   : > { %14227 = vmatprep.mubr.msk.f32.mxu0 %vm1437_vm3, %v17805_v18  ;;  %v18014_v18 = vld [vmem:[#allocation2 + $0xb2] sm:$0xff] }
 0x2aa   : > { %14835 = vmatmul.mubr.msk.f32.gmra.mrb[0].mxu1 %vm1437_vm3, %v17990_v2 }
 0x2ab   : > { %14837 = vmatprep.mubr.msk.f32.mxu1 %vm1437_vm3, %v17994_v7 }
 0x2ac   : > { %14228 = vmatmul.mubr.msk.f32.gmra.mrb[60].mxu0 %vm1437_vm3, %v17811_v28  ;;  %v18018_v28 = vld [vmem:[#allocation2 + $0xc2] sm:$0xff] }
 0x2ad   : > { %14230 = vmatprep.mubr.msk.f32.mxu0 %vm1437_vm3, %v17815_v31  ;;  %v18026_v31 = vld [vmem:[#allocation2 + $0xca] sm:$0xff] }
 0x2ae   : > { %14838 = vmatmul.mubr.msk.f32.gmra.mrb[2].mxu1 %vm1437_vm3, %v18002_v8 }
 0x2af   : > { %14840 = vmatprep.mubr.msk.f32.mxu1 %vm1437_vm3, %v18006_v17 }
 0x2b0   : > { %14231 = vmatmul.mubr.msk.f32.gmra.mrb[62].mxu0 %vm1437_vm3, %v17821_v3  ;;  %v18030_v3 = vld [vmem:[#allocation2 + $0xda] sm:$0xff] }
 0x2b1   : > { %14233 = vmatprep.mubr.msk.f32.mxu0 %vm1437_vm3, %v17825_v39  ;;  %v18038_v39 = vld [vmem:[#allocation2 + $0xe2] sm:$0xff] }
 0x2b2   : > { %14841 = vmatmul.mubr.msk.f32.gmra.mrb[4].mxu1 %vm1437_vm3, %v18014_v18 }
 0x2b3   : > { %14843 = vmatprep.mubr.msk.f32.mxu1 %vm1437_vm3, %v18018_v28 }
 0x2b4   : > { %14234 = vmatmul.mubr.msk.f32.gmra.mrb[64].mxu0 %vm1437_vm3, %v17831_v36  ;;  %v18042_v36 = vld [vmem:[#allocation2 + $0xf2] sm:$0xff] }
 0x2b5   : > { %14236 = vmatprep.mubr.msk.f32.mxu0 %vm1437_vm3, %v17835_v43  ;;  %v18050_v43 = vld [vmem:[#allocation2 + $0xfa] sm:$0xff] }
 0x2b6   : > { %14844 = vmatmul.mubr.msk.f32.gmra.mrb[6].mxu1 %vm1437_vm3, %v18026_v31 }
 0x2b7   : > { %14846 = vmatprep.mubr.msk.f32.mxu1 %vm1437_vm3, %v18030_v3 }
 0x2b8   : > { %14237 = vmatmul.mubr.msk.f32.gmra.mrb[66].mxu0 %vm1437_vm3, %v17841_v30  ;;  %v18066_v30 = vld [vmem:[#allocation2 + $0x122] sm:$0xff] }
 0x2b9   : > { %14239 = vmatprep.mubr.msk.f32.mxu0 %vm1437_vm3, %v17845_v40  ;;  %v18074_v40 = vld [vmem:[#allocation2 + $0x12a] sm:$0xff] }
 0x2ba   : > { %14847 = vmatmul.mubr.msk.f32.gmra.mrb[8].mxu1 %vm1437_vm3, %v18038_v39 }
 0x2bb   : > { %14849 = vmatprep.mubr.msk.f32.mxu1 %vm1437_vm3, %v18042_v36 }
 0x2bc   : > { %14240 = vmatmul.mubr.msk.f32.gmra.mrb[68].mxu0 %vm1437_vm3, %v17851_v16  ;;  %v18090_v16 = vld [vmem:[#allocation2 + $0x152] sm:$0xff] }
 0x2bd   : > { %14242 = vmatprep.mubr.msk.f32.mxu0 %vm1437_vm3, %v17855_v44  ;;  %v18098_v44 = vld [vmem:[#allocation2 + $0x15a] sm:$0xff] }
 0x2be   : > { %14850 = vmatmul.mubr.msk.f32.gmra.mrb[10].mxu1 %vm1437_vm3, %v18050_v43 }
 0x2bf   : > { %14852 = vmatprep.mubr.msk.f32.mxu1 %vm1437_vm3, %v18054_v46 }
 0x2c0   : > { %14243 = vmatmul.mubr.msk.f32.gmra.mrb[70].mxu0 %vm1437_vm3, %v17861_v48  ;;  %v18114_v48 = vld [vmem:[#allocation2 + $0x182] sm:$0xff] }
 0x2c1   : > { %14245 = vmatprep.mubr.msk.f32.mxu0 %vm1437_vm3, %v17865_v54  ;;  %v12135_v54 = vld [vmem:[%s19294_s4 + $0x110] sm:$0xff] }
 0x2c2   : > { %14853 = vmatmul.mubr.msk.f32.gmra.mrb[12].mxu1 %vm1437_vm3, %v18062_v12  ;;  %v15408_v4 = vpack.c.bf16 %v12136_v55, %v12135_v54  ;;  %v12568_v54 = vld [vmem:[%s19294_s4 + $0x298] sm:$0xff]  ;;  %v18363_v55 = vld [vmem:[#allocation2 + $0x4c] sm:$0xff] }
 0x2c3   : > { %14855 = vmatprep.mubr.msk.f32.mxu1 %vm1437_vm3, %v18066_v30 }
 0x2c4   : > { %14246 = vmatmul.mubr.msk.f32.gmra.mrb[72].mxu0 %vm1437_vm3, %v17871_v59  ;;  %v18127_v59 = vld [vmem:[#allocation2 + $0x18a] sm:$0xff] }
 0x2c5   : > { %14248 = vmatprep.mubr.msk.f32.mxu0 %vm1437_vm3, %v17875_v0  ;;  %v8095_v0 = vld [vmem:[#allocation2 + $0x19a] sm:$0xff] }
 0x2c6   : > { %14856 = vmatmul.mubr.msk.f32.gmra.mrb[14].mxu1 %vm1437_vm3, %v18074_v40 }
 0x2c7   : > { %14858 = vmatprep.mubr.msk.f32.mxu1 %vm1437_vm3, %v18078_v42 }
 0x2c8   : > { %14249 = vmatmul.mubr.msk.f32.gmra.mrb[74].mxu0 %vm1437_vm3, %v17881_v61  ;;  %v12169_v61 = vld [vmem:[%s19294_s4 + $0x120] sm:$0xff] }
 0x2c9   : > { %14251 = vmatprep.mubr.msk.f32.mxu0 %vm1437_vm3, %v17885_v13  ;;  %v12170_v13 = vld [vmem:[%s19294_s4 + $0x128] sm:$0xff] }
 0x2ca   : > { %14859 = vmatmul.mubr.msk.f32.gmra.mrb[16].mxu1 %vm1437_vm3, %v18086_v37 }
 0x2cb   : > { %14861 = vmatprep.mubr.msk.f32.mxu1 %vm1437_vm3, %v18090_v16 }
 0x2cc   : > { %14252 = vmatmul.mubr.msk.f32.gmra.mrb[76].mxu0 %vm1437_vm3, %v17891_v20  ;;  %v8097_v20 = vld [vmem:[#allocation2 + $0x1b2] sm:$0xff] }
 0x2cd   : > { %14254 = vmatprep.mubr.msk.f32.mxu0 %vm1437_vm3, %v17895_v21  ;;  %v18142_v21 = vpack.c.bf16 %v12170_v13, %v12169_v61  ;;  %v18393_v13 = vld [vmem:[#allocation2 + $0x6c] sm:$0xff] }
 0x2ce   : > { %14862 = vmatmul.mubr.msk.f32.gmra.mrb[18].mxu1 %vm1437_vm3, %v18098_v44 }
 0x2cf   : > { %14864 = vmatprep.mubr.msk.f32.mxu1 %vm1437_vm3, %v18102_v35 }
 0x2d0   : > { %14255 = vmatmul.mubr.msk.f32.gmra.mrb[78].mxu0 %vm1437_vm3, %v17902_v29  ;;  %v8098_v29 = vld [vmem:[#allocation2 + $0x1ba] sm:$0xff] }
 0x2d1   : > { %14257 = vmatprep.mubr.msk.f32.mxu0 %vm1437_vm3, %v17906_v25  ;;  %v12531_v25 = vld [vmem:[%s19294_s4 + $0x270] sm:$0xff] }
 0x2d2   : > { %14865 = vmatmul.mubr.msk.f32.gmra.mrb[20].mxu1 %vm1437_vm3, %v18110_v38  ;;  %v15496_v1 = vpack.c.bf16 %v12532_v32, %v12531_v25  ;;  %v18434_v25 = vld [vmem:[#allocation2 + $0xc4] sm:$0xff]  ;;  %v18442_v32 = vld [vmem:[#allocation2 + $0xcc] sm:$0xff] }
 0x2d3   : > { %14867 = vmatprep.mubr.msk.f32.mxu1 %vm1437_vm3, %v18114_v48 }
 0x2d4   : > { %14258 = vmatmul.mubr.msk.f32.gmra.mrb[80].mxu0 %vm1437_vm3, %v17919_v51  ;;  %v18164_v51 = vld [vmem:[#allocation2 + $0x53] sm:$0xff] }
 0x2d5   : > { %14268 = vmatprep.mubr.msk.f32.mxu0 %vm1437_vm3, %v4165_v58 }
 0x2d6   : > { %14868 = vmatmul.mubr.msk.f32.gmra.mrb[22].mxu1 %vm1437_vm3, %v18127_v59 }
 0x2d7   : > { %14870 = vmatprep.mubr.msk.f32.mxu1 %vm1437_vm3, %v8095_v0  ;;  %v12601_v0 = vld [vmem:[%s19294_s4 + $0x2a0] sm:$0xff] }
 0x2d8   : > { %14269 = vmatmul.mubr.msk.f32.vlgmr.msra.gmra.mrb[50].mxu0 %vm1437_vm3, %v4166_v5  ;;  %v18382_v5 = vld [vmem:[#allocation2 + $0x64] sm:$0xff] }
 0x2d9   : > { %14271 = vmatprep.mubr.msk.f32.mxu0 %vm1437_vm3, %v4167_v14  ;;  %15407 = vmatpush3.bf16.msra.mxu0 %v17934_v63  ;;  %v18210_v63 = vld [vmem:[#allocation2 + $0x9b] sm:$0xff] }
 0x2da   : > { %14871 = vmatmul.mubr.msk.f32.gmra.mrb[24].mxu1 %vm1437_vm3, %v8096_v19  ;;  %15409 = vmatprep.subr.bf16.mxu0 %v15408_v4  ;;  %v18397_v14 = vld [vmem:[#allocation2 + $0x7c] sm:$0xff]  ;;  %v18406_v19 = vld [vmem:[#allocation2 + $0x84] sm:$0xff] }
 0x2db   : > { %14873 = vmatprep.mubr.msk.f32.mxu1 %vm1437_vm3, %v8097_v20  ;;  %v18410_v20 = vld [vmem:[#allocation2 + $0x94] sm:$0xff] }
 0x2dc   : > { %14272 = vmatmul.mubr.msk.f32.gmra.mrb[52].mxu0 %vm1437_vm3, %v4168_v27  ;;  %v18422_v27 = vld [vmem:[#allocation2 + $0xac] sm:$0xff] }
 0x2dd   : > { %14274 = vmatprep.mubr.msk.f32.mxu0 %vm1437_vm3, %v17947_v23  ;;  %15411 = vmatpush3.bf16.msra.mxu0 %v15408_v4  ;;  %v18238_v23 = vld [vmem:[#allocation2 + $0xdb] sm:$0xff]  ;;  %v12602_v4 = vld [vmem:[%s19294_s4 + $0x2a8] sm:$0xff] }
 0x2de   : > { %14874 = vmatmul.mubr.msk.f32.gmra.mrb[26].mxu1 %vm1437_vm3, %v8098_v29  ;;  %15413 = vmatprep.subr.bf16.mxu0 %v18142_v21  ;;  %v18389_v61 = vpack.c.bf16 %v12602_v4, %v12601_v0  ;;  %v18430_v29 = vld [vmem:[#allocation2 + $0xb4] sm:$0xff]  ;;  %v18678_v0 = vld [vmem:[#allocation2 + $0x128] sm:$0xff] }
 0x2df   : > { %14884 = vmatprep.mubr.msk.f32.mxu1 %vm1437_vm3, %v18155_v6  ;;  %v18682_v4 = vld [vmem:[#allocation2 + $0x138] sm:$0xff] }
 0x2e0   : > { %14275 = vmatmul.mubr.msk.f32.gmra.mrb[54].mxu0 %vm1437_vm3, %v17956_v24  ;;  %v18250_v24 = vld [vmem:[#allocation2 + $0xf3] sm:$0xff] }
 0x2e1   : > { %14277 = vmatprep.mubr.msk.f32.mxu0 %vm1437_vm3, %v17966_v33  ;;  %v18270_v33 = vld [vmem:[#allocation2 + $0x113] sm:$0xff] }
 0x2e2   : > { %14885 = vmatmul.mubr.msk.f32.vlgmr.msra.gmra.mrb[28].mxu1 %vm1437_vm3, %v18164_v51 }
 0x2e3   : > { %15495 = vmatpush3.bf16.msra.mxu1 %v17973_v56  ;;  %14887 = vmatprep.mubr.msk.f32.mxu1 %vm1437_vm3, %v18174_v50  ;;  %v18274_v56 = vld [vmem:[#allocation2 + $0x123] sm:$0xff] }
 0x2e4   : > { %14278 = vmatmul.mubr.msk.f32.gmra.mrb[56].mxu0 %vm1437_vm3, %v17977_v62  ;;  %15497 = vmatprep.subr.bf16.mxu1 %v15496_v1  ;;  %v18282_v62 = vld [vmem:[#allocation2 + $0x12b] sm:$0xff] }
 0x2e5   : > { %14280 = vmatprep.mubr.msk.f32.mxu0 %vm1437_vm3, %v17981_v34  ;;  %v18286_v34 = vld [vmem:[#allocation2 + $0x13b] sm:$0xff] }
 0x2e6   : > { %14888 = vmatmul.mubr.msk.f32.gmra.mrb[30].mxu1 %vm1437_vm3, %v18185_v60 }
 0x2e7   : > { %14890 = vmatprep.mubr.msk.f32.mxu1 %vm1437_vm3, %v18189_v49  ;;  %15499 = vmatpush3.bf16.msra.mxu1 %v15496_v1  ;;  %v18454_v1 = vld [vmem:[#allocation2 + $0xe4] sm:$0xff] }
 0x2e8   : > { %14281 = vmatmul.mubr.msk.f32.gmra.mrb[58].mxu0 %vm1437_vm3, %v17990_v2  ;;  %15501 = vmatprep.subr.bf16.mxu1 %v18181_v53  ;;  %v18294_v2 = vld [vmem:[#allocation2 + $0x143] sm:$0xff] }
 0x2e9   : > { %14283 = vmatprep.mubr.msk.f32.mxu0 %vm1437_vm3, %v17994_v7  ;;  %v18298_v7 = vld [vmem:[#allocation2 + $0x153] sm:$0xff] }
 0x2ea   : > { %14891 = vmatmul.mubr.msk.f32.gmra.mrb[0].mxu1 %vm1437_vm3, %v18198_v57 }
 0x2eb   : > { %14893 = vmatprep.mubr.msk.f32.mxu1 %vm1437_vm3, %v18202_v47 }
 0x2ec   : > { %14284 = vmatmul.mubr.msk.f32.gmra.mrb[60].mxu0 %vm1437_vm3, %v18002_v8  ;;  %v18306_v8 = vld [vmem:[#allocation2 + $0x15b] sm:$0xff] }
 0x2ed   : > { %14286 = vmatprep.mubr.msk.f32.mxu0 %vm1437_vm3, %v18006_v17  ;;  %v18310_v17 = vld [vmem:[#allocation2 + $0x16b] sm:$0xff] }
 0x2ee   : > { %14894 = vmatmul.mubr.msk.f32.gmra.mrb[2].mxu1 %vm1437_vm3, %v18210_v63 }
 0x2ef   : > { %14896 = vmatprep.mubr.msk.f32.mxu1 %vm1437_vm3, %v18214_v15 }
 0x2f0   : > { %14287 = vmatmul.mubr.msk.f32.gmra.mrb[62].mxu0 %vm1437_vm3, %v18014_v18  ;;  %v18318_v18 = vld [vmem:[#allocation2 + $0x173] sm:$0xff] }
 0x2f1   : > { %14289 = vmatprep.mubr.msk.f32.mxu0 %vm1437_vm3, %v18018_v28  ;;  %v18322_v28 = vld [vmem:[#allocation2 + $0x183] sm:$0xff] }
 0x2f2   : > { %14897 = vmatmul.mubr.msk.f32.gmra.mrb[4].mxu1 %vm1437_vm3, %v18222_v10 }
 0x2f3   : > { %14899 = vmatprep.mubr.msk.f32.mxu1 %vm1437_vm3, %v18226_v11 }
 0x2f4   : > { %14290 = vmatmul.mubr.msk.f32.gmra.mrb[64].mxu0 %vm1437_vm3, %v18026_v31  ;;  %v12171_v31 = vld [vmem:[%s19294_s4 + $0x130] sm:$0xff] }
 0x2f5   : > { %14292 = vmatprep.mubr.msk.f32.mxu0 %vm1437_vm3, %v18030_v3  ;;  %v12172_v3 = vld [vmem:[%s19294_s4 + $0x138] sm:$0xff] }
 0x2f6   : > { %14900 = vmatmul.mubr.msk.f32.gmra.mrb[6].mxu1 %vm1437_vm3, %v18234_v26 }
 0x2f7   : > { %14902 = vmatprep.mubr.msk.f32.mxu1 %vm1437_vm3, %v18238_v23 }
 0x2f8   : > { %14293 = vmatmul.mubr.msk.f32.gmra.mrb[66].mxu0 %vm1437_vm3, %v18038_v39  ;;  %v4555_v39 = vld [vmem:[#allocation2 + $0x1b] sm:$0xff] }
 0x2f9   : > { %14295 = vmatprep.mubr.msk.f32.mxu0 %vm1437_vm3, %v18042_v36  ;;  %v18335_v36 = vld [vmem:[#allocation2 + $0x18b] sm:$0xff] }
 0x2fa   : > { %14903 = vmatmul.mubr.msk.f32.gmra.mrb[8].mxu1 %vm1437_vm3, %v18246_v52 }
 0x2fb   : > { %14905 = vmatprep.mubr.msk.f32.mxu1 %vm1437_vm3, %v18250_v24 }
 0x2fc   : > { %14296 = vmatmul.mubr.msk.f32.gmra.mrb[68].mxu0 %vm1437_vm3, %v18050_v43  ;;  %v8485_v43 = vld [vmem:[#allocation2 + $0x19b] sm:$0xff] }
 0x2fd   : > { %14298 = vmatprep.mubr.msk.f32.mxu0 %vm1437_vm3, %v18054_v46  ;;  %v15416_v46 = vpack.c.bf16 %v12172_v3, %v12171_v31  ;;  %v18572_v3 = vld [vmem:[#allocation2 + $0x68] sm:$0xff] }
 0x2fe   : > { %14906 = vmatmul.mubr.msk.f32.gmra.mrb[10].mxu1 %vm1437_vm3, %v18258_v45 }
 0x2ff   : > { %14908 = vmatprep.mubr.msk.f32.mxu1 %vm1437_vm3, %v18262_v22 }
 0x300   : > { %14299 = vmatmul.mubr.msk.f32.gmra.mrb[70].mxu0 %vm1437_vm3, %v18062_v12  ;;  %v4556_v12 = vld [vmem:[#allocation2 + $0x23] sm:$0xff] }
 0x301   : > { %14301 = vmatprep.mubr.msk.f32.mxu0 %vm1437_vm3, %v18066_v30  ;;  %v12205_v30 = vld [vmem:[%s19294_s4 + $0x140] sm:$0xff] }
 0x302   : > { %14909 = vmatmul.mubr.msk.f32.gmra.mrb[12].mxu1 %vm1437_vm3, %v18270_v33 }
 0x303   : > { %14911 = vmatprep.mubr.msk.f32.mxu1 %vm1437_vm3, %v18274_v56 }
 0x304   : > { %14302 = vmatmul.mubr.msk.f32.gmra.mrb[72].mxu0 %vm1437_vm3, %v18074_v40  ;;  %v12206_v40 = vld [vmem:[%s19294_s4 + $0x148] sm:$0xff] }
 0x305   : > { %14304 = vmatprep.mubr.msk.f32.mxu0 %vm1437_vm3, %v18078_v42  ;;  %v4557_v42 = vld [vmem:[#allocation2 + $0x33] sm:$0xff] }
 0x306   : > { %14912 = vmatmul.mubr.msk.f32.gmra.mrb[14].mxu1 %vm1437_vm3, %v18282_v62 }
 0x307   : > { %14914 = vmatprep.mubr.msk.f32.mxu1 %vm1437_vm3, %v18286_v34 }
 0x308   : > { %14305 = vmatmul.mubr.msk.f32.gmra.mrb[74].mxu0 %vm1437_vm3, %v18086_v37  ;;  %v8486_v37 = vld [vmem:[#allocation2 + $0x1a3] sm:$0xff] }
 0x309   : > { %14307 = vmatprep.mubr.msk.f32.mxu0 %vm1437_vm3, %v18090_v16  ;;  %v8487_v16 = vld [vmem:[#allocation2 + $0x1b3] sm:$0xff] }
 0x30a   : > { %14915 = vmatmul.mubr.msk.f32.gmra.mrb[16].mxu1 %vm1437_vm3, %v18294_v2 }
 0x30b   : > { %14917 = vmatprep.mubr.msk.f32.mxu1 %vm1437_vm3, %v18298_v7 }
 0x30c   : > { %14308 = vmatmul.mubr.msk.f32.gmra.mrb[76].mxu0 %vm1437_vm3, %v18098_v44  ;;  %v18350_v44 = vpack.c.bf16 %v12206_v40, %v12205_v30  ;;  %v18597_v30 = vld [vmem:[#allocation2 + $0x90] sm:$0xff]  ;;  %v18606_v40 = vld [vmem:[#allocation2 + $0x98] sm:$0xff] }
 0x30d   : > { %14310 = vmatprep.mubr.msk.f32.mxu0 %vm1437_vm3, %v18102_v35  ;;  %v4558_v35 = vld [vmem:[#allocation2 + $0x3b] sm:$0xff] }
 0x30e   : > { %14918 = vmatmul.mubr.msk.f32.gmra.mrb[18].mxu1 %vm1437_vm3, %v18306_v8 }
 0x30f   : > { %14920 = vmatprep.mubr.msk.f32.mxu1 %vm1437_vm3, %v18310_v17 }
 0x310   : > { %14311 = vmatmul.mubr.msk.f32.gmra.mrb[78].mxu0 %vm1437_vm3, %v18110_v38  ;;  %v8488_v38 = vld [vmem:[#allocation2 + $0x1bb] sm:$0xff] }
 0x311   : > { %14313 = vmatprep.mubr.msk.f32.mxu0 %vm1437_vm3, %v18114_v48  ;;  %v12567_v48 = vld [vmem:[%s19294_s4 + $0x290] sm:$0xff] }
 0x312   : > { %14921 = vmatmul.mubr.msk.f32.gmra.mrb[20].mxu1 %vm1437_vm3, %v18318_v18  ;;  %v15504_v58 = vpack.c.bf16 %v12568_v54, %v12567_v48  ;;  %v18646_v48 = vld [vmem:[#allocation2 + $0xf0] sm:$0xff]  ;;  %v18654_v54 = vld [vmem:[#allocation2 + $0xf8] sm:$0xff] }
 0x313   : > { %14923 = vmatprep.mubr.msk.f32.mxu1 %vm1437_vm3, %v18322_v28 }
 0x314   : > { %14314 = vmatmul.mubr.msk.f32.gmra.mrb[80].mxu0 %vm1437_vm3, %v18127_v59  ;;  %v18372_v59 = vld [vmem:[#allocation2 + $0x54] sm:$0xff] }
 0x315   : > { %14324 = vmatprep.mubr.msk.f32.mxu0 %vm1437_vm3, %v4555_v39  ;;  %v12637_v39 = vld [vmem:[%s19294_s4 + $0x2c0] sm:$0xff] }
 0x316   : > { %14924 = vmatmul.mubr.msk.f32.gmra.mrb[22].mxu1 %vm1437_vm3, %v18335_v36 }
 0x317   : > { %14926 = vmatprep.mubr.msk.f32.mxu1 %vm1437_vm3, %v8485_v43  ;;  %v18582_v43 = vld [vmem:[#allocation2 + $0x78] sm:$0xff] }
 0x318   : > { %14325 = vmatmul.mubr.msk.f32.vlgmr.msra.gmra.mrb[50].mxu0 %vm1437_vm3, %v4556_v12  ;;  %v18593_v12 = vld [vmem:[#allocation2 + $0x80] sm:$0xff] }
 0x319   : > { %14327 = vmatprep.mubr.msk.f32.mxu0 %vm1437_vm3, %v4557_v42  ;;  %15415 = vmatpush3.bf16.msra.mxu0 %v18142_v21  ;;  %v18418_v21 = vld [vmem:[#allocation2 + $0x9c] sm:$0xff]  ;;  %v18610_v42 = vld [vmem:[#allocation2 + $0xa8] sm:$0xff] }
 0x31a   : > { %14927 = vmatmul.mubr.msk.f32.gmra.mrb[24].mxu1 %vm1437_vm3, %v8486_v37  ;;  %15417 = vmatprep.subr.bf16.mxu0 %v15416_v46  ;;  %v18618_v37 = vld [vmem:[#allocation2 + $0xb0] sm:$0xff] }
 0x31b   : > { %14929 = vmatprep.mubr.msk.f32.mxu1 %vm1437_vm3, %v8487_v16  ;;  %v18622_v16 = vld [vmem:[#allocation2 + $0xc0] sm:$0xff] }
 0x31c   : > { %14328 = vmatmul.mubr.msk.f32.gmra.mrb[52].mxu0 %vm1437_vm3, %v4558_v35  ;;  %v18634_v35 = vld [vmem:[#allocation2 + $0xd8] sm:$0xff] }
 0x31d   : > { %14330 = vmatprep.mubr.msk.f32.mxu0 %vm1437_vm3, %v18155_v6  ;;  %15419 = vmatpush3.bf16.msra.mxu0 %v15416_v46  ;;  %v18446_v6 = vld [vmem:[#allocation2 + $0xdc] sm:$0xff] }
 0x31e   : > { %14930 = vmatmul.mubr.msk.f32.gmra.mrb[26].mxu1 %vm1437_vm3, %v8488_v38  ;;  %15421 = vmatprep.subr.bf16.mxu0 %v18350_v44  ;;  %v18642_v38 = vld [vmem:[#allocation2 + $0xe0] sm:$0xff] }
 0x31f   : > { %14940 = vmatprep.mubr.msk.f32.mxu1 %vm1437_vm3, %v18363_v55 }
 0x320   : > { %14331 = vmatmul.mubr.msk.f32.gmra.mrb[54].mxu0 %vm1437_vm3, %v18164_v51  ;;  %v18458_v51 = vld [vmem:[#allocation2 + $0xf4] sm:$0xff] }
 0x321   : > { %14333 = vmatprep.mubr.msk.f32.mxu0 %vm1437_vm3, %v18174_v50  ;;  %v18478_v50 = vld [vmem:[#allocation2 + $0x114] sm:$0xff] }
 0x322   : > { %14941 = vmatmul.mubr.msk.f32.vlgmr.msra.gmra.mrb[28].mxu1 %vm1437_vm3, %v18372_v59 }
 0x323   : > { %15503 = vmatpush3.bf16.msra.mxu1 %v18181_v53  ;;  %14943 = vmatprep.mubr.msk.f32.mxu1 %vm1437_vm3, %v18382_v5  ;;  %v18482_v53 = vld [vmem:[#allocation2 + $0x124] sm:$0xff] }
 0x324   : > { %14334 = vmatmul.mubr.msk.f32.gmra.mrb[56].mxu0 %vm1437_vm3, %v18185_v60  ;;  %15505 = vmatprep.subr.bf16.mxu1 %v15504_v58  ;;  %v18490_v60 = vld [vmem:[#allocation2 + $0x12c] sm:$0xff] }
 0x325   : > { %14336 = vmatprep.mubr.msk.f32.mxu0 %vm1437_vm3, %v18189_v49  ;;  %v18494_v49 = vld [vmem:[#allocation2 + $0x13c] sm:$0xff] }
 0x326   : > { %14944 = vmatmul.mubr.msk.f32.gmra.mrb[30].mxu1 %vm1437_vm3, %v18393_v13 }
 0x327   : > { %14946 = vmatprep.mubr.msk.f32.mxu1 %vm1437_vm3, %v18397_v14  ;;  %15507 = vmatpush3.bf16.msra.mxu1 %v15504_v58  ;;  %v18666_v58 = vld [vmem:[#allocation2 + $0x110] sm:$0xff] }
 0x328   : > { %14337 = vmatmul.mubr.msk.f32.gmra.mrb[58].mxu0 %vm1437_vm3, %v18198_v57  ;;  %15509 = vmatprep.subr.bf16.mxu1 %v18389_v61  ;;  %v18502_v57 = vld [vmem:[#allocation2 + $0x144] sm:$0xff] }
 0x329   : > { %14339 = vmatprep.mubr.msk.f32.mxu0 %vm1437_vm3, %v18202_v47  ;;  %v18506_v47 = vld [vmem:[#allocation2 + $0x154] sm:$0xff] }
 0x32a   : > { %14947 = vmatmul.mubr.msk.f32.gmra.mrb[0].mxu1 %vm1437_vm3, %v18406_v19 }
 0x32b   : > { %14949 = vmatprep.mubr.msk.f32.mxu1 %vm1437_vm3, %v18410_v20 }
 0x32c   : > { %14340 = vmatmul.mubr.msk.f32.gmra.mrb[60].mxu0 %vm1437_vm3, %v18210_v63  ;;  %v18514_v63 = vld [vmem:[#allocation2 + $0x15c] sm:$0xff] }
 0x32d   : > { %14342 = vmatprep.mubr.msk.f32.mxu0 %vm1437_vm3, %v18214_v15  ;;  %v18518_v15 = vld [vmem:[#allocation2 + $0x16c] sm:$0xff] }
 0x32e   : > { %14950 = vmatmul.mubr.msk.f32.gmra.mrb[2].mxu1 %vm1437_vm3, %v18418_v21 }
 0x32f   : > { %14952 = vmatprep.mubr.msk.f32.mxu1 %vm1437_vm3, %v18422_v27 }
 0x330   : > { %14343 = vmatmul.mubr.msk.f32.gmra.mrb[62].mxu0 %vm1437_vm3, %v18222_v10  ;;  %v18526_v10 = vld [vmem:[#allocation2 + $0x174] sm:$0xff] }
 0x331   : > { %14345 = vmatprep.mubr.msk.f32.mxu0 %vm1437_vm3, %v18226_v11  ;;  %v18530_v11 = vld [vmem:[#allocation2 + $0x184] sm:$0xff] }
 0x332   : > { %14953 = vmatmul.mubr.msk.f32.gmra.mrb[4].mxu1 %vm1437_vm3, %v18430_v29 }
 0x333   : > { %14955 = vmatprep.mubr.msk.f32.mxu1 %vm1437_vm3, %v18434_v25 }
 0x334   : > { %14346 = vmatmul.mubr.msk.f32.gmra.mrb[64].mxu0 %vm1437_vm3, %v18234_v26  ;;  %v12207_v26 = vld [vmem:[%s19294_s4 + $0x150] sm:$0xff] }
 0x335   : > { %14348 = vmatprep.mubr.msk.f32.mxu0 %vm1437_vm3, %v18238_v23  ;;  %v12208_v23 = vld [vmem:[%s19294_s4 + $0x158] sm:$0xff] }
 0x336   : > { %14956 = vmatmul.mubr.msk.f32.gmra.mrb[6].mxu1 %vm1437_vm3, %v18442_v32 }
 0x337   : > { %14958 = vmatprep.mubr.msk.f32.mxu1 %vm1437_vm3, %v18446_v6 }
 0x338   : > { %14349 = vmatmul.mubr.msk.f32.gmra.mrb[66].mxu0 %vm1437_vm3, %v18246_v52  ;;  %v4945_v52 = vld [vmem:[#allocation2 + $0x1c] sm:$0xff] }
 0x339   : > { %14351 = vmatprep.mubr.msk.f32.mxu0 %vm1437_vm3, %v18250_v24  ;;  %v18543_v24 = vld [vmem:[#allocation2 + $0x18c] sm:$0xff] }
 0x33a   : > { %14959 = vmatmul.mubr.msk.f32.gmra.mrb[8].mxu1 %vm1437_vm3, %v18454_v1 }
 0x33b   : > { %14961 = vmatprep.mubr.msk.f32.mxu1 %vm1437_vm3, %v18458_v51 }
 0x33c   : > { %14352 = vmatmul.mubr.msk.f32.gmra.mrb[68].mxu0 %vm1437_vm3, %v18258_v45  ;;  %v8875_v45 = vld [vmem:[#allocation2 + $0x19c] sm:$0xff] }
 0x33d   : > { %14354 = vmatprep.mubr.msk.f32.mxu0 %vm1437_vm3, %v18262_v22  ;;  %v15424_v22 = vpack.c.bf16 %v12208_v23, %v12207_v26  ;;  %v9631_v23 = vld [vmem:[#allocation2 + $0x81] sm:$0xff] }
 0x33e   : > { %14962 = vmatmul.mubr.msk.f32.gmra.mrb[10].mxu1 %vm1437_vm3, %v18466_v41 }
 0x33f   : > { %14964 = vmatprep.mubr.msk.f32.mxu1 %vm1437_vm3, %v18470_v9 }
 0x340   : > { %14355 = vmatmul.mubr.msk.f32.gmra.mrb[70].mxu0 %vm1437_vm3, %v18270_v33  ;;  %v4946_v33 = vld [vmem:[#allocation2 + $0x24] sm:$0xff] }
 0x341   : > { %14357 = vmatprep.mubr.msk.f32.mxu0 %vm1437_vm3, %v18274_v56  ;;  %v4947_v56 = vld [vmem:[#allocation2 + $0x34] sm:$0xff] }
 0x342   : > { %14965 = vmatmul.mubr.msk.f32.gmra.mrb[12].mxu1 %vm1437_vm3, %v18478_v50 }
 0x343   : > { %14967 = vmatprep.mubr.msk.f32.mxu1 %vm1437_vm3, %v18482_v53 }
 0x344   : > { %14358 = vmatmul.mubr.msk.f32.gmra.mrb[72].mxu0 %vm1437_vm3, %v18282_v62  ;;  %v8876_v62 = vld [vmem:[#allocation2 + $0x1a4] sm:$0xff] }
 0x345   : > { %14360 = vmatprep.mubr.msk.f32.mxu0 %vm1437_vm3, %v18286_v34  ;;  %v8877_v34 = vld [vmem:[#allocation2 + $0x1b4] sm:$0xff] }
 0x346   : > { %14968 = vmatmul.mubr.msk.f32.gmra.mrb[14].mxu1 %vm1437_vm3, %v18490_v60 }
 0x347   : > { %14970 = vmatprep.mubr.msk.f32.mxu1 %vm1437_vm3, %v18494_v49 }
 0x348   : > { %14361 = vmatmul.mubr.msk.f32.gmra.mrb[74].mxu0 %vm1437_vm3, %v18294_v2  ;;  %v4948_v2 = vld [vmem:[#allocation2 + $0x3c] sm:$0xff] }
 0x349   : > { %14363 = vmatprep.mubr.msk.f32.mxu0 %vm1437_vm3, %v18298_v7  ;;  %v8878_v7 = vld [vmem:[#allocation2 + $0x1bc] sm:$0xff] }
 0x34a   : > { %14971 = vmatmul.mubr.msk.f32.gmra.mrb[16].mxu1 %vm1437_vm3, %v18502_v57 }
 0x34b   : > { %14973 = vmatprep.mubr.msk.f32.mxu1 %vm1437_vm3, %v18506_v47 }
 0x34c   : > { %14364 = vmatmul.mubr.msk.f32.gmra.mrb[76].mxu0 %vm1437_vm3, %v18306_v8  ;;  %v12603_v8 = vld [vmem:[%s19294_s4 + $0x2b0] sm:$0xff] }
 0x34d   : > { %14366 = vmatprep.mubr.msk.f32.mxu0 %vm1437_vm3, %v18310_v17  ;;  %v12604_v17 = vld [vmem:[%s19294_s4 + $0x2b8] sm:$0xff] }
 0x34e   : > { %14974 = vmatmul.mubr.msk.f32.gmra.mrb[18].mxu1 %vm1437_vm3, %v18514_v63  ;;  %v15512_v31 = vpack.c.bf16 %v12604_v17, %v12603_v8  ;;  %v9642_v8 = vld [vmem:[#allocation2 + $0x109] sm:$0xff]  ;;  %v9643_v17 = vld [vmem:[#allocation2 + $0x111] sm:$0xff] }
 0x34f   : > { %14976 = vmatprep.mubr.msk.f32.mxu1 %vm1437_vm3, %v18518_v15 }
 0x350   : > { %14367 = vmatmul.mubr.msk.f32.gmra.mrb[78].mxu0 %vm1437_vm3, %v18318_v18  ;;  %v18563_v18 = vld [vmem:[#allocation2 + $0x60] sm:$0xff] }
 0x351   : > { %14369 = vmatprep.mubr.msk.f32.mxu0 %vm1437_vm3, %v18322_v28  ;;  %v19320_v28 = vld [vmem:[#allocation3_spill] sm:$0xff] }
 0x352   : > { %14977 = vmatmul.mubr.msk.f32.gmra.mrb[20].mxu1 %vm1437_vm3, %v18526_v10 }
 0x353   : > { %14979 = vmatprep.mubr.msk.f32.mxu1 %vm1437_vm3, %v18530_v11 }
 0x354   : > { %14370 = vmatmul.mubr.msk.f32.gmra.mrb[80].mxu0 %vm1437_vm3, %v18335_v36  ;;  %v12638_v36 = vld [vmem:[%s19294_s4 + $0x2c8] sm:$0xff] }
 0x355   : > { %14380 = vmatprep.mubr.msk.f32.mxu0 %vm1437_vm3, %v4945_v52  ;;  %v18589_v46 = vpack.c.bf16 %v12638_v36, %v12637_v39  ;;  %v9632_v52 = vld [vmem:[#allocation2 + $0x91] sm:$0xff]  ;;  %v9649_v36 = vld [vmem:[#allocation2 + $0x159] sm:$0xff] }
 0x356   : > { %14980 = vmatmul.mubr.msk.f32.gmra.mrb[22].mxu1 %vm1437_vm3, %v18543_v24  ;;  %v9648_v39 = vld [vmem:[#allocation2 + $0x151] sm:$0xff] }
 0x357   : > { %14982 = vmatprep.mubr.msk.f32.mxu1 %vm1437_vm3, %v8875_v45  ;;  %v9634_v45 = vld [vmem:[#allocation2 + $0xa9] sm:$0xff] }
 0x358   : > { %14381 = vmatmul.mubr.msk.f32.vlgmr.msra.gmra.mrb[50].mxu0 %vm1437_vm3, %v4946_v33  ;;  %v9636_v33 = vld [vmem:[#allocation2 + $0xc1] sm:$0xff] }
 0x359   : > { %14383 = vmatprep.mubr.msk.f32.mxu0 %vm1437_vm3, %v4947_v56  ;;  %15423 = vmatpush3.bf16.msra.mxu0 %v18350_v44  ;;  %v18630_v44 = vld [vmem:[#allocation2 + $0xc8] sm:$0xff] }
 0x35a   : > { %14983 = vmatmul.mubr.msk.f32.gmra.mrb[24].mxu1 %vm1437_vm3, %v8876_v62  ;;  %15425 = vmatprep.subr.bf16.mxu0 %v15424_v22  ;;  %v9637_v56 = vld [vmem:[#allocation2 + $0xc9] sm:$0xff]  ;;  %v9638_v62 = vld [vmem:[#allocation2 + $0xd9] sm:$0xff] }
 0x35b   : > { %14985 = vmatprep.mubr.msk.f32.mxu1 %vm1437_vm3, %v8877_v34  ;;  %v9639_v34 = vld [vmem:[#allocation2 + $0xe1] sm:$0xff] }
 0x35c   : > { %14384 = vmatmul.mubr.msk.f32.gmra.mrb[52].mxu0 %vm1437_vm3, %v4948_v2  ;;  %v9640_v2 = vld [vmem:[#allocation2 + $0xf1] sm:$0xff] }
 0x35d   : > { %14386 = vmatprep.mubr.msk.f32.mxu0 %vm1437_vm3, %v18363_v55  ;;  %15427 = vmatpush3.bf16.msra.mxu0 %v15424_v22  ;;  %v18658_v55 = vld [vmem:[#allocation2 + $0x108] sm:$0xff]  ;;  %v9635_v22 = vld [vmem:[#allocation2 + $0xb1] sm:$0xff] }
 0x35e   : > { %14986 = vmatmul.mubr.msk.f32.gmra.mrb[26].mxu1 %vm1437_vm3, %v8878_v7  ;;  %15429 = vmatprep.subr.bf16.mxu0 %v19320_v28  ;;  %v9641_v7 = vld [vmem:[#allocation2 + $0xf9] sm:$0xff] }
 0x35f   : > { %14996 = vmatprep.mubr.msk.f32.mxu1 %vm1437_vm3, %v18563_v18 }
 0x360   : > { %14387 = vmatmul.mubr.msk.f32.gmra.mrb[54].mxu0 %vm1437_vm3, %v18372_v59  ;;  %v18670_v59 = vld [vmem:[#allocation2 + $0x120] sm:$0xff] }
 0x361   : > { %14389 = vmatprep.mubr.msk.f32.mxu0 %vm1437_vm3, %v18382_v5  ;;  %v18690_v5 = vld [vmem:[#allocation2 + $0x140] sm:$0xff] }
 0x362   : > { %14997 = vmatmul.mubr.msk.f32.vlgmr.msra.gmra.mrb[28].mxu1 %vm1437_vm3, %v18572_v3 }
 0x363   : > { %15511 = vmatpush3.bf16.msra.mxu1 %v18389_v61  ;;  %14999 = vmatprep.mubr.msk.f32.mxu1 %vm1437_vm3, %v18582_v43  ;;  %v18694_v61 = vld [vmem:[#allocation2 + $0x150] sm:$0xff] }
 0x364   : > { %14390 = vmatmul.mubr.msk.f32.gmra.mrb[56].mxu0 %vm1437_vm3, %v18393_v13  ;;  %15513 = vmatprep.subr.bf16.mxu1 %v15512_v31  ;;  %v18702_v13 = vld [vmem:[#allocation2 + $0x158] sm:$0xff] }
 0x365   : > { %14392 = vmatprep.mubr.msk.f32.mxu0 %vm1437_vm3, %v18397_v14  ;;  %v18706_v14 = vld [vmem:[#allocation2 + $0x168] sm:$0xff] }
 0x366   : > { %15000 = vmatmul.mubr.msk.f32.gmra.mrb[30].mxu1 %vm1437_vm3, %v18593_v12 }
 0x367   : > { %15002 = vmatprep.mubr.msk.f32.mxu1 %vm1437_vm3, %v18597_v30  ;;  %15515 = vmatpush3.bf16.msra.mxu1 %v15512_v31  ;;  %v9646_v31 = vld [vmem:[#allocation2 + $0x139] sm:$0xff] }
 0x368   : > { %14393 = vmatmul.mubr.msk.f32.gmra.mrb[58].mxu0 %vm1437_vm3, %v18406_v19  ;;  %15517 = vmatprep.subr.bf16.mxu1 %v18589_v46  ;;  %v18714_v19 = vld [vmem:[#allocation2 + $0x170] sm:$0xff] }
 0x369   : > { %14395 = vmatprep.mubr.msk.f32.mxu0 %vm1437_vm3, %v18410_v20  ;;  %v18718_v20 = vld [vmem:[#allocation2 + $0x180] sm:$0xff] }
 0x36a   : > { %15003 = vmatmul.mubr.msk.f32.gmra.mrb[0].mxu1 %vm1437_vm3, %v18606_v40 }
 0x36b   : > { %15005 = vmatprep.mubr.msk.f32.mxu1 %vm1437_vm3, %v18610_v42 }
 0x36c   : > { %14396 = vmatmul.mubr.msk.f32.gmra.mrb[60].mxu0 %vm1437_vm3, %v18418_v21  ;;  %v18726_v21 = vld [vmem:[#allocation2 + $0x188] sm:$0xff] }
 0x36d   : > { %14398 = vmatprep.mubr.msk.f32.mxu0 %vm1437_vm3, %v18422_v27  ;;  %v18730_v27 = vld [vmem:[#allocation2 + $0x198] sm:$0xff] }
 0x36e   : > { %15006 = vmatmul.mubr.msk.f32.gmra.mrb[2].mxu1 %vm1437_vm3, %v18618_v37 }
 0x36f   : > { %15008 = vmatprep.mubr.msk.f32.mxu1 %vm1437_vm3, %v18622_v16 }
 0x370   : > { %14399 = vmatmul.mubr.msk.f32.gmra.mrb[62].mxu0 %vm1437_vm3, %v18430_v29  ;;  %v5336_v29 = vld [vmem:[#allocation2 + $0x30] sm:$0xff] }
 0x371   : > { %14401 = vmatprep.mubr.msk.f32.mxu0 %vm1437_vm3, %v18434_v25  ;;  %v18737_v25 = vld [vmem:[#allocation2 + $0x1a0] sm:$0xff] }
 0x372   : > { %15009 = vmatmul.mubr.msk.f32.gmra.mrb[4].mxu1 %vm1437_vm3, %v18630_v44 }
 0x373   : > { %15011 = vmatprep.mubr.msk.f32.mxu1 %vm1437_vm3, %v18634_v35 }
 0x374   : > { %14402 = vmatmul.mubr.msk.f32.gmra.mrb[64].mxu0 %vm1437_vm3, %v18442_v32  ;;  %v9266_v32 = vld [vmem:[#allocation2 + $0x1b0] sm:$0xff] }
 0x375   : > { %14404 = vmatprep.mubr.msk.f32.mxu0 %vm1437_vm3, %v18446_v6  ;;  %v5337_v6 = vld [vmem:[#allocation2 + $0x38] sm:$0xff] }
 0x376   : > { %15012 = vmatmul.mubr.msk.f32.gmra.mrb[6].mxu1 %vm1437_vm3, %v18642_v38 }
 0x377   : > { %15014 = vmatprep.mubr.msk.f32.mxu1 %vm1437_vm3, %v18646_v48 }
 0x378   : > { %14405 = vmatmul.mubr.msk.f32.gmra.mrb[66].mxu0 %vm1437_vm3, %v18454_v1  ;;  %v5338_v1 = vld [vmem:[#allocation2 + $0x48] sm:$0xff] }
 0x379   : > { %14407 = vmatprep.mubr.msk.f32.mxu0 %vm1437_vm3, %v18458_v51  ;;  %v9267_v51 = vld [vmem:[#allocation2 + $0x1b8] sm:$0xff] }
 0x37a   : > { %15015 = vmatmul.mubr.msk.f32.gmra.mrb[8].mxu1 %vm1437_vm3, %v18654_v54 }
 0x37b   : > { %15017 = vmatprep.mubr.msk.f32.mxu1 %vm1437_vm3, %v18658_v55 }
 0x37c   : > { %14408 = vmatmul.mubr.msk.f32.gmra.mrb[68].mxu0 %vm1437_vm3, %v18466_v41  ;;  %v9268_v41 = vld [vmem:[#allocation2 + $0x1c8] sm:$0xff] }
 0x37d   : > { %14410 = vmatprep.mubr.msk.f32.mxu0 %vm1437_vm3, %v18470_v9  ;;  %v19321_v9 = vld [vmem:[#allocation4_spill] sm:$0xff] }
 0x37e   : > { %15018 = vmatmul.mubr.msk.f32.gmra.mrb[10].mxu1 %vm1437_vm3, %v18666_v58 }
 0x37f   : > { %15020 = vmatprep.mubr.msk.f32.mxu1 %vm1437_vm3, %v18670_v59 }
 0x380   : > { %14411 = vmatmul.mubr.msk.f32.gmra.mrb[70].mxu0 %vm1437_vm3, %v18478_v50  ;;  %v5339_v50 = vld [vmem:[#allocation2 + $0x50] sm:$0xff] }
 0x381   : > { %14413 = vmatprep.mubr.msk.f32.mxu0 %vm1437_vm3, %v18482_v53  ;;  %v9269_v53 = vld [vmem:[#allocation2 + $0x1d0] sm:$0xff] }
 0x382   : > { %15021 = vmatmul.mubr.msk.f32.gmra.mrb[12].mxu1 %vm1437_vm3, %v18678_v0 }
 0x383   : > { %15023 = vmatprep.mubr.msk.f32.mxu1 %vm1437_vm3, %v18682_v4 }
 0x384   : > { %14414 = vmatmul.mubr.msk.f32.gmra.mrb[72].mxu0 %vm1437_vm3, %v18490_v60  ;;  %v12639_v60 = vld [vmem:[%s19294_s4 + $0x2d0] sm:$0xff] }
 0x385   : > { %14416 = vmatprep.mubr.msk.f32.mxu0 %vm1437_vm3, %v18494_v49  ;;  %v12640_v49 = vld [vmem:[%s19294_s4 + $0x2d8] sm:$0xff] }
 0x386   : > { %15024 = vmatmul.mubr.msk.f32.gmra.mrb[14].mxu1 %vm1437_vm3, %v18690_v5 }
 0x387   : > { %15026 = vmatprep.mubr.msk.f32.mxu1 %vm1437_vm3, %v18694_v61 }
 0x388   : > { %14417 = vmatmul.mubr.msk.f32.gmra.mrb[74].mxu0 %vm1437_vm3, %v18502_v57  ;;  %v9628_v57 = vld [vmem:[#allocation2 + $0x61] sm:$0xff] }
 0x389   : > { %14419 = vmatprep.mubr.msk.f32.mxu0 %vm1437_vm3, %v18506_v47  ;;  %v15520_v47 = vpack.c.bf16 %v12640_v49, %v12639_v60  ;;  %v10034_v60 = vld [vmem:[#allocation2 + $0x122] sm:$0xff]  ;;  %v10035_v49 = vld [vmem:[#allocation2 + $0x12a] sm:$0xff] }
 0x38a   : > { %15027 = vmatmul.mubr.msk.f32.gmra.mrb[16].mxu1 %vm1437_vm3, %v18702_v13 }
 0x38b   : > { %15029 = vmatprep.mubr.msk.f32.mxu1 %vm1437_vm3, %v18706_v14 }
 0x38c   : > { %14420 = vmatmul.mubr.msk.f32.gmra.mrb[76].mxu0 %vm1437_vm3, %v18514_v63  ;;  %v9629_v63 = vld [vmem:[#allocation2 + $0x69] sm:$0xff] }
 0x38d   : > { %14422 = vmatprep.mubr.msk.f32.mxu0 %vm1437_vm3, %v18518_v15  ;;  %v12673_v15 = vld [vmem:[%s19294_s4 + $0x2e0] sm:$0xff] }
 0x38e   : > { %15030 = vmatmul.mubr.msk.f32.gmra.mrb[18].mxu1 %vm1437_vm3, %v18714_v19 }
 0x38f   : > { %15032 = vmatprep.mubr.msk.f32.mxu1 %vm1437_vm3, %v18718_v20 }
 0x390   : > { %14423 = vmatmul.mubr.msk.f32.gmra.mrb[78].mxu0 %vm1437_vm3, %v18526_v10  ;;  %v12674_v10 = vld [vmem:[%s19294_s4 + $0x2e8] sm:$0xff] }
 0x391   : > { %14425 = vmatprep.mubr.msk.f32.mxu0 %vm1437_vm3, %v18530_v11  ;;  %v9630_v11 = vld [vmem:[#allocation2 + $0x79] sm:$0xff]  ;;  %v18775_v26 = vpack.c.bf16 %v12674_v10, %v12673_v15  ;;  %v10040_v10 = vld [vmem:[#allocation2 + $0x16a] sm:$0xff] }
 0x392   : > { %15033 = vmatmul.mubr.msk.f32.gmra.mrb[20].mxu1 %vm1437_vm3, %v18726_v21  ;;  %v10039_v15 = vld [vmem:[#allocation2 + $0x15a] sm:$0xff] }
 0x393   : > { %15035 = vmatprep.mubr.msk.f32.mxu1 %vm1437_vm3, %v18730_v27 }
 0x394   : > { %14426 = vmatmul.mubr.msk.f32.gmra.mrb[80].mxu0 %vm1437_vm3, %v18543_v24  ;;  %v9633_v24 = vld [vmem:[#allocation2 + $0x99] sm:$0xff] }
 0x395   : > { %14436 = vmatprep.mubr.msk.f32.mxu0 %vm1437_vm3, %v5336_v29  ;;  %v10024_v29 = vld [vmem:[#allocation2 + $0xaa] sm:$0xff] }
 0x396   : > { %15036 = vmatmul.mubr.msk.f32.gmra.mrb[22].mxu1 %vm1437_vm3, %v18737_v25 }
 0x397   : > { %15038 = vmatprep.mubr.msk.f32.mxu1 %vm1437_vm3, %v9266_v32  ;;  %v10026_v32 = vld [vmem:[#allocation2 + $0xc2] sm:$0xff] }
 0x398   : > { %14437 = vmatmul.mubr.msk.f32.vlgmr.msra.gmra.mrb[50].mxu0 %vm1437_vm3, %v5337_v6  ;;  %v10027_v6 = vld [vmem:[#allocation2 + $0xca] sm:$0xff] }
 0x399   : > { %14439 = vmatprep.mubr.msk.f32.mxu0 %vm1437_vm3, %v5338_v1  ;;  %15431 = vmatpush3.bf16.msra.mxu0 %v19320_v28  ;;  %v9645_v28 = vld [vmem:[#allocation2 + $0x129] sm:$0xff]  ;;  %v10028_v1 = vld [vmem:[#allocation2 + $0xda] sm:$0xff] }
 0x39a   : > { %15039 = vmatmul.mubr.msk.f32.gmra.mrb[24].mxu1 %vm1437_vm3, %v9267_v51  ;;  %15433 = vmatprep.subr.bf16.mxu0 %v19321_v9  ;;  %v10029_v51 = vld [vmem:[#allocation2 + $0xe2] sm:$0xff] }
 0x39b   : > { %15041 = vmatprep.mubr.msk.f32.mxu1 %vm1437_vm3, %v9268_v41  ;;  %v10030_v41 = vld [vmem:[#allocation2 + $0xf2] sm:$0xff] }
 0x39c   : > { %14440 = vmatmul.mubr.msk.f32.gmra.mrb[52].mxu0 %vm1437_vm3, %v5339_v50  ;;  %v10032_v50 = vld [vmem:[#allocation2 + $0x10a] sm:$0xff] }
 0x39d   : > { %14442 = vmatprep.mubr.msk.f32.mxu0 %vm1437_vm3, %v18563_v18  ;;  %15435 = vmatpush3.bf16.msra.mxu0 %v19321_v9  ;;  %v9644_v18 = vld [vmem:[#allocation2 + $0x121] sm:$0xff] }
 0x39e   : > { %15042 = vmatmul.mubr.msk.f32.gmra.mrb[26].mxu1 %vm1437_vm3, %v9269_v53  ;;  %v10031_v9 = vld [vmem:[#allocation2 + $0xfa] sm:$0xff]  ;;  %v10033_v53 = vld [vmem:[#allocation2 + $0x112] sm:$0xff] }
 0x39f   : > { %15052 = vmatprep.mubr.msk.f32.mxu1 %vm1437_vm3, %v9628_v57  ;;  %v10036_v57 = vld [vmem:[#allocation2 + $0x13a] sm:$0xff] }
 0x3a0   : > { %14443 = vmatmul.mubr.msk.f32.gmra.mrb[54].mxu0 %vm1437_vm3, %v18572_v3  ;;  %v9647_v3 = vld [vmem:[#allocation2 + $0x141] sm:$0xff] }
 0x3a1   : > { %14445 = vmatprep.mubr.msk.f32.mxu0 %vm1437_vm3, %v18582_v43  ;;  %v9650_v43 = vld [vmem:[#allocation2 + $0x169] sm:$0xff] }
 0x3a2   : > { %15053 = vmatmul.mubr.msk.f32.vlgmr.msra.gmra.mrb[28].mxu1 %vm1437_vm3, %v9629_v63  ;;  %v10038_v63 = vld [vmem:[#allocation2 + $0x152] sm:$0xff] }
 0x3a3   : > { %15519 = vmatpush3.bf16.msra.mxu1 %v18589_v46  ;;  %15055 = vmatprep.mubr.msk.f32.mxu1 %vm1437_vm3, %v9630_v11  ;;  %v9651_v46 = vld [vmem:[#allocation2 + $0x171] sm:$0xff] }
 0x3a4   : > { %14446 = vmatmul.mubr.msk.f32.gmra.mrb[56].mxu0 %vm1437_vm3, %v18593_v12  ;;  %15521 = vmatprep.subr.bf16.mxu1 %v15520_v47  ;;  %v9652_v12 = vld [vmem:[#allocation2 + $0x181] sm:$0xff]  ;;  %v10041_v11 = vld [vmem:[#allocation2 + $0x172] sm:$0xff] }
 0x3a5   : > { %14448 = vmatprep.mubr.msk.f32.mxu0 %vm1437_vm3, %v18597_v30  ;;  %v9653_v30 = vld [vmem:[#allocation2 + $0x189] sm:$0xff] }
 0x3a6   : > { %15056 = vmatmul.mubr.msk.f32.gmra.mrb[30].mxu1 %vm1437_vm3, %v9631_v23  ;;  %v10043_v23 = vld [vmem:[#allocation2 + $0x18a] sm:$0xff] }
 0x3a7   : > { %15058 = vmatprep.mubr.msk.f32.mxu1 %vm1437_vm3, %v9632_v52  ;;  %15523 = vmatpush3.bf16.msra.mxu1 %v15520_v47  ;;  %v10037_v47 = vld [vmem:[#allocation2 + $0x142] sm:$0xff]  ;;  %v10044_v52 = vld [vmem:[#allocation2 + $0x19a] sm:$0xff] }
 0x3a8   : > { %14449 = vmatmul.mubr.msk.f32.gmra.mrb[58].mxu0 %vm1437_vm3, %v18606_v40  ;;  %15525 = vmatprep.subr.bf16.mxu1 %v18775_v26  ;;  %v9654_v40 = vld [vmem:[#allocation2 + $0x199] sm:$0xff] }
 0x3a9   : > { %14451 = vmatprep.mubr.msk.f32.mxu0 %vm1437_vm3, %v18610_v42  ;;  %v5726_v42 = vld [vmem:[#allocation2 + $0x31] sm:$0xff] }
 0x3aa   : > { %15059 = vmatmul.mubr.msk.f32.gmra.mrb[0].mxu1 %vm1437_vm3, %v9633_v24  ;;  %v10045_v24 = vld [vmem:[#allocation2 + $0x1a2] sm:$0xff] }
 0x3ab   : > { %15061 = vmatprep.mubr.msk.f32.mxu1 %vm1437_vm3, %v9634_v45  ;;  %v10046_v45 = vld [vmem:[#allocation2 + $0x1b2] sm:$0xff] }
 0x3ac   : > { %14452 = vmatmul.mubr.msk.f32.gmra.mrb[60].mxu0 %vm1437_vm3, %v18618_v37  ;;  %v9655_v37 = vld [vmem:[#allocation2 + $0x1a1] sm:$0xff] }
 0x3ad   : > { %14454 = vmatprep.mubr.msk.f32.mxu0 %vm1437_vm3, %v18622_v16  ;;  %v9656_v16 = vld [vmem:[#allocation2 + $0x1b1] sm:$0xff] }
 0x3ae   : > { %15062 = vmatmul.mubr.msk.f32.gmra.mrb[2].mxu1 %vm1437_vm3, %v9635_v22  ;;  %v10047_v22 = vld [vmem:[#allocation2 + $0x1ba] sm:$0xff] }
 0x3af   : > { %15064 = vmatprep.mubr.msk.f32.mxu1 %vm1437_vm3, %v9636_v33  ;;  %v10048_v33 = vld [vmem:[#allocation2 + $0x1ca] sm:$0xff] }
 0x3b0   : > { %14455 = vmatmul.mubr.msk.f32.gmra.mrb[62].mxu0 %vm1437_vm3, %v18630_v44  ;;  %v5727_v44 = vld [vmem:[#allocation2 + $0x39] sm:$0xff] }
 0x3b1   : > { %14457 = vmatprep.mubr.msk.f32.mxu0 %vm1437_vm3, %v18634_v35  ;;  %v5728_v35 = vld [vmem:[#allocation2 + $0x49] sm:$0xff] }
 0x3b2   : > { %15065 = vmatmul.mubr.msk.f32.gmra.mrb[4].mxu1 %vm1437_vm3, %v9637_v56  ;;  %v10049_v56 = vld [vmem:[#allocation2 + $0x1d2] sm:$0xff] }
 0x3b3   : > { %15067 = vmatprep.mubr.msk.f32.mxu1 %vm1437_vm3, %v9638_v62  ;;  %v12711_v62 = vld [vmem:[%s19294_s4 + $0x310] sm:$0xff] }
 0x3b4   : > { %14458 = vmatmul.mubr.msk.f32.gmra.mrb[64].mxu0 %vm1437_vm3, %v18642_v38  ;;  %v9657_v38 = vld [vmem:[#allocation2 + $0x1b9] sm:$0xff] }
 0x3b5   : > { %14460 = vmatprep.mubr.msk.f32.mxu0 %vm1437_vm3, %v18646_v48  ;;  %v9658_v48 = vld [vmem:[#allocation2 + $0x1c9] sm:$0xff] }
 0x3b6   : > { %15068 = vmatmul.mubr.msk.f32.gmra.mrb[6].mxu1 %vm1437_vm3, %v9639_v34  ;;  %v12712_v34 = vld [vmem:[%s19294_s4 + $0x318] sm:$0xff] }
 0x3b7   : > { %15070 = vmatprep.mubr.msk.f32.mxu1 %vm1437_vm3, %v9640_v2  ;;  %v10408_v2 = vld [vmem:[#allocation2 + $0x63] sm:$0xff] }
 0x3b8   : > { %14461 = vmatmul.mubr.msk.f32.gmra.mrb[66].mxu0 %vm1437_vm3, %v18654_v54  ;;  %v5729_v54 = vld [vmem:[#allocation2 + $0x51] sm:$0xff] }
 0x3b9   : > { %14463 = vmatprep.mubr.msk.f32.mxu0 %vm1437_vm3, %v18658_v55  ;;  %v9659_v55 = vld [vmem:[#allocation2 + $0x1d1] sm:$0xff] }
 0x3ba   : > { %15071 = vmatmul.mubr.msk.f32.gmra.mrb[8].mxu1 %vm1437_vm3, %v9641_v7  ;;  %v15536_v7 = vpack.c.bf16 %v12712_v34, %v12711_v62  ;;  %v10817_v62 = vld [vmem:[#allocation2 + $0x144] sm:$0xff]  ;;  %v10818_v34 = vld [vmem:[#allocation2 + $0x154] sm:$0xff] }
 0x3bb   : > { %15073 = vmatprep.mubr.msk.f32.mxu1 %vm1437_vm3, %v9642_v8  ;;  %v10409_v8 = vld [vmem:[#allocation2 + $0x6b] sm:$0xff] }
 0x3bc   : > { %14464 = vmatmul.mubr.msk.f32.gmra.mrb[68].mxu0 %vm1437_vm3, %v18666_v58  ;;  %v12675_v58 = vld [vmem:[%s19294_s4 + $0x2f0] sm:$0xff] }
 0x3bd   : > { %14466 = vmatprep.mubr.msk.f32.mxu0 %vm1437_vm3, %v18670_v59  ;;  %v12676_v59 = vld [vmem:[%s19294_s4 + $0x2f8] sm:$0xff] }
 0x3be   : > { %15074 = vmatmul.mubr.msk.f32.gmra.mrb[10].mxu1 %vm1437_vm3, %v9643_v17  ;;  %v10410_v17 = vld [vmem:[#allocation2 + $0x7b] sm:$0xff] }
 0x3bf   : > { %15076 = vmatprep.mubr.msk.f32.mxu1 %vm1437_vm3, %v9644_v18  ;;  %v10411_v18 = vld [vmem:[#allocation2 + $0x83] sm:$0xff] }
 0x3c0   : > { %14467 = vmatmul.mubr.msk.f32.gmra.mrb[70].mxu0 %vm1437_vm3, %v18678_v0  ;;  %v10018_v0 = vld [vmem:[#allocation2 + $0x62] sm:$0xff] }
 0x3c1   : > { %14469 = vmatprep.mubr.msk.f32.mxu0 %vm1437_vm3, %v18682_v4  ;;  %v15528_v4 = vpack.c.bf16 %v12676_v59, %v12675_v58  ;;  %v10431_v58 = vld [vmem:[#allocation2 + $0x173] sm:$0xff]  ;;  %v10432_v59 = vld [vmem:[#allocation2 + $0x183] sm:$0xff] }
 0x3c2   : > { %15077 = vmatmul.mubr.msk.f32.gmra.mrb[12].mxu1 %vm1437_vm3, %v9645_v28  ;;  %v10412_v28 = vld [vmem:[#allocation2 + $0x93] sm:$0xff] }
 0x3c3   : > { %15079 = vmatprep.mubr.msk.f32.mxu1 %vm1437_vm3, %v9646_v31  ;;  %v10413_v31 = vld [vmem:[#allocation2 + $0x9b] sm:$0xff] }
 0x3c4   : > { %14470 = vmatmul.mubr.msk.f32.gmra.mrb[72].mxu0 %vm1437_vm3, %v18690_v5  ;;  %v10019_v5 = vld [vmem:[#allocation2 + $0x6a] sm:$0xff] }
 0x3c5   : > { %14472 = vmatprep.mubr.msk.f32.mxu0 %vm1437_vm3, %v18694_v61  ;;  %v12709_v61 = vld [vmem:[%s19294_s4 + $0x300] sm:$0xff] }
 0x3c6   : > { %15080 = vmatmul.mubr.msk.f32.gmra.mrb[14].mxu1 %vm1437_vm3, %v9647_v3  ;;  %v10414_v3 = vld [vmem:[#allocation2 + $0xab] sm:$0xff] }
 0x3c7   : > { %15082 = vmatprep.mubr.msk.f32.mxu1 %vm1437_vm3, %v9648_v39  ;;  %v10415_v39 = vld [vmem:[#allocation2 + $0xb3] sm:$0xff] }
 0x3c8   : > { %14473 = vmatmul.mubr.msk.f32.gmra.mrb[74].mxu0 %vm1437_vm3, %v18702_v13  ;;  %v12710_v13 = vld [vmem:[%s19294_s4 + $0x308] sm:$0xff] }
 0x3c9   : > { %14475 = vmatprep.mubr.msk.f32.mxu0 %vm1437_vm3, %v18706_v14  ;;  %v10020_v14 = vld [vmem:[#allocation2 + $0x7a] sm:$0xff] }
 0x3ca   : > { %15083 = vmatmul.mubr.msk.f32.gmra.mrb[16].mxu1 %vm1437_vm3, %v9649_v36  ;;  %v10416_v36 = vld [vmem:[#allocation2 + $0xc3] sm:$0xff] }
 0x3cb   : > { %15085 = vmatprep.mubr.msk.f32.mxu1 %vm1437_vm3, %v9650_v43  ;;  %v10417_v43 = vld [vmem:[#allocation2 + $0xcb] sm:$0xff] }
 0x3cc   : > { %14476 = vmatmul.mubr.msk.f32.gmra.mrb[76].mxu0 %vm1437_vm3, %v18714_v19  ;;  %v18875_v19 = vpack.c.bf16 %v12710_v13, %v12709_v61  ;;  %v10436_v61 = vld [vmem:[#allocation2 + $0x1b3] sm:$0xff]  ;;  %v10437_v13 = vld [vmem:[#allocation2 + $0x1bb] sm:$0xff] }
 0x3cd   : > { %14478 = vmatprep.mubr.msk.f32.mxu0 %vm1437_vm3, %v18718_v20  ;;  %v10021_v20 = vld [vmem:[#allocation2 + $0x82] sm:$0xff] }
 0x3ce   : > { %15086 = vmatmul.mubr.msk.f32.gmra.mrb[18].mxu1 %vm1437_vm3, %v9651_v46  ;;  %v10418_v46 = vld [vmem:[#allocation2 + $0xdb] sm:$0xff] }
 0x3cf   : > { %15088 = vmatprep.mubr.msk.f32.mxu1 %vm1437_vm3, %v9652_v12  ;;  %v10419_v12 = vld [vmem:[#allocation2 + $0xe3] sm:$0xff] }
 0x3d0   : > { %14479 = vmatmul.mubr.msk.f32.gmra.mrb[78].mxu0 %vm1437_vm3, %v18726_v21  ;;  %v10022_v21 = vld [vmem:[#allocation2 + $0x92] sm:$0xff] }
 0x3d1   : > { %14481 = vmatprep.mubr.msk.f32.mxu0 %vm1437_vm3, %v18730_v27  ;;  %v10023_v27 = vld [vmem:[#allocation2 + $0x9a] sm:$0xff] }
 0x3d2   : > { %15089 = vmatmul.mubr.msk.f32.gmra.mrb[20].mxu1 %vm1437_vm3, %v9653_v30  ;;  %v10420_v30 = vld [vmem:[#allocation2 + $0xf3] sm:$0xff] }
 0x3d3   : > { %15091 = vmatprep.mubr.msk.f32.mxu1 %vm1437_vm3, %v9654_v40  ;;  %v10421_v40 = vld [vmem:[#allocation2 + $0xfb] sm:$0xff] }
 0x3d4   : > { %14482 = vmatmul.mubr.msk.f32.gmra.mrb[80].mxu0 %vm1437_vm3, %v18737_v25  ;;  %v10025_v25 = vld [vmem:[#allocation2 + $0xb2] sm:$0xff] }
 0x3d5   : > { %14492 = vmatprep.mubr.msk.f32.mxu0 %vm1437_vm3, %v5726_v42  ;;  %v10422_v42 = vld [vmem:[#allocation2 + $0x10b] sm:$0xff] }
 0x3d6   : > { %15092 = vmatmul.mubr.msk.f32.gmra.mrb[22].mxu1 %vm1437_vm3, %v9655_v37  ;;  %v10423_v37 = vld [vmem:[#allocation2 + $0x113] sm:$0xff] }
 0x3d7   : > { %15094 = vmatprep.mubr.msk.f32.mxu1 %vm1437_vm3, %v9656_v16  ;;  %v10424_v16 = vld [vmem:[#allocation2 + $0x123] sm:$0xff] }
 0x3d8   : > { %14493 = vmatmul.mubr.msk.f32.vlgmr.msra.gmra.mrb[50].mxu0 %vm1437_vm3, %v5727_v44  ;;  %v10425_v44 = vld [vmem:[#allocation2 + $0x12b] sm:$0xff] }
 0x3d9   : > { %14495 = vmatprep.mubr.msk.f32.mxu0 %vm1437_vm3, %v5728_v35  ;;  %v10426_v35 = vld [vmem:[#allocation2 + $0x13b] sm:$0xff] }
 0x3da   : > { %15095 = vmatmul.mubr.msk.f32.gmra.mrb[24].mxu1 %vm1437_vm3, %v9657_v38  ;;  %v10427_v38 = vld [vmem:[#allocation2 + $0x143] sm:$0xff] }
 0x3db   : > { %15097 = vmatprep.mubr.msk.f32.mxu1 %vm1437_vm3, %v9658_v48  ;;  %v10428_v48 = vld [vmem:[#allocation2 + $0x153] sm:$0xff] }
 0x3dc   : > { %14496 = vmatmul.mubr.msk.f32.gmra.mrb[52].mxu0 %vm1437_vm3, %v5729_v54  ;;  %v10429_v54 = vld [vmem:[#allocation2 + $0x15b] sm:$0xff] }
 0x3de   : > { %15098 = vmatmul.mubr.msk.f32.gmra.mrb[26].mxu1 %vm1437_vm3, %v9659_v55  ;;  %v10430_v55 = vld [vmem:[#allocation2 + $0x16b] sm:$0xff] }
 0x3df   : > { %15108 = vmatprep.mubr.msk.f32.mxu1 %vm1437_vm3, %v10018_v0  ;;  %v10433_v0 = vld [vmem:[#allocation2 + $0x18b] sm:$0xff] }
 0x3e2   : > { %15109 = vmatmul.mubr.msk.f32.vlgmr.msra.gmra.mrb[28].mxu1 %vm1437_vm3, %v10019_v5  ;;  %v10435_v5 = vld [vmem:[#allocation2 + $0x1a3] sm:$0xff] }
 0x3e3   : > { %15527 = vmatpush3.bf16.msra.mxu1 %v18775_v26  ;;  %15111 = vmatprep.mubr.msk.f32.mxu1 %vm1437_vm3, %v10020_v14  ;;  %v10042_v26 = vld [vmem:[#allocation2 + $0x182] sm:$0xff]  ;;  %v10438_v14 = vld [vmem:[#allocation2 + $0x1cb] sm:$0xff] }
 0x3e4   : > { %15529 = vmatprep.subr.bf16.mxu1 %v15528_v4 }
 0x3e6   : > { %15112 = vmatmul.mubr.msk.f32.gmra.mrb[30].mxu1 %vm1437_vm3, %v10021_v20  ;;  %v10798_v20 = vld [vmem:[#allocation2 + $0x64] sm:$0xff] }
 0x3e7   : > { %15114 = vmatprep.mubr.msk.f32.mxu1 %vm1437_vm3, %v10022_v21  ;;  %15531 = vmatpush3.bf16.msra.mxu1 %v15528_v4  ;;  %v10434_v4 = vld [vmem:[#allocation2 + $0x19b] sm:$0xff]  ;;  %v10799_v21 = vld [vmem:[#allocation2 + $0x6c] sm:$0xff] }
 0x3e8   : > { %15533 = vmatprep.subr.bf16.mxu1 %v18875_v19 }
 0x3ea   : > { %15115 = vmatmul.mubr.msk.f32.gmra.mrb[0].mxu1 %vm1437_vm3, %v10023_v27  ;;  %v10800_v27 = vld [vmem:[#allocation2 + $0x7c] sm:$0xff] }
 0x3eb   : > { %15117 = vmatprep.mubr.msk.f32.mxu1 %vm1437_vm3, %v10024_v29  ;;  %v10801_v29 = vld [vmem:[#allocation2 + $0x84] sm:$0xff] }
 0x3ee   : > { %15118 = vmatmul.mubr.msk.f32.gmra.mrb[2].mxu1 %vm1437_vm3, %v10025_v25  ;;  %v10802_v25 = vld [vmem:[#allocation2 + $0x94] sm:$0xff] }
 0x3ef   : > { %15120 = vmatprep.mubr.msk.f32.mxu1 %vm1437_vm3, %v10026_v32  ;;  %v10803_v32 = vld [vmem:[#allocation2 + $0x9c] sm:$0xff] }
 0x3f2   : > { %15121 = vmatmul.mubr.msk.f32.gmra.mrb[4].mxu1 %vm1437_vm3, %v10027_v6  ;;  %v10804_v6 = vld [vmem:[#allocation2 + $0xac] sm:$0xff] }
 0x3f3   : > { %15123 = vmatprep.mubr.msk.f32.mxu1 %vm1437_vm3, %v10028_v1  ;;  %v10805_v1 = vld [vmem:[#allocation2 + $0xb4] sm:$0xff] }
 0x3f6   : > { %15124 = vmatmul.mubr.msk.f32.gmra.mrb[6].mxu1 %vm1437_vm3, %v10029_v51  ;;  %v10806_v51 = vld [vmem:[#allocation2 + $0xc4] sm:$0xff] }
 0x3f7   : > { %15126 = vmatprep.mubr.msk.f32.mxu1 %vm1437_vm3, %v10030_v41  ;;  %v10807_v41 = vld [vmem:[#allocation2 + $0xcc] sm:$0xff] }
 0x3fa   : > { %15127 = vmatmul.mubr.msk.f32.gmra.mrb[8].mxu1 %vm1437_vm3, %v10031_v9  ;;  %v10808_v9 = vld [vmem:[#allocation2 + $0xdc] sm:$0xff] }
 0x3fb   : > { %15129 = vmatprep.mubr.msk.f32.mxu1 %vm1437_vm3, %v10032_v50 }
 0x3fe   : > { %15130 = vmatmul.mubr.msk.f32.gmra.mrb[10].mxu1 %vm1437_vm3, %v10033_v53 }
 0x3ff   : > { %15132 = vmatprep.mubr.msk.f32.mxu1 %vm1437_vm3, %v10034_v60  ;;  %v10809_v60 = vld [vmem:[#allocation2 + $0xe4] sm:$0xff] }
 0x402   : > { %15133 = vmatmul.mubr.msk.f32.gmra.mrb[12].mxu1 %vm1437_vm3, %v10035_v49  ;;  %v10810_v49 = vld [vmem:[#allocation2 + $0xf4] sm:$0xff] }
 0x403   : > { %15135 = vmatprep.mubr.msk.f32.mxu1 %vm1437_vm3, %v10036_v57 }
 0x406   : > { %15136 = vmatmul.mubr.msk.f32.gmra.mrb[14].mxu1 %vm1437_vm3, %v10037_v47 }
 0x407   : > { %15138 = vmatprep.mubr.msk.f32.mxu1 %vm1437_vm3, %v10038_v63  ;;  %v10811_v63 = vld [vmem:[#allocation2 + $0xfc] sm:$0xff] }
 0x40a   : > { %15139 = vmatmul.mubr.msk.f32.gmra.mrb[16].mxu1 %vm1437_vm3, %v10039_v15  ;;  %v10812_v15 = vld [vmem:[#allocation2 + $0x10c] sm:$0xff] }
 0x40b   : > { %15141 = vmatprep.mubr.msk.f32.mxu1 %vm1437_vm3, %v10040_v10 }
 0x40e   : > { %15142 = vmatmul.mubr.msk.f32.gmra.mrb[18].mxu1 %vm1437_vm3, %v10041_v11 }
 0x40f   : > { %15144 = vmatprep.mubr.msk.f32.mxu1 %vm1437_vm3, %v10042_v26  ;;  %v10813_v26 = vld [vmem:[#allocation2 + $0x114] sm:$0xff] }
 0x412   : > { %15145 = vmatmul.mubr.msk.f32.gmra.mrb[20].mxu1 %vm1437_vm3, %v10043_v23  ;;  %v10814_v23 = vld [vmem:[#allocation2 + $0x124] sm:$0xff] }
 0x413   : > { %15147 = vmatprep.mubr.msk.f32.mxu1 %vm1437_vm3, %v10044_v52 }
 0x416   : > { %15148 = vmatmul.mubr.msk.f32.gmra.mrb[22].mxu1 %vm1437_vm3, %v10045_v24 }
 0x417   : > { %15150 = vmatprep.mubr.msk.f32.mxu1 %vm1437_vm3, %v10046_v45  ;;  %v10815_v45 = vld [vmem:[#allocation2 + $0x12c] sm:$0xff] }
 0x41a   : > { %15151 = vmatmul.mubr.msk.f32.gmra.mrb[24].mxu1 %vm1437_vm3, %v10047_v22  ;;  %v10816_v22 = vld [vmem:[#allocation2 + $0x13c] sm:$0xff] }
 0x41b   : > { %15153 = vmatprep.mubr.msk.f32.mxu1 %vm1437_vm3, %v10048_v33 }
 0x41e   : > { %15154 = vmatmul.mubr.msk.f32.gmra.mrb[26].mxu1 %vm1437_vm3, %v10049_v56 }
 0x41f   : > { %15164 = vmatprep.mubr.msk.f32.mxu1 %vm1437_vm3, %v10408_v2 }
 0x422   : > { %15165 = vmatmul.mubr.msk.f32.vlgmr.msra.gmra.mrb[28].mxu1 %vm1437_vm3, %v10409_v8  ;;  %v10819_v8 = vld [vmem:[#allocation2 + $0x15c] sm:$0xff] }
 0x423   : > { %15535 = vmatpush3.bf16.msra.mxu1 %v18875_v19  ;;  %15167 = vmatprep.mubr.msk.f32.mxu1 %vm1437_vm3, %v10410_v17  ;;  %v10439_v19 = vld [vmem:[#allocation2 + $0x1d3] sm:$0xff] }
 0x424   : > { %15537 = vmatprep.subr.bf16.mxu1 %v15536_v7  ;;  %v10820_v17 = vld [vmem:[#allocation2 + $0x16c] sm:$0xff] }
 0x426   : > { %15168 = vmatmul.mubr.msk.f32.gmra.mrb[30].mxu1 %vm1437_vm3, %v10411_v18 }
 0x427   : > { %15170 = vmatprep.mubr.msk.f32.mxu1 %vm1437_vm3, %v10412_v28  ;;  %15539 = vmatpush3.bf16.msra.mxu1 %v15536_v7 }
 0x42a   : > { %15171 = vmatmul.mubr.msk.f32.gmra.mrb[0].mxu1 %vm1437_vm3, %v10413_v31  ;;  %v10821_v31 = vld [vmem:[#allocation2 + $0x174] sm:$0xff] }
 0x42b   : > { %15173 = vmatprep.mubr.msk.f32.mxu1 %vm1437_vm3, %v10414_v3  ;;  %v10822_v3 = vld [vmem:[#allocation2 + $0x184] sm:$0xff] }
 0x42e   : > { %15174 = vmatmul.mubr.msk.f32.gmra.mrb[2].mxu1 %vm1437_vm3, %v10415_v39 }
 0x42f   : > { %15176 = vmatprep.mubr.msk.f32.mxu1 %vm1437_vm3, %v10416_v36 }
 0x432   : > { %15177 = vmatmul.mubr.msk.f32.gmra.mrb[4].mxu1 %vm1437_vm3, %v10417_v43  ;;  %v10823_v43 = vld [vmem:[#allocation2 + $0x18c] sm:$0xff] }
 0x433   : > { %15179 = vmatprep.mubr.msk.f32.mxu1 %vm1437_vm3, %v10418_v46  ;;  %v10824_v46 = vld [vmem:[#allocation2 + $0x19c] sm:$0xff] }
 0x436   : > { %15180 = vmatmul.mubr.msk.f32.gmra.mrb[6].mxu1 %vm1437_vm3, %v10419_v12 }
 0x437   : > { %15182 = vmatprep.mubr.msk.f32.mxu1 %vm1437_vm3, %v10420_v30 }
 0x43a   : > { %15183 = vmatmul.mubr.msk.f32.gmra.mrb[8].mxu1 %vm1437_vm3, %v10421_v40  ;;  %v10825_v40 = vld [vmem:[#allocation2 + $0x1a4] sm:$0xff] }
 0x43b   : > { %15185 = vmatprep.mubr.msk.f32.mxu1 %vm1437_vm3, %v10422_v42  ;;  %v10826_v42 = vld [vmem:[#allocation2 + $0x1b4] sm:$0xff] }
 0x43e   : > { %15186 = vmatmul.mubr.msk.f32.gmra.mrb[10].mxu1 %vm1437_vm3, %v10423_v37 }
 0x43f   : > { %15188 = vmatprep.mubr.msk.f32.mxu1 %vm1437_vm3, %v10424_v16 }
 0x442   : > { %15189 = vmatmul.mubr.msk.f32.gmra.mrb[12].mxu1 %vm1437_vm3, %v10425_v44  ;;  %v10827_v44 = vld [vmem:[#allocation2 + $0x1bc] sm:$0xff] }
 0x443   : > { %15191 = vmatprep.mubr.msk.f32.mxu1 %vm1437_vm3, %v10426_v35  ;;  %v10828_v35 = vld [vmem:[#allocation2 + $0x1cc] sm:$0xff] }
 0x446   : > { %15192 = vmatmul.mubr.msk.f32.gmra.mrb[14].mxu1 %vm1437_vm3, %v10427_v38 }
 0x447   : > { %15194 = vmatprep.mubr.msk.f32.mxu1 %vm1437_vm3, %v10428_v48 }
 0x44a   : > { %15195 = vmatmul.mubr.msk.f32.gmra.mrb[16].mxu1 %vm1437_vm3, %v10429_v54  ;;  %v10829_v54 = vld [vmem:[#allocation2 + $0x1d4] sm:$0xff] }
 0x44b   : > { %15197 = vmatprep.mubr.msk.f32.mxu1 %vm1437_vm3, %v10430_v55 }
 0x44e   : > { %15198 = vmatmul.mubr.msk.f32.gmra.mrb[18].mxu1 %vm1437_vm3, %v10431_v58 }
 0x44f   : > { %15200 = vmatprep.mubr.msk.f32.mxu1 %vm1437_vm3, %v10432_v59 }
 0x452   : > { %15201 = vmatmul.mubr.msk.f32.gmra.mrb[20].mxu1 %vm1437_vm3, %v10433_v0 }
 0x453   : > { %15203 = vmatprep.mubr.msk.f32.mxu1 %vm1437_vm3, %v10434_v4 }
 0x456   : > { %15204 = vmatmul.mubr.msk.f32.gmra.mrb[22].mxu1 %vm1437_vm3, %v10435_v5 }
 0x457   : > { %15206 = vmatprep.mubr.msk.f32.mxu1 %vm1437_vm3, %v10436_v61 }
 0x45a   : > { %15207 = vmatmul.mubr.msk.f32.gmra.mrb[24].mxu1 %vm1437_vm3, %v10437_v13 }
 0x45b   : > { %15209 = vmatprep.mubr.msk.f32.mxu1 %vm1437_vm3, %v10438_v14 }
 0x45e   : > { %15210 = vmatmul.mubr.msk.f32.gmra.mrb[26].mxu1 %vm1437_vm3, %v10439_v19 }
 0x45f   : > { %15220 = vmatprep.mubr.msk.f32.mxu1 %vm1437_vm3, %v10798_v20  ;;  %v11259_v20 = vld [vmem:[%s19296_s6] sm:$0xff] }
 0x462   : > { %15221 = vmatmul.mubr.msk.f32.vlgmr.msra.gmra.mrb[28].mxu1 %vm1437_vm3, %v10799_v21  ;;  %v11260_v21 = vld [vmem:[%s19296_s6 + $0x8] sm:$0xff] }
 0x463   : > { %15223 = vmatprep.mubr.msk.f32.mxu1 %vm1437_vm3, %v10800_v27  ;;  %v15540_v27 = vpack.c.bf16 %v11260_v21, %v11259_v20 }
 0x465   : > { %15541 = vmatprep.subr.bf16.mxu0 %v15540_v27 }
 0x466   : > { %15224 = vmatmul.mubr.msk.f32.gmra.mrb[30].mxu1 %vm1437_vm3, %v10801_v29  ;;  %15543 = vmatpush3.bf16.msra.mxu0 %v15540_v27  ;;  %v11261_v29 = vld [vmem:[%s19296_s6 + $0x10] sm:$0xff] }
 0x467   : > { %15226 = vmatprep.mubr.msk.f32.mxu1 %vm1437_vm3, %v10802_v25  ;;  %v11262_v25 = vld [vmem:[%s19296_s6 + $0x18] sm:$0xff] }
 0x46a   : > { %15227 = vmatmul.mubr.msk.f32.gmra.mrb[0].mxu1 %vm1437_vm3, %v10803_v32  ;;  %v15544_v32 = vpack.c.bf16 %v11262_v25, %v11261_v29 }
 0x46b   : > { %15229 = vmatprep.mubr.msk.f32.mxu1 %vm1437_vm3, %v10804_v6 }
 0x46c   : > { %15545 = vmatprep.subr.bf16.mxu0 %v15544_v32 }
 0x46d   : > { %15547 = vmatpush3.bf16.msra.mxu0 %v15544_v32 }
 0x46e   : > { %15230 = vmatmul.mubr.msk.f32.gmra.mrb[2].mxu1 %vm1437_vm3, %v10805_v1  ;;  %v19049_v1 = vld [vmem:[%s19295_s5] ss:$0 sm:$0xff] }
 0x46f   : > { %15232 = vmatprep.mubr.msk.f32.mxu1 %vm1437_vm3, %v10806_v51 }
 0x472   : > { %15233 = vmatmul.mubr.msk.f32.gmra.mrb[4].mxu1 %vm1437_vm3, %v10807_v41 }
 0x473   : > { %v18956_v50 = vpop.f32.mrb[54].mxu0  ;;  %15235 = vmatprep.mubr.msk.f32.mxu1 %vm1437_vm3, %v10808_v9 }
 0x474   : > { %v18959_v53 = vpop.f32.mrb[55].mxu0 }
 0x476   : > { %15236 = vmatmul.mubr.msk.f32.gmra.mrb[6].mxu1 %vm1437_vm3, %v10809_v60 }
 0x477   : > { %v18962_v57 = vpop.f32.mrb[56].mxu0  ;;  %15238 = vmatprep.mubr.msk.f32.mxu1 %vm1437_vm3, %v10810_v49 }
 0x478   : > { %v18965_v47 = vpop.f32.mrb[57].mxu0 }
 0x47a   : > { %15239 = vmatmul.mubr.msk.f32.gmra.mrb[8].mxu1 %vm1437_vm3, %v10811_v63 }
 0x47b   : > { %v18968_v10 = vpop.f32.mrb[58].mxu0  ;;  %15241 = vmatprep.mubr.msk.f32.mxu1 %vm1437_vm3, %v10812_v15 }
 0x47c   : > { %v18971_v11 = vpop.f32.mrb[59].mxu0 }
 0x47e   : > { %15242 = vmatmul.mubr.msk.f32.gmra.mrb[10].mxu1 %vm1437_vm3, %v10813_v26 }
 0x47f   : > { %v18974_v52 = vpop.f32.mrb[60].mxu0  ;;  %15244 = vmatprep.mubr.msk.f32.mxu1 %vm1437_vm3, %v10814_v23 }
 0x480   : > { %v18977_v24 = vpop.f32.mrb[61].mxu0 }
 0x482   : > { %15245 = vmatmul.mubr.msk.f32.gmra.mrb[12].mxu1 %vm1437_vm3, %v10815_v45 }
 0x483   : > { %v18980_v33 = vpop.f32.mrb[62].mxu0  ;;  %15247 = vmatprep.mubr.msk.f32.mxu1 %vm1437_vm3, %v10816_v22 }
 0x484   : > { %v18983_v56 = vpop.f32.mrb[63].mxu0 }
 0x486   : > { %15248 = vmatmul.mubr.msk.f32.gmra.mrb[14].mxu1 %vm1437_vm3, %v10817_v62 }
 0x487   : > { %v18986_v2 = vpop.f32.mrb[64].mxu0  ;;  %15250 = vmatprep.mubr.msk.f32.mxu1 %vm1437_vm3, %v10818_v34 }
 0x488   : > { %v18989_v7 = vpop.f32.mrb[65].mxu0 }
 0x48a   : > { %15251 = vmatmul.mubr.msk.f32.gmra.mrb[16].mxu1 %vm1437_vm3, %v10819_v8 }
 0x48b   : > { %v18992_v18 = vpop.f32.mrb[66].mxu0  ;;  %15253 = vmatprep.mubr.msk.f32.mxu1 %vm1437_vm3, %v10820_v17 }
 0x48c   : > { %v18995_v28 = vpop.f32.mrb[67].mxu0 }
 0x48e   : > { %15254 = vmatmul.mubr.msk.f32.gmra.mrb[18].mxu1 %vm1437_vm3, %v10821_v31 }
 0x48f   : > { %v18998_v39 = vpop.f32.mrb[68].mxu0  ;;  %15256 = vmatprep.mubr.msk.f32.mxu1 %vm1437_vm3, %v10822_v3 }
 0x490   : > { %v19001_v36 = vpop.f32.mrb[69].mxu0 }
 0x492   : > { %15257 = vmatmul.mubr.msk.f32.gmra.mrb[20].mxu1 %vm1437_vm3, %v10823_v43 }
 0x493   : > { %v19004_v12 = vpop.f32.mrb[70].mxu0  ;;  %15259 = vmatprep.mubr.msk.f32.mxu1 %vm1437_vm3, %v10824_v46 }
 0x494   : > { %v19007_v30 = vpop.f32.mrb[71].mxu0 }
 0x496   : > { %15260 = vmatmul.mubr.msk.f32.gmra.mrb[22].mxu1 %vm1437_vm3, %v10825_v40 }
 0x497   : > { %v19010_v37 = vpop.f32.mrb[72].mxu0  ;;  %15262 = vmatprep.mubr.msk.f32.mxu1 %vm1437_vm3, %v10826_v42 }
 0x498   : > { %v19013_v16 = vpop.f32.mrb[73].mxu0 }
 0x49a   : > { %15263 = vmatmul.mubr.msk.f32.gmra.mrb[24].mxu1 %vm1437_vm3, %v10827_v44 }
 0x49b   : > { %v19016_v38 = vpop.f32.mrb[74].mxu0  ;;  %15265 = vmatprep.mubr.msk.f32.mxu1 %vm1437_vm3, %v10828_v35 }
 0x49c   : > { %v19019_v48 = vpop.f32.mrb[75].mxu0 }
 0x49e   : > { %15266 = vmatmul.mubr.msk.f32.gmra.mrb[26].mxu1 %vm1437_vm3, %v10829_v54 }
 0x49f   : > { %v19022_v55 = vpop.f32.mrb[76].mxu0 }
 0x4a0   : > { %v19024_v58 = vpop.f32.mrb[77].mxu0 }
 0x4a3   : > { %v19026_v59 = vpop.f32.mrb[78].mxu0 }
 0x4a4   : > { %v19028_v0 = vpop.f32.mrb[79].mxu0 }
 0x4a7   : > { %v19030_v4 = vpop.f32.mrb[80].mxu0 }
 0x4a8   : > { %v19032_v5 = vpop.f32.mrb[81].mxu0 }
 0x4ab   : > { %v14494_v61 = vpop.f32.mrb[50].mxu0 }
 0x4ac   : > { %v5925_v13 = vpop.f32.mrb[51].mxu0 }
 0x4af   : > { %v14497_v14 = vpop.f32.mrb[52].mxu0 }
 0x4b0   : > { %v5935_v19 = vpop.f32.mrb[53].mxu0 }
 0x535   : > { %v15222_v6 = vpop.f32.mrb[28].mxu1 }
 0x536   : > { %v15552_v51 = vadd.f32 %v15222_v6, %v14494_v61  ;;  %v10997_v41 = vpop.f32.mrb[29].mxu1 }
 0x537   : > { %v15553_v9 = vadd.f32 %v10997_v41, %v5925_v13 }
 0x538   : > { %v11196_v60 = vadd.f32 %v15552_v51, %v19049_v1 }
 0x539   : > { %v11195_v49 = vadd.f32 %v15553_v9, %v19049_v1  ;;  %v15225_v63 = vpop.f32.mrb[30].mxu1 }
 0x53a   : > { %v15554_v15 = vadd.f32 %v15225_v63, %v14497_v14  ;;  %v11007_v26 = vpop.f32.mrb[31].mxu1  ;;  %v11228_v22 = vmax.f32 %v11196_v60, 0.0 }
 0x53b   : > { %v11227_v23 = vmax.f32 %v11195_v49, 0.0  ;;  %v15555_v45 = vadd.f32 %v11007_v26, %v5935_v19 }
 0x53c   : > { %v11198_v62 = vadd.f32 %v15554_v15, %v19049_v1 }
 0x53d   : > { %v11197_v34 = vadd.f32 %v15555_v45, %v19049_v1  ;;  %v15228_v8 = vpop.f32.mrb[0].mxu1  ;;  %15276 = vmatprep.mubr.msk.f32.mxu0 %vm1437_vm3, %v11227_v23 }
 0x53e   : > { %v15556_v17 = vadd.f32 %v15228_v8, %v18956_v50  ;;  %v11017_v31 = vpop.f32.mrb[1].mxu1  ;;  %15277 = vmatmul.mubr.msk.f32.vlgmr.msra.gmra.mrb[82].mxu0 %vm1437_vm3, %v11228_v22  ;;  %v11230_v46 = vmax.f32 %v11198_v62, 0.0 }
 0x53f   : > { %v11229_v3 = vmax.f32 %v11197_v34, 0.0  ;;  %v15557_v43 = vadd.f32 %v11017_v31, %v18959_v53 }
 0x540   : > { %v11200_v40 = vadd.f32 %v15556_v17, %v19049_v1 }
 0x541   : > { %v11199_v42 = vadd.f32 %v15557_v43, %v19049_v1  ;;  %v15231_v44 = vpop.f32.mrb[2].mxu1  ;;  %15279 = vmatprep.mubr.msk.f32.mxu0 %vm1437_vm3, %v11229_v3 }
 0x542   : > { %v15558_v35 = vadd.f32 %v15231_v44, %v18962_v57  ;;  %v11027_v54 = vpop.f32.mrb[3].mxu1  ;;  %15280 = vmatmul.mubr.msk.f32.gmra.mrb[84].mxu0 %vm1437_vm3, %v11230_v46  ;;  %v11232_v13 = vmax.f32 %v11200_v40, 0.0 }
 0x543   : > { %v11231_v50 = vmax.f32 %v11199_v42, 0.0  ;;  %v15559_v61 = vadd.f32 %v11027_v54, %v18965_v47 }
 0x544   : > { %v11202_v14 = vadd.f32 %v15558_v35, %v19049_v1 }
 0x545   : > { %v11201_v53 = vadd.f32 %v15559_v61, %v19049_v1  ;;  %v15234_v19 = vpop.f32.mrb[4].mxu1  ;;  %15282 = vmatprep.mubr.msk.f32.mxu0 %vm1437_vm3, %v11231_v50 }
 0x546   : > { %v15560_v20 = vadd.f32 %v15234_v19, %v18968_v10  ;;  %v11037_v21 = vpop.f32.mrb[5].mxu1  ;;  %15283 = vmatmul.mubr.msk.f32.gmra.mrb[86].mxu0 %vm1437_vm3, %v11232_v13  ;;  %v11234_v29 = vmax.f32 %v11202_v14, 0.0 }
 0x547   : > { %v11233_v57 = vmax.f32 %v11201_v53, 0.0  ;;  %v15561_v27 = vadd.f32 %v11037_v21, %v18971_v11 }
 0x548   : > { %v11204_v25 = vadd.f32 %v15560_v20, %v19049_v1 }
 0x549   : > { %v11203_v47 = vadd.f32 %v15561_v27, %v19049_v1  ;;  %v15237_v32 = vpop.f32.mrb[6].mxu1  ;;  %15285 = vmatprep.mubr.msk.f32.mxu0 %vm1437_vm3, %v11233_v57 }
 0x54a   : > { %v15562_v6 = vadd.f32 %v15237_v32, %v18974_v52  ;;  %v11047_v51 = vpop.f32.mrb[7].mxu1  ;;  %15286 = vmatmul.mubr.msk.f32.gmra.mrb[88].mxu0 %vm1437_vm3, %v11234_v29  ;;  %v11236_v9 = vmax.f32 %v11204_v25, 0.0 }
 0x54b   : > { %v11235_v10 = vmax.f32 %v11203_v47, 0.0  ;;  %v15563_v41 = vadd.f32 %v11047_v51, %v18977_v24 }
 0x54c   : > { %v11206_v60 = vadd.f32 %v15562_v6, %v19049_v1 }
 0x54d   : > { %v11205_v11 = vadd.f32 %v15563_v41, %v19049_v1  ;;  %v15240_v49 = vpop.f32.mrb[8].mxu1  ;;  %15288 = vmatprep.mubr.msk.f32.mxu0 %vm1437_vm3, %v11235_v10 }
 0x54e   : > { %v15564_v63 = vadd.f32 %v15240_v49, %v18980_v33  ;;  %v11057_v15 = vpop.f32.mrb[9].mxu1  ;;  %15289 = vmatmul.mubr.msk.f32.gmra.mrb[90].mxu0 %vm1437_vm3, %v11236_v9  ;;  %v11238_v23 = vmax.f32 %v11206_v60, 0.0 }
 0x54f   : > { %v11237_v52 = vmax.f32 %v11205_v11, 0.0  ;;  %v15565_v26 = vadd.f32 %v11057_v15, %v18983_v56 }
 0x550   : > { %v11208_v45 = vadd.f32 %v15564_v63, %v19049_v1 }
 0x551   : > { %v11207_v24 = vadd.f32 %v15565_v26, %v19049_v1  ;;  %v15243_v22 = vpop.f32.mrb[10].mxu1  ;;  %15291 = vmatprep.mubr.msk.f32.mxu0 %vm1437_vm3, %v11237_v52 }
 0x552   : > { %v15566_v62 = vadd.f32 %v15243_v22, %v18986_v2  ;;  %v11067_v34 = vpop.f32.mrb[11].mxu1  ;;  %15292 = vmatmul.mubr.msk.f32.gmra.mrb[92].mxu0 %vm1437_vm3, %v11238_v23  ;;  %v11240_v17 = vmax.f32 %v11208_v45, 0.0 }
 0x553   : > { %v11239_v33 = vmax.f32 %v11207_v24, 0.0  ;;  %v15567_v8 = vadd.f32 %v11067_v34, %v18989_v7 }
 0x554   : > { %v11210_v31 = vadd.f32 %v15566_v62, %v19049_v1 }
 0x555   : > { %v11209_v56 = vadd.f32 %v15567_v8, %v19049_v1  ;;  %v15246_v3 = vpop.f32.mrb[12].mxu1  ;;  %15294 = vmatprep.mubr.msk.f32.mxu0 %vm1437_vm3, %v11239_v33 }
 0x556   : > { %v15568_v43 = vadd.f32 %v15246_v3, %v18992_v18  ;;  %v11077_v46 = vpop.f32.mrb[13].mxu1  ;;  %15295 = vmatmul.mubr.msk.f32.gmra.mrb[94].mxu0 %vm1437_vm3, %v11240_v17  ;;  %v11242_v42 = vmax.f32 %v11210_v31, 0.0 }
 0x557   : > { %v11241_v2 = vmax.f32 %v11209_v56, 0.0  ;;  %v15569_v40 = vadd.f32 %v11077_v46, %v18995_v28 }
 0x558   : > { %v11212_v44 = vadd.f32 %v15568_v43, %v19049_v1 }
 0x559   : > { %v11211_v7 = vadd.f32 %v15569_v40, %v19049_v1  ;;  %v15249_v35 = vpop.f32.mrb[14].mxu1  ;;  %15297 = vmatprep.mubr.msk.f32.mxu0 %vm1437_vm3, %v11241_v2 }
 0x55a   : > { %v15570_v54 = vadd.f32 %v15249_v35, %v18998_v39  ;;  %v11087_v50 = vpop.f32.mrb[15].mxu1  ;;  %15298 = vmatmul.mubr.msk.f32.gmra.mrb[96].mxu0 %vm1437_vm3, %v11242_v42  ;;  %v11244_v13 = vmax.f32 %v11212_v44, 0.0 }
 0x55b   : > { %v11243_v18 = vmax.f32 %v11211_v7, 0.0  ;;  %v15571_v61 = vadd.f32 %v11087_v50, %v19001_v36  ;;  %v11591_v7 = vld [vmem:[%s19147_s24] sm:$0xff] }
 0x55c   : > { %v11214_v14 = vadd.f32 %v15570_v54, %v19049_v1 }
 0x55d   : > { %v11213_v28 = vadd.f32 %v15571_v61, %v19049_v1  ;;  %v15252_v53 = vpop.f32.mrb[16].mxu1  ;;  %15300 = vmatprep.mubr.msk.f32.mxu0 %vm1437_vm3, %v11243_v18  ;;  %v11594_v61 = vld [vmem:[%s19147_s24 + $0x18] sm:$0xff] }
 0x55e   : > { %v15572_v19 = vadd.f32 %v15252_v53, %v19004_v12  ;;  %v11097_v20 = vpop.f32.mrb[17].mxu1  ;;  %15301 = vmatmul.mubr.msk.f32.gmra.mrb[98].mxu0 %vm1437_vm3, %v11244_v13  ;;  %v11246_v57 = vmax.f32 %v11214_v14, 0.0  ;;  %v11593_v53 = vld [vmem:[%s19147_s24 + $0x10] sm:$0xff] }
 0x55f   : > { %v11245_v39 = vmax.f32 %v11213_v28, 0.0  ;;  %v15573_v21 = vadd.f32 %v11097_v20, %v19007_v30 }
 0x560   : > { %v11216_v27 = vadd.f32 %v15572_v19, %v19049_v1 }
 0x561   : > { %v11215_v36 = vadd.f32 %v15573_v21, %v19049_v1  ;;  %v15255_v29 = vpop.f32.mrb[18].mxu1  ;;  %15303 = vmatprep.mubr.msk.f32.mxu0 %vm1437_vm3, %v11245_v39 }
 0x562   : > { %v15574_v25 = vadd.f32 %v15255_v29, %v19010_v37  ;;  %v11107_v47 = vpop.f32.mrb[19].mxu1  ;;  %15304 = vmatmul.mubr.msk.f32.gmra.mrb[100].mxu0 %vm1437_vm3, %v11246_v57  ;;  %v11248_v6 = vmax.f32 %v11216_v27, 0.0  ;;  %v11596_v27 = vld [vmem:[%s19147_s24 + $0x28] sm:$0xff] }
 0x563   : > { %v11247_v12 = vmax.f32 %v11215_v36, 0.0  ;;  %v15575_v32 = vadd.f32 %v11107_v47, %v19013_v16  ;;  %v11595_v47 = vld [vmem:[%s19147_s24 + $0x20] sm:$0xff] }
 0x564   : > { %v11218_v51 = vadd.f32 %v15574_v25, %v19049_v1 }
 0x565   : > { %v11217_v30 = vadd.f32 %v15575_v32, %v19049_v1  ;;  %v15258_v10 = vpop.f32.mrb[20].mxu1  ;;  %15306 = vmatprep.mubr.msk.f32.mxu0 %vm1437_vm3, %v11247_v12 }
 0x566   : > { %v15576_v41 = vadd.f32 %v15258_v10, %v19016_v38  ;;  %v11117_v9 = vpop.f32.mrb[21].mxu1  ;;  %15307 = vmatmul.mubr.msk.f32.gmra.mrb[102].mxu0 %vm1437_vm3, %v11248_v6  ;;  %v11250_v11 = vmax.f32 %v11218_v51, 0.0  ;;  %v11598_v10 = vld [vmem:[%s19147_s24 + $0x38] sm:$0xff] }
 0x567   : > { %v11249_v37 = vmax.f32 %v11217_v30, 0.0  ;;  %v15577_v60 = vadd.f32 %v11117_v9, %v19019_v48 }
 0x568   : > { %v11220_v49 = vadd.f32 %v15576_v41, %v19049_v1 }
 0x569   : > { %v11219_v16 = vadd.f32 %v15577_v60, %v19049_v1  ;;  %v15261_v63 = vpop.f32.mrb[22].mxu1  ;;  %15309 = vmatprep.mubr.msk.f32.mxu0 %vm1437_vm3, %v11249_v37  ;;  %v11597_v60 = vld [vmem:[%s19147_s24 + $0x30] sm:$0xff] }
 0x56a   : > { %v15578_v15 = vadd.f32 %v15261_v63, %v19022_v55  ;;  %v11127_v52 = vpop.f32.mrb[23].mxu1  ;;  %15310 = vmatmul.mubr.msk.f32.gmra.mrb[104].mxu0 %vm1437_vm3, %v11250_v11  ;;  %v11252_v23 = vmax.f32 %v11220_v49, 0.0 }
 0x56b   : > { %v11251_v38 = vmax.f32 %v11219_v16, 0.0  ;;  %v15579_v26 = vadd.f32 %v11127_v52, %v19024_v58  ;;  %v11600_v52 = vld [vmem:[%s19147_s24 + $0x48] sm:$0xff] }
 0x56c   : > { %v11222_v45 = vadd.f32 %v15578_v15, %v19049_v1 }
 0x56d   : > { %v11221_v48 = vadd.f32 %v15579_v26, %v19049_v1  ;;  %v15264_v24 = vpop.f32.mrb[24].mxu1  ;;  %15312 = vmatprep.mubr.msk.f32.mxu0 %vm1437_vm3, %v11251_v38 }
 0x56e   : > { %v15580_v22 = vadd.f32 %v15264_v24, %v19026_v59  ;;  %v11137_v62 = vpop.f32.mrb[25].mxu1  ;;  %15313 = vmatmul.mubr.msk.f32.gmra.mrb[106].mxu0 %vm1437_vm3, %v11252_v23  ;;  %v11254_v33 = vmax.f32 %v11222_v45, 0.0  ;;  %v11599_v45 = vld [vmem:[%s19147_s24 + $0x40] sm:$0xff] }
 0x56f   : > { %v11253_v55 = vmax.f32 %v11221_v48, 0.0  ;;  %v15581_v34 = vadd.f32 %v11137_v62, %v19028_v0 }
 0x570   : > { %v11224_v8 = vadd.f32 %v15580_v22, %v19049_v1 }
 0x571   : > { %v11223_v58 = vadd.f32 %v15581_v34, %v19049_v1  ;;  %v15267_v17 = vpop.f32.mrb[26].mxu1  ;;  %15315 = vmatprep.mubr.msk.f32.mxu0 %vm1437_vm3, %v11253_v55  ;;  %v11602_v34 = vld [vmem:[%s19147_s24 + $0x58] sm:$0xff] }
 0x572   : > { %v15582_v31 = vadd.f32 %v15267_v17, %v19030_v4  ;;  %v11147_v56 = vpop.f32.mrb[27].mxu1  ;;  %15316 = vmatmul.mubr.msk.f32.gmra.mrb[108].mxu0 %vm1437_vm3, %v11254_v33  ;;  %v11256_v43 = vmax.f32 %v11224_v8, 0.0  ;;  %v19152_v4 = vld [vmem:[%s19297_s7] ss:$0 sm:$0xff]  ;;  %v11601_v17 = vld [vmem:[%s19147_s24 + $0x50] sm:$0xff] }
 0x573   : > { %v11255_v59 = vmax.f32 %v11223_v58, 0.0  ;;  %v15583_v3 = vadd.f32 %v11147_v56, %v19032_v5 }
 0x574   : > { %v11226_v0 = vadd.f32 %v15582_v31, %v19049_v1 }
 0x575   : > { %v11225_v46 = vadd.f32 %v15583_v3, %v19049_v1  ;;  %15318 = vmatprep.mubr.msk.f32.mxu0 %vm1437_vm3, %v11255_v59  ;;  %v11592_v1 = vld [vmem:[%s19147_s24 + $0x8] sm:$0xff] }
 0x576   : > { %15319 = vmatmul.mubr.msk.f32.gmra.mrb[110].mxu0 %vm1437_vm3, %v11256_v43  ;;  %v11258_v40 = vmax.f32 %v11226_v0, 0.0  ;;  %v11604_v0 = vld [vmem:[%s19147_s24 + $0x68] sm:$0xff] }
 0x577   : > { %v11257_v2 = vmax.f32 %v11225_v46, 0.0 }
 0x579   : > { %15321 = vmatprep.mubr.msk.f32.mxu0 %vm1437_vm3, %v11257_v2 }
 0x57a   : > { %15322 = vmatmul.mubr.msk.f32.gmra.mrb[112].mxu0 %vm1437_vm3, %v11258_v40 }
 0x611   : > { %v15278_v5 = vpop.f32.mrb[82].mxu0 }
 0x612   : > { %v11438_v42 = vadd.f32 %v15278_v5, %v19152_v4  ;;  %v11432_v44 = vpop.f32.mrb[83].mxu0  ;;  %v11603_v5 = vld [vmem:[%s19147_s24 + $0x60] sm:$0xff] }
 0x613   : > { %v11433_v35 = vadd.f32 %v19152_v4, %v11432_v44 }
 0x614   : > { %v11624_v54 = vadd.f32 %v11592_v1, %v11438_v42 }
 0x615   : > { %v11623_v50 = vadd.f32 %v11591_v7, %v11433_v35  ;;  %v15281_v18 = vpop.f32.mrb[84].mxu0 }
 0x616   : > { %v11656_v13 = vmax.f32 %v11624_v54, 0.0  ;;  %v11448_v14 = vadd.f32 %v15281_v18, %v19152_v4  ;;  %v11442_v28 = vpop.f32.mrb[85].mxu0  ;;  %v11606_v54 = vld [vmem:[%s19147_s24 + $0x78] sm:$0xff] }
 0x617   : > { %v11655_v19 = vmax.f32 %v11623_v50, 0.0  ;;  %v11443_v20 = vadd.f32 %v19152_v4, %v11442_v28 }
 0x618   : > { %11688 = vst.msk [vmem:[%s19161_s30 + $0x8] sm:$0xff] %vm391_vm0, %v11656_v13  ;;  %v11626_v39 = vadd.f32 %v11594_v61, %v11448_v14  ;;  %v11605_v13 = vld [vmem:[%s19147_s24 + $0x70] sm:$0xff] }
 0x619   : > { %11687 = vst.msk [vmem:[%s19161_s30] sm:$0xff] %vm391_vm0, %v11655_v19  ;;  %v11625_v21 = vadd.f32 %v11593_v53, %v11443_v20  ;;  %v15284_v57 = vpop.f32.mrb[86].mxu0 }
 0x61a   : > { %v11658_v36 = vmax.f32 %v11626_v39, 0.0  ;;  %v11458_v29 = vadd.f32 %v15284_v57, %v19152_v4  ;;  %v11452_v25 = vpop.f32.mrb[87].mxu0  ;;  %v11608_v39 = vld [vmem:[%s19147_s24 + $0x88] sm:$0xff] }
 0x61b   : > { %v11657_v12 = vmax.f32 %v11625_v21, 0.0  ;;  %v11453_v32 = vadd.f32 %v19152_v4, %v11452_v25 }
 0x61c   : > { %11690 = vst.msk [vmem:[%s19161_s30 + $0x18] sm:$0xff] %vm391_vm0, %v11658_v36  ;;  %v11628_v6 = vadd.f32 %v11596_v27, %v11458_v29  ;;  %v11607_v36 = vld [vmem:[%s19147_s24 + $0x80] sm:$0xff] }
 0x61d   : > { %11689 = vst.msk [vmem:[%s19161_s30 + $0x10] sm:$0xff] %vm391_vm0, %v11657_v12  ;;  %v11627_v51 = vadd.f32 %v11595_v47, %v11453_v32  ;;  %v15287_v30 = vpop.f32.mrb[88].mxu0 }
 0x61e   : > { %v11660_v41 = vmax.f32 %v11628_v6, 0.0  ;;  %v11468_v9 = vadd.f32 %v15287_v30, %v19152_v4  ;;  %v11462_v37 = vpop.f32.mrb[89].mxu0  ;;  %v11610_v6 = vld [vmem:[%s19147_s24 + $0x98] sm:$0xff] }
 0x61f   : > { %v11659_v11 = vmax.f32 %v11627_v51, 0.0  ;;  %v11463_v49 = vadd.f32 %v19152_v4, %v11462_v37 }
 0x620   : > { %11692 = vst.msk [vmem:[%s19161_s30 + $0x28] sm:$0xff] %vm391_vm0, %v11660_v41  ;;  %v11630_v16 = vadd.f32 %v11598_v10, %v11468_v9  ;;  %v11609_v41 = vld [vmem:[%s19147_s24 + $0x90] sm:$0xff] }
 0x621   : > { %11691 = vst.msk [vmem:[%s19161_s30 + $0x20] sm:$0xff] %vm391_vm0, %v11659_v11  ;;  %v11629_v63 = vadd.f32 %v11597_v60, %v11463_v49  ;;  %v15290_v15 = vpop.f32.mrb[90].mxu0 }
 0x622   : > { %v11662_v38 = vmax.f32 %v11630_v16, 0.0  ;;  %v11478_v26 = vadd.f32 %v15290_v15, %v19152_v4  ;;  %v11472_v23 = vpop.f32.mrb[91].mxu0  ;;  %v11612_v16 = vld [vmem:[%s19147_s24 + $0xa8] sm:$0xff] }
 0x623   : > { %v11661_v48 = vmax.f32 %v11629_v63, 0.0  ;;  %v11473_v24 = vadd.f32 %v19152_v4, %v11472_v23 }
 0x624   : > { %11694 = vst.msk [vmem:[%s19161_s30 + $0x38] sm:$0xff] %vm391_vm0, %v11662_v38  ;;  %v11632_v22 = vadd.f32 %v11600_v52, %v11478_v26  ;;  %v11611_v38 = vld [vmem:[%s19147_s24 + $0xa0] sm:$0xff] }
 0x625   : > { %11693 = vst.msk [vmem:[%s19161_s30 + $0x30] sm:$0xff] %vm391_vm0, %v11661_v48  ;;  %v11631_v62 = vadd.f32 %v11599_v45, %v11473_v24  ;;  %v15293_v55 = vpop.f32.mrb[92].mxu0 }
 0x626   : > { %v11664_v33 = vmax.f32 %v11632_v22, 0.0  ;;  %v11488_v8 = vadd.f32 %v15293_v55, %v19152_v4  ;;  %v11482_v58 = vpop.f32.mrb[93].mxu0  ;;  %v11614_v22 = vld [vmem:[%s19147_s24 + $0xb8] sm:$0xff] }
 0x627   : > { %v11663_v31 = vmax.f32 %v11631_v62, 0.0  ;;  %v11483_v56 = vadd.f32 %v19152_v4, %v11482_v58 }
 0x628   : > { %11696 = vst.msk [vmem:[%s19161_s30 + $0x48] sm:$0xff] %vm391_vm0, %v11664_v33  ;;  %v11634_v59 = vadd.f32 %v11602_v34, %v11488_v8  ;;  %v11613_v33 = vld [vmem:[%s19147_s24 + $0xb0] sm:$0xff] }
 0x629   : > { %11695 = vst.msk [vmem:[%s19161_s30 + $0x40] sm:$0xff] %vm391_vm0, %v11663_v31  ;;  %v11633_v3 = vadd.f32 %v11601_v17, %v11483_v56  ;;  %v15296_v43 = vpop.f32.mrb[94].mxu0 }
 0x62a   : > { %v11666_v46 = vmax.f32 %v11634_v59, 0.0  ;;  %v11498_v2 = vadd.f32 %v15296_v43, %v19152_v4  ;;  %v11492_v40 = vpop.f32.mrb[95].mxu0  ;;  %v11616_v59 = vld [vmem:[%s19147_s24 + $0xc8] sm:$0xff] }
 0x62b   : > { %v11665_v1 = vmax.f32 %v11633_v3, 0.0  ;;  %v11493_v42 = vadd.f32 %v19152_v4, %v11492_v40 }
 0x62c   : > { %11698 = vst.msk [vmem:[%s19161_s30 + $0x58] sm:$0xff] %vm391_vm0, %v11666_v46  ;;  %v11636_v44 = vadd.f32 %v11604_v0, %v11498_v2  ;;  %v11615_v46 = vld [vmem:[%s19147_s24 + $0xc0] sm:$0xff] }
 0x62d   : > { %11697 = vst.msk [vmem:[%s19161_s30 + $0x50] sm:$0xff] %vm391_vm0, %v11665_v1  ;;  %v11635_v7 = vadd.f32 %v11603_v5, %v11493_v42  ;;  %v15299_v35 = vpop.f32.mrb[96].mxu0 }
 0x62e   : > { %v11668_v50 = vmax.f32 %v11636_v44, 0.0  ;;  %v11508_v18 = vadd.f32 %v15299_v35, %v19152_v4  ;;  %v11502_v61 = vpop.f32.mrb[97].mxu0  ;;  %v11618_v44 = vld [vmem:[%s19147_s24 + $0xd8] sm:$0xff] }
 0x62f   : > { %v11667_v14 = vmax.f32 %v11635_v7, 0.0  ;;  %v11503_v28 = vadd.f32 %v19152_v4, %v11502_v61 }
 0x630   : > { %11700 = vst.msk [vmem:[%s19161_s30 + $0x68] sm:$0xff] %vm391_vm0, %v11668_v50  ;;  %v11638_v53 = vadd.f32 %v11606_v54, %v11508_v18  ;;  %v11617_v50 = vld [vmem:[%s19147_s24 + $0xd0] sm:$0xff] }
 0x631   : > { %11699 = vst.msk [vmem:[%s19161_s30 + $0x60] sm:$0xff] %vm391_vm0, %v11667_v14  ;;  %v11637_v19 = vadd.f32 %v11605_v13, %v11503_v28  ;;  %v15302_v20 = vpop.f32.mrb[98].mxu0 }
 0x632   : > { %v11670_v21 = vmax.f32 %v11638_v53, 0.0  ;;  %v11518_v57 = vadd.f32 %v15302_v20, %v19152_v4  ;;  %v11512_v27 = vpop.f32.mrb[99].mxu0  ;;  %v11620_v53 = vld [vmem:[%s19147_s24 + $0xe8] sm:$0xff] }
 0x633   : > { %v11669_v29 = vmax.f32 %v11637_v19, 0.0  ;;  %v11513_v25 = vadd.f32 %v19152_v4, %v11512_v27 }
 0x634   : > { %11702 = vst.msk [vmem:[%s19161_s30 + $0x78] sm:$0xff] %vm391_vm0, %v11670_v21  ;;  %v11640_v47 = vadd.f32 %v11608_v39, %v11518_v57  ;;  %v11619_v21 = vld [vmem:[%s19147_s24 + $0xe0] sm:$0xff] }
 0x635   : > { %11701 = vst.msk [vmem:[%s19161_s30 + $0x70] sm:$0xff] %vm391_vm0, %v11669_v29  ;;  %v11639_v12 = vadd.f32 %v11607_v36, %v11513_v25  ;;  %v15305_v32 = vpop.f32.mrb[100].mxu0 }
 0x636   : > { %v11672_v51 = vmax.f32 %v11640_v47, 0.0  ;;  %v11528_v30 = vadd.f32 %v15305_v32, %v19152_v4  ;;  %v11522_v10 = vpop.f32.mrb[101].mxu0  ;;  %v11622_v47 = vld [vmem:[%s19147_s24 + $0xf8] sm:$0xff] }
 0x637   : > { %v11671_v9 = vmax.f32 %v11639_v12, 0.0  ;;  %v11523_v37 = vadd.f32 %v19152_v4, %v11522_v10 }
 0x638   : > { %11704 = vst.msk [vmem:[%s19161_s30 + $0x88] sm:$0xff] %vm391_vm0, %v11672_v51  ;;  %v11642_v60 = vadd.f32 %v11610_v6, %v11528_v30  ;;  %v11621_v51 = vld [vmem:[%s19147_s24 + $0xf0] sm:$0xff] }
 0x639   : > { %11703 = vst.msk [vmem:[%s19161_s30 + $0x80] sm:$0xff] %vm391_vm0, %v11671_v9  ;;  %v11641_v11 = vadd.f32 %v11609_v41, %v11523_v37  ;;  %v15308_v49 = vpop.f32.mrb[102].mxu0 }
 0x63a   : > { %v11674_v63 = vmax.f32 %v11642_v60, 0.0  ;;  %v11538_v15 = vadd.f32 %v15308_v49, %v19152_v4  ;;  %v11532_v52 = vpop.f32.mrb[103].mxu0 }
 0x63b   : > { %v11673_v26 = vmax.f32 %v11641_v11, 0.0  ;;  %v11533_v23 = vadd.f32 %v19152_v4, %v11532_v52 }
 0x63c   : > { %11706 = vst.msk [vmem:[%s19161_s30 + $0x98] sm:$0xff] %vm391_vm0, %v11674_v63  ;;  %v11644_v45 = vadd.f32 %v11612_v16, %v11538_v15 }
 0x63d   : > { %11705 = vst.msk [vmem:[%s19161_s30 + $0x90] sm:$0xff] %vm391_vm0, %v11673_v26  ;;  %v11643_v48 = vadd.f32 %v11611_v38, %v11533_v23  ;;  %v15311_v24 = vpop.f32.mrb[104].mxu0 }
 0x63e   : > { %v11676_v62 = vmax.f32 %v11644_v45, 0.0  ;;  %v11548_v55 = vadd.f32 %v15311_v24, %v19152_v4  ;;  %v11542_v34 = vpop.f32.mrb[105].mxu0 }
 0x63f   : > { %v11675_v8 = vmax.f32 %v11643_v48, 0.0  ;;  %v11543_v58 = vadd.f32 %v19152_v4, %v11542_v34 }
 0x640   : > { %11708 = vst.msk [vmem:[%s19161_s30 + $0xa8] sm:$0xff] %vm391_vm0, %v11676_v62  ;;  %v11646_v17 = vadd.f32 %v11614_v22, %v11548_v55 }
 0x641   : > { %11707 = vst.msk [vmem:[%s19161_s30 + $0xa0] sm:$0xff] %vm391_vm0, %v11675_v8  ;;  %v11645_v31 = vadd.f32 %v11613_v33, %v11543_v58  ;;  %v15314_v56 = vpop.f32.mrb[106].mxu0 }
 0x642   : > { %v11678_v3 = vmax.f32 %v11646_v17, 0.0  ;;  %v11558_v43 = vadd.f32 %v15314_v56, %v19152_v4  ;;  %v11552_v0 = vpop.f32.mrb[107].mxu0 }
 0x643   : > { %v11677_v2 = vmax.f32 %v11645_v31, 0.0  ;;  %v11553_v40 = vadd.f32 %v19152_v4, %v11552_v0 }
 0x644   : > { %11710 = vst.msk [vmem:[%s19161_s30 + $0xb8] sm:$0xff] %vm391_vm0, %v11678_v3  ;;  %v11648_v5 = vadd.f32 %v11616_v59, %v11558_v43 }
 0x645   : > { %11709 = vst.msk [vmem:[%s19161_s30 + $0xb0] sm:$0xff] %vm391_vm0, %v11677_v2  ;;  %v11647_v1 = vadd.f32 %v11615_v46, %v11553_v40  ;;  %v15317_v42 = vpop.f32.mrb[108].mxu0 }
 0x646   : > { %v11680_v7 = vmax.f32 %v11648_v5, 0.0  ;;  %v11568_v35 = vadd.f32 %v15317_v42, %v19152_v4  ;;  %v11562_v54 = vpop.f32.mrb[109].mxu0 }
 0x647   : > { %v11679_v18 = vmax.f32 %v11647_v1, 0.0  ;;  %v11563_v61 = vadd.f32 %v19152_v4, %v11562_v54 }
 0x648   : > { %11712 = vst.msk [vmem:[%s19161_s30 + $0xc8] sm:$0xff] %vm391_vm0, %v11680_v7  ;;  %v11650_v13 = vadd.f32 %v11618_v44, %v11568_v35 }
 0x649   : > { %11711 = vst.msk [vmem:[%s19161_s30 + $0xc0] sm:$0xff] %vm391_vm0, %v11679_v18  ;;  %v11649_v14 = vadd.f32 %v11617_v50, %v11563_v61  ;;  %v15320_v28 = vpop.f32.mrb[110].mxu0 }
 0x64a   : > { %v11682_v19 = vmax.f32 %v11650_v13, 0.0  ;;  %v11578_v20 = vadd.f32 %v15320_v28, %v19152_v4  ;;  %v11572_v39 = vpop.f32.mrb[111].mxu0 }
 0x64b   : > { %v11681_v57 = vmax.f32 %v11649_v14, 0.0  ;;  %v11573_v27 = vadd.f32 %v19152_v4, %v11572_v39 }
 0x64c   : > { %11714 = vst.msk [vmem:[%s19161_s30 + $0xd8] sm:$0xff] %vm391_vm0, %v11682_v19  ;;  %v11652_v36 = vadd.f32 %v11620_v53, %v11578_v20 }
 0x64d   : > { %11713 = vst.msk [vmem:[%s19161_s30 + $0xd0] sm:$0xff] %vm391_vm0, %v11681_v57  ;;  %v11651_v29 = vadd.f32 %v11619_v21, %v11573_v27  ;;  %v15323_v25 = vpop.f32.mrb[112].mxu0 }
 0x64e   : > { %v11684_v12 = vmax.f32 %v11652_v36, 0.0  ;;  %v11588_v32 = vadd.f32 %v15323_v25, %v19152_v4  ;;  %v11582_v6 = vpop.f32.mrb[113].mxu0 }
 0x64f   : > { %v11683_v30 = vmax.f32 %v11651_v29, 0.0  ;;  %v11583_v10 = vadd.f32 %v19152_v4, %v11582_v6 }
 0x650   : > { %11716 = vst.msk [vmem:[%s19161_s30 + $0xe8] sm:$0xff] %vm391_vm0, %v11684_v12  ;;  %v11654_v41 = vadd.f32 %v11622_v47, %v11588_v32 }
 0x651   : > { %11715 = vst.msk [vmem:[%s19161_s30 + $0xe0] sm:$0xff] %vm391_vm0, %v11683_v30  ;;  %v11653_v9 = vadd.f32 %v11621_v51, %v11583_v10 }
 0x652   : > { %v11686_v37 = vmax.f32 %v11654_v41, 0.0 }
 0x653   : > { %v11685_v60 = vmax.f32 %v11653_v9, 0.0 }
 0x654   : > { %11718 = vst.msk [vmem:[%s19161_s30 + $0xf8] sm:$0xff] %vm391_vm0, %v11686_v37 }
 0x655   : > { %11717 = vst.msk [vmem:[%s19161_s30 + $0xf0] sm:$0xff] %vm391_vm0, %v11685_v60 }
 0x656 PF: > { %s18_s27 = sadd.s32 1, %s16340_s27  }
 0x657   : > { %p15_p4 = scmp.ge.s32.totalorder %s18_s27, 4  }
 0x659   :  { %17 = sbr.rel (!%p15_p4) target bundleno = 1 (0x1), region = 113 }

</bundles_post_ra>
